<compile_context>
chip_gen: v7x
topology: tpu7x:2x2x1
jax: 0.10.0
libtpu: 0.0.40
codegen_flags: <defaults>
</compile_context>

<pallas_src>
import jax
import jax.numpy as jnp
from jax import lax
from jax.experimental import pallas as pl
from jax.experimental.pallas import tpu as pltpu

KH = 25            # conv kernel height (both convs)
POOL_STRIDE = 20   # MaxPool2d(kernel_size=1, stride=20) == stride-20 subsample
OUT_DIM = 10       # fc3 true output width
OUT_PAD = 128      # lane-dense padded output width
TM_MAX = 256       # batch-tile rows (matches v6e/v7x MXU M; drop to 128 for v5e tuning)


def _round_up(x, m):
    return ((x + m - 1) // m) * m


def _padded_bytes(shape, itemsize):
    """VMEM footprint of an array: last two dims padded to the (8, 128) tile."""
    if len(shape) == 1:
        shape = (1,) + tuple(shape)
    lead = 1
    for d in shape[:-2]:
        lead *= int(d)
    return lead * _round_up(int(shape[-2]), 8) * _round_up(int(shape[-1]), 128) * itemsize


# ----------------------------- fused Pallas kernel ---------------------------
def _cnet_fused_kernel(a1_ref, w1_ref, b1_ref, w2_ref, b2_ref,
                       w3_ref, b3_ref, w4_ref, b4_ref, w5_ref, b5_ref,
                       o_ref):
    n_pos, tm, kh = a1_ref.shape
    c1 = w1_ref.shape[1]                  # 64 conv1 output channels
    wt = w1_ref.dtype                     # MXU input dtype (bf16 by default)

    # conv1 + bias + ReLU over all (tap, batch-row) pairs as ONE matmul.
    # (n_pos, TM, KH) -> (n_pos*TM, KH) is a sublane-only merge (TM % 8 == 0).
    a1 = a1_ref[...].reshape(n_pos * tm, kh).astype(wt)
    h1 = jnp.dot(a1, w1_ref[...], preferred_element_type=jnp.float32)
    h1 = jnp.maximum(h1 + b1_ref[...], 0.0)                     # (n_pos*TM, 64) f32

    # conv2 (kernel spans the whole pooled map == flatten) as ONE batched
    # contraction over the 25 taps, then a log-depth VPU add tree.  Replaces
    # the old per-tap Python loop (serialized MXU-pop -> vadd chain).
    h1b = h1.astype(wt).reshape(n_pos, tm, c1)                  # sublane-only split
    h2p = lax.dot_general(h1b, w2_ref[...],
                          dimension_numbers=(((2,), (1,)), ((0,), (0,))),
                          preferred_element_type=jnp.float32)   # (n_pos, TM, 128)
    parts = [h2p[k] for k in range(n_pos)]
    while len(parts) > 1:
        nxt = [parts[i] + parts[i + 1] for i in range(0, len(parts) - 1, 2)]
        if len(parts) % 2:
            nxt.append(parts[-1])
        parts = nxt
    h2 = jnp.maximum(parts[0] + b2_ref[...], 0.0)               # (TM, 128)

    # FC stack; weights pre-stored (in, out) so there are no in-kernel transposes.
    h3 = jnp.maximum(
        jnp.dot(h2.astype(wt), w3_ref[...],
                preferred_element_type=jnp.float32) + b3_ref[...], 0.0)
    h4 = jnp.maximum(
        jnp.dot(h3.astype(wt), w4_ref[...],
                preferred_element_type=jnp.float32) + b4_ref[...], 0.0)
    logits = jnp.dot(h4.astype(wt), w5_ref[...],
                     preferred_element_type=jnp.float32) + b5_ref[...]
    o_ref[...] = jax.nn.sigmoid(logits).astype(o_ref.dtype)     # (TM, 128) lane-dense


def _fused_call(a1, weights, *, bp, tm, n_pos):
    grid_m = bp // tm
    c1 = weights[0].shape[1]      # 64
    c2 = weights[2].shape[2]      # 128
    f1 = weights[4].shape[1]      # 1024
    f2 = weights[6].shape[1]      # 512

    in_specs = [pl.BlockSpec((n_pos, tm, KH), lambda i: (0, i, 0))]
    for w in weights:             # weights/biases: fetched once, VMEM-resident
        in_specs.append(pl.BlockSpec(w.shape, lambda i, _nd=w.ndim: (0,) * _nd))

    flops = 2 * bp * (n_pos * KH * c1 + n_pos * c1 * c2 + c2 * f1 + f1 * f2 + f2 * OUT_PAD)
    bytes_accessed = (int(a1.size) * a1.dtype.itemsize
                      + sum(int(w.size) * w.dtype.itemsize for w in weights)
                      + bp * OUT_PAD * 4)
    cost = pl.CostEstimate(flops=int(flops),
                           transcendentals=int(bp * OUT_PAD),
                           bytes_accessed=int(bytes_accessed))

    # Raise the scoped-VMEM limit only when the per-tile footprint needs it
    # (large TM); small-batch calls keep the conservative defaults.
    est = (2 * (_padded_bytes((n_pos, tm, KH), 4)
                + sum(_padded_bytes(w.shape, w.dtype.itemsize) for w in weights)
                + _padded_bytes((tm, OUT_PAD), 4))
           + _padded_bytes((n_pos * tm, c1), 4) + _padded_bytes((n_pos * tm, c1), 2)
           + _padded_bytes((n_pos, tm, c2), 4)
           + _padded_bytes((tm, f1), 4) + _padded_bytes((tm, f1), 2)
           + _padded_bytes((tm, f2), 4) + _padded_bytes((tm, f2), 2)
           + 2 * _padded_bytes((tm, OUT_PAD), 4))
    cp_kwargs = dict(dimension_semantics=("parallel",))
    if est > (12 << 20):
        cp_kwargs["vmem_limit_bytes"] = int(min(est + (16 << 20), 64 << 20))

    return pl.pallas_call(
        _cnet_fused_kernel,
        out_shape=jax.ShapeDtypeStruct((bp, OUT_PAD), jnp.float32),
        grid=(grid_m,),
        in_specs=in_specs,
        out_specs=pl.BlockSpec((tm, OUT_PAD), lambda i: (i, 0)),
        compiler_params=pltpu.CompilerParams(**cp_kwargs),
        cost_estimate=cost,
    )(a1, *weights)


# ----------------------------- parameters ------------------------------------
def init_params(key):
    """Parameters in PyTorch layouts (conv: (Cout,Cin,KH,KW), linear: (out,in))."""
    ks = jax.random.split(key, 10)

    def w(k, shape, scale):
        return jax.random.normal(k, shape, jnp.float32) * scale

    return {
        "conv1_w": w(ks[0], (64, 1, 25, 1), 0.30),
        "conv1_b": w(ks[1], (64,), 0.30),
        "conv2_w": w(ks[2], (128, 64, 25, 1), 0.05),
        "conv2_b": w(ks[3], (128,), 0.05),
        "fc1_w": w(ks[4], (1024, 128), 0.08),
        "fc1_b": w(ks[5], (1024,), 0.08),
        "fc2_w": w(ks[6], (512, 1024), 0.04),
        "fc2_b": w(ks[7], (512,), 0.04),
        "fc3_w": w(ks[8], (10, 512), 0.03),
        "fc3_b": w(ks[9], (10,), 0.03),
    }


def prepare_params(params, dtype=jnp.bfloat16):
    """One-time re-layout of PyTorch weights into kernel-ready form.

    Weights default to bf16 (halves HBM weight traffic; MXU-native on all
    gens); biases stay f32 and all matmuls accumulate in f32.  Pass
    dtype=jnp.float32 for exact-PyTorch numerics.
    """
    w1 = params["conv1_w"][:, 0, :, 0].T.astype(dtype)                     # (25, 64)
    b1 = params["conv1_b"].reshape(1, -1).astype(jnp.float32)              # (1, 64)
    # conv2 weight as (tap k, in-channel c, out-channel o)
    w2 = jnp.transpose(params["conv2_w"][:, :, :, 0], (2, 1, 0)).astype(dtype)  # (25,64,128)
    b2 = params["conv2_b"].reshape(1, -1).astype(jnp.float32)              # (1, 128)
    w3 = params["fc1_w"].T.astype(dtype)                                   # (128, 1024)
    b3 = params["fc1_b"].reshape(1, -1).astype(jnp.float32)
    w4 = params["fc2_w"].T.astype(dtype)                                   # (1024, 512)
    b4 = params["fc2_b"].reshape(1, -1).astype(jnp.float32)
    # fc3 padded 10 -> 128 output lanes for an unmasked lane-dense store.
    w5 = jnp.zeros((512, OUT_PAD), dtype).at[:, :OUT_DIM].set(
        params["fc3_w"].T.astype(dtype))
    b5 = jnp.zeros((1, OUT_PAD), jnp.float32).at[0, :OUT_DIM].set(
        params["fc3_b"].astype(jnp.float32))
    return (w1, b1, w2, b2, w3, b3, w4, b4, w5, b5)


# ------------------------------- forward -------------------------------------
def cnet_forward(prepared, x, *, tile_m=TM_MAX):
    # x: (N, 1, H, 1) NCHW, exactly like the PyTorch module (H = 505).
    N, C, H, W = x.shape
    assert C == 1 and W == 1
    H1 = H - KH + 1                           # conv1 output height (481)
    n_pos = (H1 - 1) // POOL_STRIDE + 1       # pooled height (25)
    assert n_pos - KH + 1 == 1, "conv2 must reduce the pooled map to 1x1 (flatten -> 128)"

    # Batch tile: a multiple of 8 sublanes; pad the batch up to a whole number
    # of tiles (padded rows are sliced off at the end).
    tm = min(tile_m, _round_up(N, 8))
    bp = _round_up(N, tm)
    x2d = x[:, 0, :, 0]                       # (N, H)
    if bp != N:
        x2d = jnp.pad(x2d, ((0, bp - N), (0, 0)))

    # MaxPool2d(kernel=1, stride=20) is a pure subsample, so conv1+ReLU is only
    # computed at the sampled rows.  im2col patches, tap-major layout:
    # a1[k, n, i] = x[n, k*20 + i].
    # TODO(synk): fold this gather into the kernel's input pipeline (pass x
    # tiles directly) to drop the extra HBM round-trip of a1 at large batch.
    idx = (jnp.arange(n_pos) * POOL_STRIDE)[:, None] + jnp.arange(KH)[None, :]
    a1 = jnp.transpose(x2d[:, idx], (1, 0, 2))        # (n_pos, bp, KH)

    out = _fused_call(a1, prepared, bp=bp, tm=tm, n_pos=n_pos)  # (bp, 128)
    return out[:N, :OUT_DIM]


# --------------------------- pure-JAX reference -------------------------------
def cnet_reference(params, x):
    hp = jax.lax.Precision.HIGHEST
    x2d = x[:, 0, :, 0]
    n_pos = (x.shape[2] - KH) // POOL_STRIDE + 1
    idx = (jnp.arange(n_pos) * POOL_STRIDE)[:, None] + jnp.arange(KH)[None, :]
    patches = x2d[:, idx]                                         # (N, 25, 25)
    w1 = params["conv1_w"][:, 0, :, 0]                            # (64, 25)
    h1 = jax.nn.relu(jnp.einsum("npi,ci->npc", patches, w1, precision=hp)
                     + params["conv1_b"])
    w2 = params["conv2_w"][:, :, :, 0]                            # (128, 64, 25)
    h2 = jax.nn.relu(jnp.einsum("npc,ocp->no", h1, w2, precision=hp)
                     + params["conv2_b"])
    h3 = jax.nn.relu(jnp.dot(h2, params["fc1_w"].T, precision=hp) + params["fc1_b"])
    h4 = jax.nn.relu(jnp.dot(h3, params["fc2_w"].T, precision=hp) + params["fc2_b"])
    return jax.nn.sigmoid(jnp.dot(h4, params["fc3_w"].T, precision=hp) + params["fc3_b"])


if __name__ == "__main__":
    key = jax.random.PRNGKey(0)
    kp, kx = jax.random.split(key)
    params = init_params(kp)
    x = jax.random.normal(kx, (2, 1, 505, 1), jnp.float32)   # NCHW, as in PyTorch

    ref = cnet_reference(params, x)

    prepared = prepare_params(params)          # one-time re-layout, bf16 weights
    fwd = jax.jit(cnet_forward)
    out = fwd(prepared, x)
    jax.block_until_ready(out)

    assert out.shape == (2, OUT_DIM)
    assert bool(jnp.all((out >= 0.0) & (out <= 1.0)))         # sigmoid range
    max_err = float(jnp.max(jnp.abs(out - ref)))
    assert max_err < 2e-2, f"kernel vs f32 reference mismatch: {max_err}"
    print("KERNEL_OK")
</pallas_src>

<mosaic_0001>
module attributes {stable_mosaic.version = 11 : i64} {
  func.func @_cnet_fused_kernel(%arg0: i32, %arg1: memref<25x8x25xf32, #tpu.memory_space<vmem>>, %arg2: memref<25x64xbf16, #tpu.memory_space<vmem>>, %arg3: memref<1x64xf32, #tpu.memory_space<vmem>>, %arg4: memref<25x64x128xbf16, #tpu.memory_space<vmem>>, %arg5: memref<1x128xf32, #tpu.memory_space<vmem>>, %arg6: memref<128x1024xbf16, #tpu.memory_space<vmem>>, %arg7: memref<1x1024xf32, #tpu.memory_space<vmem>>, %arg8: memref<1024x512xbf16, #tpu.memory_space<vmem>>, %arg9: memref<1x512xf32, #tpu.memory_space<vmem>>, %arg10: memref<512x128xbf16, #tpu.memory_space<vmem>>, %arg11: memref<1x128xf32, #tpu.memory_space<vmem>>, %arg12: memref<8x128xf32, #tpu.memory_space<vmem>>) attributes {dimension_semantics = [#tpu.dimension_semantics<parallel>], iteration_bounds = array<i64: 1>, scalar_prefetch = 0 : i64, scratch_operands = 0 : i64, tpu.core_type = #tpu.core_type<tc>, window_params = [{transform_indices = @transform_0, window_bounds = array<i64: 25, 8, 25>}, {pipeline_mode = #tpu.pipeline_mode<synchronous>, transform_indices = @transform_1, window_bounds = array<i64: 25, 64>}, {pipeline_mode = #tpu.pipeline_mode<synchronous>, transform_indices = @transform_2, window_bounds = array<i64: 1, 64>}, {pipeline_mode = #tpu.pipeline_mode<synchronous>, transform_indices = @transform_3, window_bounds = array<i64: 25, 64, 128>}, {pipeline_mode = #tpu.pipeline_mode<synchronous>, transform_indices = @transform_4, window_bounds = array<i64: 1, 128>}, {pipeline_mode = #tpu.pipeline_mode<synchronous>, transform_indices = @transform_5, window_bounds = array<i64: 128, 1024>}, {pipeline_mode = #tpu.pipeline_mode<synchronous>, transform_indices = @transform_6, window_bounds = array<i64: 1, 1024>}, {pipeline_mode = #tpu.pipeline_mode<synchronous>, transform_indices = @transform_7, window_bounds = array<i64: 1024, 512>}, {pipeline_mode = #tpu.pipeline_mode<synchronous>, transform_indices = @transform_8, window_bounds = array<i64: 1, 512>}, {pipeline_mode = #tpu.pipeline_mode<synchronous>, transform_indices = @transform_9, window_bounds = array<i64: 512, 128>}, {pipeline_mode = #tpu.pipeline_mode<synchronous>, transform_indices = @transform_10, window_bounds = array<i64: 1, 128>}, {transform_indices = @transform_11, window_bounds = array<i64: 8, 128>}]} {
    %c0 = arith.constant 0 : index
    %c0_0 = arith.constant 0 : index
    %c0_1 = arith.constant 0 : index
    %0 = vector.load %arg1[%c0, %c0_0, %c0_1] : memref<25x8x25xf32, #tpu.memory_space<vmem>>, vector<25x8x25xf32>
    %1 = vector.shape_cast %0 : vector<25x8x25xf32> to vector<200x25xf32>
    %2 = arith.truncf %1 : vector<200x25xf32> to vector<200x25xbf16>
    %c0_2 = arith.constant 0 : index
    %c0_3 = arith.constant 0 : index
    %3 = vector.load %arg2[%c0_2, %c0_3] : memref<25x64xbf16, #tpu.memory_space<vmem>>, vector<25x64xbf16>
    %cst = arith.constant dense<0.000000e+00> : vector<200x64xf32>
    %4 = tpu.matmul %2, %3, %cst {dimension_numbers = #tpu.dot_dimension_numbers<[1], [0], [0], [1], [0, 0, 1, 1], [], []>} : vector<200x25xbf16>, vector<25x64xbf16>, vector<200x64xf32> -> vector<200x64xf32>
    %c0_4 = arith.constant 0 : index
    %c0_5 = arith.constant 0 : index
    %5 = vector.load %arg3[%c0_4, %c0_5] : memref<1x64xf32, #tpu.memory_space<vmem>>, vector<1x64xf32>
    %6 = vector.broadcast %5 : vector<1x64xf32> to vector<200x64xf32>
    %7 = arith.addf %4, %6 : vector<200x64xf32>
    %cst_6 = arith.constant 0.000000e+00 : f32
    %8 = vector.broadcast %cst_6 : f32 to vector<200x64xf32>
    %9 = arith.maximumf %7, %8 : vector<200x64xf32>
    %10 = arith.truncf %9 : vector<200x64xf32> to vector<200x64xbf16>
    %11 = vector.shape_cast %10 : vector<200x64xbf16> to vector<25x8x64xbf16>
    %c0_7 = arith.constant 0 : index
    %c0_8 = arith.constant 0 : index
    %c0_9 = arith.constant 0 : index
    %12 = vector.load %arg4[%c0_7, %c0_8, %c0_9] : memref<25x64x128xbf16, #tpu.memory_space<vmem>>, vector<25x64x128xbf16>
    %cst_10 = arith.constant dense<0.000000e+00> : vector<25x8x128xf32>
    %13 = tpu.matmul %11, %12, %cst_10 {dimension_numbers = #tpu.dot_dimension_numbers<[2], [1], [1], [2], [0, 0, 0, 1, 1, 2], [0], [0]>} : vector<25x8x64xbf16>, vector<25x64x128xbf16>, vector<25x8x128xf32> -> vector<25x8x128xf32>
    %14 = vector.extract_strided_slice %13 {offsets = [0, 0, 0], sizes = [1, 8, 128], strides = [1, 1, 1]} : vector<25x8x128xf32> to vector<1x8x128xf32>
    %15 = vector.shape_cast %14 : vector<1x8x128xf32> to vector<8x128xf32>
    %16 = vector.extract_strided_slice %13 {offsets = [1, 0, 0], sizes = [1, 8, 128], strides = [1, 1, 1]} : vector<25x8x128xf32> to vector<1x8x128xf32>
    %17 = vector.shape_cast %16 : vector<1x8x128xf32> to vector<8x128xf32>
    %18 = vector.extract_strided_slice %13 {offsets = [2, 0, 0], sizes = [1, 8, 128], strides = [1, 1, 1]} : vector<25x8x128xf32> to vector<1x8x128xf32>
    %19 = vector.shape_cast %18 : vector<1x8x128xf32> to vector<8x128xf32>
    %20 = vector.extract_strided_slice %13 {offsets = [3, 0, 0], sizes = [1, 8, 128], strides = [1, 1, 1]} : vector<25x8x128xf32> to vector<1x8x128xf32>
    %21 = vector.shape_cast %20 : vector<1x8x128xf32> to vector<8x128xf32>
    %22 = vector.extract_strided_slice %13 {offsets = [4, 0, 0], sizes = [1, 8, 128], strides = [1, 1, 1]} : vector<25x8x128xf32> to vector<1x8x128xf32>
    %23 = vector.shape_cast %22 : vector<1x8x128xf32> to vector<8x128xf32>
    %24 = vector.extract_strided_slice %13 {offsets = [5, 0, 0], sizes = [1, 8, 128], strides = [1, 1, 1]} : vector<25x8x128xf32> to vector<1x8x128xf32>
    %25 = vector.shape_cast %24 : vector<1x8x128xf32> to vector<8x128xf32>
    %26 = vector.extract_strided_slice %13 {offsets = [6, 0, 0], sizes = [1, 8, 128], strides = [1, 1, 1]} : vector<25x8x128xf32> to vector<1x8x128xf32>
    %27 = vector.shape_cast %26 : vector<1x8x128xf32> to vector<8x128xf32>
    %28 = vector.extract_strided_slice %13 {offsets = [7, 0, 0], sizes = [1, 8, 128], strides = [1, 1, 1]} : vector<25x8x128xf32> to vector<1x8x128xf32>
    %29 = vector.shape_cast %28 : vector<1x8x128xf32> to vector<8x128xf32>
    %30 = vector.extract_strided_slice %13 {offsets = [8, 0, 0], sizes = [1, 8, 128], strides = [1, 1, 1]} : vector<25x8x128xf32> to vector<1x8x128xf32>
    %31 = vector.shape_cast %30 : vector<1x8x128xf32> to vector<8x128xf32>
    %32 = vector.extract_strided_slice %13 {offsets = [9, 0, 0], sizes = [1, 8, 128], strides = [1, 1, 1]} : vector<25x8x128xf32> to vector<1x8x128xf32>
    %33 = vector.shape_cast %32 : vector<1x8x128xf32> to vector<8x128xf32>
    %34 = vector.extract_strided_slice %13 {offsets = [10, 0, 0], sizes = [1, 8, 128], strides = [1, 1, 1]} : vector<25x8x128xf32> to vector<1x8x128xf32>
    %35 = vector.shape_cast %34 : vector<1x8x128xf32> to vector<8x128xf32>
    %36 = vector.extract_strided_slice %13 {offsets = [11, 0, 0], sizes = [1, 8, 128], strides = [1, 1, 1]} : vector<25x8x128xf32> to vector<1x8x128xf32>
    %37 = vector.shape_cast %36 : vector<1x8x128xf32> to vector<8x128xf32>
    %38 = vector.extract_strided_slice %13 {offsets = [12, 0, 0], sizes = [1, 8, 128], strides = [1, 1, 1]} : vector<25x8x128xf32> to vector<1x8x128xf32>
    %39 = vector.shape_cast %38 : vector<1x8x128xf32> to vector<8x128xf32>
    %40 = vector.extract_strided_slice %13 {offsets = [13, 0, 0], sizes = [1, 8, 128], strides = [1, 1, 1]} : vector<25x8x128xf32> to vector<1x8x128xf32>
    %41 = vector.shape_cast %40 : vector<1x8x128xf32> to vector<8x128xf32>
    %42 = vector.extract_strided_slice %13 {offsets = [14, 0, 0], sizes = [1, 8, 128], strides = [1, 1, 1]} : vector<25x8x128xf32> to vector<1x8x128xf32>
    %43 = vector.shape_cast %42 : vector<1x8x128xf32> to vector<8x128xf32>
    %44 = vector.extract_strided_slice %13 {offsets = [15, 0, 0], sizes = [1, 8, 128], strides = [1, 1, 1]} : vector<25x8x128xf32> to vector<1x8x128xf32>
    %45 = vector.shape_cast %44 : vector<1x8x128xf32> to vector<8x128xf32>
    %46 = vector.extract_strided_slice %13 {offsets = [16, 0, 0], sizes = [1, 8, 128], strides = [1, 1, 1]} : vector<25x8x128xf32> to vector<1x8x128xf32>
    %47 = vector.shape_cast %46 : vector<1x8x128xf32> to vector<8x128xf32>
    %48 = vector.extract_strided_slice %13 {offsets = [17, 0, 0], sizes = [1, 8, 128], strides = [1, 1, 1]} : vector<25x8x128xf32> to vector<1x8x128xf32>
    %49 = vector.shape_cast %48 : vector<1x8x128xf32> to vector<8x128xf32>
    %50 = vector.extract_strided_slice %13 {offsets = [18, 0, 0], sizes = [1, 8, 128], strides = [1, 1, 1]} : vector<25x8x128xf32> to vector<1x8x128xf32>
    %51 = vector.shape_cast %50 : vector<1x8x128xf32> to vector<8x128xf32>
    %52 = vector.extract_strided_slice %13 {offsets = [19, 0, 0], sizes = [1, 8, 128], strides = [1, 1, 1]} : vector<25x8x128xf32> to vector<1x8x128xf32>
    %53 = vector.shape_cast %52 : vector<1x8x128xf32> to vector<8x128xf32>
    %54 = vector.extract_strided_slice %13 {offsets = [20, 0, 0], sizes = [1, 8, 128], strides = [1, 1, 1]} : vector<25x8x128xf32> to vector<1x8x128xf32>
    %55 = vector.shape_cast %54 : vector<1x8x128xf32> to vector<8x128xf32>
    %56 = vector.extract_strided_slice %13 {offsets = [21, 0, 0], sizes = [1, 8, 128], strides = [1, 1, 1]} : vector<25x8x128xf32> to vector<1x8x128xf32>
    %57 = vector.shape_cast %56 : vector<1x8x128xf32> to vector<8x128xf32>
    %58 = vector.extract_strided_slice %13 {offsets = [22, 0, 0], sizes = [1, 8, 128], strides = [1, 1, 1]} : vector<25x8x128xf32> to vector<1x8x128xf32>
    %59 = vector.shape_cast %58 : vector<1x8x128xf32> to vector<8x128xf32>
    %60 = vector.extract_strided_slice %13 {offsets = [23, 0, 0], sizes = [1, 8, 128], strides = [1, 1, 1]} : vector<25x8x128xf32> to vector<1x8x128xf32>
    %61 = vector.shape_cast %60 : vector<1x8x128xf32> to vector<8x128xf32>
    %62 = vector.extract_strided_slice %13 {offsets = [24, 0, 0], sizes = [1, 8, 128], strides = [1, 1, 1]} : vector<25x8x128xf32> to vector<1x8x128xf32>
    %63 = vector.shape_cast %62 : vector<1x8x128xf32> to vector<8x128xf32>
    %64 = arith.addf %15, %17 : vector<8x128xf32>
    %65 = arith.addf %19, %21 : vector<8x128xf32>
    %66 = arith.addf %23, %25 : vector<8x128xf32>
    %67 = arith.addf %27, %29 : vector<8x128xf32>
    %68 = arith.addf %31, %33 : vector<8x128xf32>
    %69 = arith.addf %35, %37 : vector<8x128xf32>
    %70 = arith.addf %39, %41 : vector<8x128xf32>
    %71 = arith.addf %43, %45 : vector<8x128xf32>
    %72 = arith.addf %47, %49 : vector<8x128xf32>
    %73 = arith.addf %51, %53 : vector<8x128xf32>
    %74 = arith.addf %55, %57 : vector<8x128xf32>
    %75 = arith.addf %59, %61 : vector<8x128xf32>
    %76 = arith.addf %64, %65 : vector<8x128xf32>
    %77 = arith.addf %66, %67 : vector<8x128xf32>
    %78 = arith.addf %68, %69 : vector<8x128xf32>
    %79 = arith.addf %70, %71 : vector<8x128xf32>
    %80 = arith.addf %72, %73 : vector<8x128xf32>
    %81 = arith.addf %74, %75 : vector<8x128xf32>
    %82 = arith.addf %76, %77 : vector<8x128xf32>
    %83 = arith.addf %78, %79 : vector<8x128xf32>
    %84 = arith.addf %80, %81 : vector<8x128xf32>
    %85 = arith.addf %82, %83 : vector<8x128xf32>
    %86 = arith.addf %84, %63 : vector<8x128xf32>
    %87 = arith.addf %85, %86 : vector<8x128xf32>
    %c0_11 = arith.constant 0 : index
    %c0_12 = arith.constant 0 : index
    %88 = vector.load %arg5[%c0_11, %c0_12] : memref<1x128xf32, #tpu.memory_space<vmem>>, vector<1x128xf32>
    %89 = vector.broadcast %88 : vector<1x128xf32> to vector<8x128xf32>
    %90 = arith.addf %87, %89 : vector<8x128xf32>
    %cst_13 = arith.constant 0.000000e+00 : f32
    %91 = vector.broadcast %cst_13 : f32 to vector<8x128xf32>
    %92 = arith.maximumf %90, %91 : vector<8x128xf32>
    %93 = arith.truncf %92 : vector<8x128xf32> to vector<8x128xbf16>
    %c0_14 = arith.constant 0 : index
    %c0_15 = arith.constant 0 : index
    %94 = vector.load %arg6[%c0_14, %c0_15] : memref<128x1024xbf16, #tpu.memory_space<vmem>>, vector<128x1024xbf16>
    %cst_16 = arith.constant dense<0.000000e+00> : vector<8x1024xf32>
    %95 = tpu.matmul %93, %94, %cst_16 {dimension_numbers = #tpu.dot_dimension_numbers<[1], [0], [0], [1], [0, 0, 1, 1], [], []>} : vector<8x128xbf16>, vector<128x1024xbf16>, vector<8x1024xf32> -> vector<8x1024xf32>
    %c0_17 = arith.constant 0 : index
    %c0_18 = arith.constant 0 : index
    %96 = vector.load %arg7[%c0_17, %c0_18] : memref<1x1024xf32, #tpu.memory_space<vmem>>, vector<1x1024xf32>
    %97 = vector.broadcast %96 : vector<1x1024xf32> to vector<8x1024xf32>
    %98 = arith.addf %95, %97 : vector<8x1024xf32>
    %cst_19 = arith.constant 0.000000e+00 : f32
    %99 = vector.broadcast %cst_19 : f32 to vector<8x1024xf32>
    %100 = arith.maximumf %98, %99 : vector<8x1024xf32>
    %101 = arith.truncf %100 : vector<8x1024xf32> to vector<8x1024xbf16>
    %c0_20 = arith.constant 0 : index
    %c0_21 = arith.constant 0 : index
    %102 = vector.load %arg8[%c0_20, %c0_21] : memref<1024x512xbf16, #tpu.memory_space<vmem>>, vector<1024x512xbf16>
    %cst_22 = arith.constant dense<0.000000e+00> : vector<8x512xf32>
    %103 = tpu.matmul %101, %102, %cst_22 {dimension_numbers = #tpu.dot_dimension_numbers<[1], [0], [0], [1], [0, 0, 1, 1], [], []>} : vector<8x1024xbf16>, vector<1024x512xbf16>, vector<8x512xf32> -> vector<8x512xf32>
    %c0_23 = arith.constant 0 : index
    %c0_24 = arith.constant 0 : index
    %104 = vector.load %arg9[%c0_23, %c0_24] : memref<1x512xf32, #tpu.memory_space<vmem>>, vector<1x512xf32>
    %105 = vector.broadcast %104 : vector<1x512xf32> to vector<8x512xf32>
    %106 = arith.addf %103, %105 : vector<8x512xf32>
    %cst_25 = arith.constant 0.000000e+00 : f32
    %107 = vector.broadcast %cst_25 : f32 to vector<8x512xf32>
    %108 = arith.maximumf %106, %107 : vector<8x512xf32>
    %109 = arith.truncf %108 : vector<8x512xf32> to vector<8x512xbf16>
    %c0_26 = arith.constant 0 : index
    %c0_27 = arith.constant 0 : index
    %110 = vector.load %arg10[%c0_26, %c0_27] : memref<512x128xbf16, #tpu.memory_space<vmem>>, vector<512x128xbf16>
    %cst_28 = arith.constant dense<0.000000e+00> : vector<8x128xf32>
    %111 = tpu.matmul %109, %110, %cst_28 {dimension_numbers = #tpu.dot_dimension_numbers<[1], [0], [0], [1], [0, 0, 1, 1], [], []>} : vector<8x512xbf16>, vector<512x128xbf16>, vector<8x128xf32> -> vector<8x128xf32>
    %c0_29 = arith.constant 0 : index
    %c0_30 = arith.constant 0 : index
    %112 = vector.load %arg11[%c0_29, %c0_30] : memref<1x128xf32, #tpu.memory_space<vmem>>, vector<1x128xf32>
    %113 = vector.broadcast %112 : vector<1x128xf32> to vector<8x128xf32>
    %114 = arith.addf %111, %113 : vector<8x128xf32>
    %115 = arith.negf %114 : vector<8x128xf32>
    %116 = math.exp %115 : vector<8x128xf32>
    %cst_31 = arith.constant 1.000000e+00 : f32
    %117 = vector.broadcast %cst_31 : f32 to vector<8x128xf32>
    %118 = arith.addf %117, %116 : vector<8x128xf32>
    %119 = arith.divf %117, %118 : vector<8x128xf32>
    %c0_32 = arith.constant 0 : index
    %c0_33 = arith.constant 0 : index
    %120 = vector.load %arg12[%c0_32, %c0_33] : memref<8x128xf32, #tpu.memory_space<vmem>>, vector<8x128xf32>
    tpu.vector_store %arg12[%c0_32, %c0_33], %119 {strides = array<i32>} : memref<8x128xf32, #tpu.memory_space<vmem>>, vector<8x128xf32>,
    return
  }
  func.func @transform_0(%arg0: i32) -> (i32, i32, i32) {
    %c0_i32 = arith.constant 0 : i32
    %c0_i32_0 = arith.constant 0 : i32
    %c0_i32_1 = arith.constant 0 : i32
    return %c0_i32, %arg0, %c0_i32_0 : i32, i32, i32
  }
  func.func @transform_1(%arg0: i32) -> (i32, i32) {
    %c0_i32 = arith.constant 0 : i32
    %c0_i32_0 = arith.constant 0 : i32
    %c0_i32_1 = arith.constant 0 : i32
    return %c0_i32, %c0_i32_0 : i32, i32
  }
  func.func @transform_2(%arg0: i32) -> (i32, i32) {
    %c0_i32 = arith.constant 0 : i32
    %c0_i32_0 = arith.constant 0 : i32
    %c0_i32_1 = arith.constant 0 : i32
    return %c0_i32, %c0_i32_0 : i32, i32
  }
  func.func @transform_3(%arg0: i32) -> (i32, i32, i32) {
    %c0_i32 = arith.constant 0 : i32
    %c0_i32_0 = arith.constant 0 : i32
    %c0_i32_1 = arith.constant 0 : i32
    %c0_i32_2 = arith.constant 0 : i32
    return %c0_i32, %c0_i32_0, %c0_i32_1 : i32, i32, i32
  }
  func.func @transform_4(%arg0: i32) -> (i32, i32) {
    %c0_i32 = arith.constant 0 : i32
    %c0_i32_0 = arith.constant 0 : i32
    %c0_i32_1 = arith.constant 0 : i32
    return %c0_i32, %c0_i32_0 : i32, i32
  }
  func.func @transform_5(%arg0: i32) -> (i32, i32) {
    %c0_i32 = arith.constant 0 : i32
    %c0_i32_0 = arith.constant 0 : i32
    %c0_i32_1 = arith.constant 0 : i32
    return %c0_i32, %c0_i32_0 : i32, i32
  }
  func.func @transform_6(%arg0: i32) -> (i32, i32) {
    %c0_i32 = arith.constant 0 : i32
    %c0_i32_0 = arith.constant 0 : i32
    %c0_i32_1 = arith.constant 0 : i32
    return %c0_i32, %c0_i32_0 : i32, i32
  }
  func.func @transform_7(%arg0: i32) -> (i32, i32) {
    %c0_i32 = arith.constant 0 : i32
    %c0_i32_0 = arith.constant 0 : i32
    %c0_i32_1 = arith.constant 0 : i32
    return %c0_i32, %c0_i32_0 : i32, i32
  }
  func.func @transform_8(%arg0: i32) -> (i32, i32) {
    %c0_i32 = arith.constant 0 : i32
    %c0_i32_0 = arith.constant 0 : i32
    %c0_i32_1 = arith.constant 0 : i32
    return %c0_i32, %c0_i32_0 : i32, i32
  }
  func.func @transform_9(%arg0: i32) -> (i32, i32) {
    %c0_i32 = arith.constant 0 : i32
    %c0_i32_0 = arith.constant 0 : i32
    %c0_i32_1 = arith.constant 0 : i32
    return %c0_i32, %c0_i32_0 : i32, i32
  }
  func.func @transform_10(%arg0: i32) -> (i32, i32) {
    %c0_i32 = arith.constant 0 : i32
    %c0_i32_0 = arith.constant 0 : i32
    %c0_i32_1 = arith.constant 0 : i32
    return %c0_i32, %c0_i32_0 : i32, i32
  }
  func.func @transform_11(%arg0: i32) -> (i32, i32) {
    %c0_i32 = arith.constant 0 : i32
    %c0_i32_0 = arith.constant 0 : i32
    return %arg0, %c0_i32 : i32, i32
  }
}

</mosaic_0001>

<bundles_post_ra>
// kernel: cnet_forward.1
= control target key start
LH: loop header
LB: loop body
LE: loop exit
PB: predicated region body
PF: predicated region fallthrough
CT: control target
= control target key end

     0   :  { %16 = vsyncpa [#allocation3], 0  ;;  %s8427_s0 = inlined_call_operand.vmem [shape: f32[25,8,25], index: 0, kind: input, shape index: {}]   ;;  %s8428_s1 = inlined_call_operand.vmem [shape: bf16[25,64], index: 1, kind: input, shape index: {}]   ;;  %s8429_s2 = inlined_call_operand.vmem [shape: f32[1,64], index: 2, kind: input, shape index: {}]   ;;  %s8430_s3 = inlined_call_operand.hbm [shape: bf16[25,64,128], index: 3, kind: input, shape index: {}]   ;;  %s8431_s4 = inlined_call_operand.vmem [shape: f32[1,128], index: 4, kind: input, shape index: {}]   ;;  %s8432_s5 = inlined_call_operand.hbm [shape: bf16[128,1024], index: 5, kind: input, shape index: {}]   ;;  %s8433_s6 = inlined_call_operand.hbm [shape: f32[1,1024], index: 6, kind: input, shape index: {}]   ;;  %s8434_s7 = inlined_call_operand.vmem [shape: bf16[1024,512], index: 7, kind: input, shape index: {}]   ;;  %s8435_s8 = inlined_call_operand.hbm [shape: f32[1,512], index: 8, kind: input, shape index: {}]   ;;  %s8436_s9 = inlined_call_operand.vmem [shape: bf16[512,128], index: 9, kind: input, shape index: {}]   ;;  %s8437_s10 = inlined_call_operand.vmem [shape: f32[1,128], index: 10, kind: input, shape index: {}]   ;;  %s8438_s11 = inlined_call_operand.vmem [shape: f32[8,128], index: 11, kind: output, shape index: {}]  }
   0x1   :  { %17 = vsyncpa [#allocation5], 0 }
   0x2   :  { %18 = vsyncpa [#allocation8], 0  ;;  %s6943_s17 = smov [#allocation4]   ;;  %s6849_s21 = scalar_lea.hbm %s8432_s5, 8192 }
   0x3   :  { %s44_s18 = sshll.u32 %s6943_s17, 4  ;;  %p6850_p0 = scmp.ne.s32.totalorder %s8432_s5, %s6849_s21  ;;  %s45_s18 = int_to_ptr.vmem [resolvable:$true] %s44_s18 }
   0x4   :  { %p6853_p1 = scmp.lt.u32.totalorder %s6849_s21, %s8432_s5 }
   0x6   :  { %p6855_p2 = pnand %p6853_p1, %p6850_p0 }
   0x8   :  { %6858 = shalt.err (!%p6855_p2)
}
   0x9   :  { %s6859_s26 = scalar_lea.vmem %s45_s18, 8192  ;;  %p6864_p4 = scmp.lt.s32.totalorder %s45_s18, %s45_s18 }
   0xa   :  { %p6860_p3 = scmp.ne.s32.totalorder %s45_s18, %s6859_s26  ;;  %p6865_p5 = scmp.lt.s32.totalorder %s6859_s26, %s6859_s26 }
   0xc   :  { %p6866_p6 = por %p6865_p5, %p6864_p4 }
   0xe   :  { %p6867_p7 = pnand %p6866_p6, %p6860_p3 }
  0x10   :  { %6870 = shalt.err (!%p6867_p7)
}
  0x11   :  { %s6944_s27 = smov 512   ;;  %s6945_s28 = smov 32  }
  0x12   :  { %50 = dma.hbm_to_vmem [thread:$0]  %s8432_s5, 8192, %s45_s18, [#allocation5], %s6944_s27, %s6944_s27, %s6945_s28  }
  0x13   :  { %s6946_s12 = smov [#allocation2]   ;;  %s6871_s16 = scalar_lea.hbm %s8430_s3, 12800 }
  0x14   :  { %s30_s13 = sshll.u32 %s6946_s12, 4  ;;  %p6872_p8 = scmp.ne.s32.totalorder %s8430_s3, %s6871_s16  ;;  %s31_s13 = int_to_ptr.vmem [resolvable:$true] %s30_s13 }
  0x15   :  { %p6875_p9 = scmp.lt.u32.totalorder %s6871_s16, %s8430_s3 }
  0x17   :  { %p6877_p10 = pnand %p6875_p9, %p6872_p8 }
  0x19   :  { %6880 = shalt.err (!%p6877_p10)
}
  0x1a   :  { %s6881_s22 = scalar_lea.vmem %s31_s13, 12800  ;;  %p6886_p12 = scmp.lt.s32.totalorder %s31_s13, %s31_s13 }
  0x1b   :  { %p6882_p11 = scmp.ne.s32.totalorder %s31_s13, %s6881_s22  ;;  %p6887_p13 = scmp.lt.s32.totalorder %s6881_s22, %s6881_s22 }
  0x1d   :  { %p6888_p0 = por %p6887_p13, %p6886_p12 }
  0x1f   :  { %p6889_p1 = pnand %p6888_p0, %p6882_p11 }
  0x21   :  { %6892 = shalt.err (!%p6889_p1)
}
  0x22   :  { %s6947_s5 = smov 64   ;;  %s6948_s18 = smov 4  }
  0x23   :  { %36 = dma.hbm_to_vmem [thread:$0]  %s8430_s3, 12800, %s31_s13, [#allocation3], %s6947_s5, %s6947_s5, %s6948_s18  }
  0x24   :  { %s6949_s25 = smov [#allocation6]   ;;  %s6950_s27 = smov [#allocation7]  }
  0x25   :  { %s57_s26 = sshll.u32 %s6949_s25, 4  ;;  %s69_s28 = sshll.u32 %s6950_s27, 4  ;;  %s58_s26 = int_to_ptr.vmem [resolvable:$true] %s57_s26  ;;  %s70_s28 = int_to_ptr.vmem [resolvable:$true] %s69_s28 }
  0x26   :  { %s6893_s12 = scalar_lea.hbm %s8433_s6, 128 }
  0x27   :  { %p6894_p2 = scmp.ne.s32.totalorder %s8433_s6, %s6893_s12  ;;  %p6897_p3 = scmp.lt.u32.totalorder %s6893_s12, %s8433_s6 }
  0x29   :  { %p6899_p4 = pnand %p6897_p3, %p6894_p2 }
  0x2b   :  { %6902 = shalt.err (!%p6899_p4)
}
  0x2c   :  { %s6903_s3 = scalar_lea.vmem %s58_s26, 128  ;;  %p6908_p6 = scmp.lt.s32.totalorder %s58_s26, %s58_s26 }
  0x2d   :  { %p6904_p5 = scmp.ne.s32.totalorder %s58_s26, %s6903_s3  ;;  %p6909_p7 = scmp.lt.s32.totalorder %s6903_s3, %s6903_s3 }
  0x2f   :  { %p6910_p8 = por %p6909_p7, %p6908_p6 }
  0x31   :  { %p6911_p9 = pnand %p6910_p8, %p6904_p5 }
  0x33   :  { %6914 = shalt.err (!%p6911_p9)
}
  0x34   :  { %60 = dma.hbm_to_vmem [thread:$0]  %s8433_s6, 128, %s58_s26, [#allocation5]  }
  0x35   :  { %s6915_s22 = scalar_lea.hbm %s8435_s8, 64 }
  0x36   :  { %p6916_p10 = scmp.ne.s32.totalorder %s8435_s8, %s6915_s22  ;;  %p6919_p11 = scmp.lt.u32.totalorder %s6915_s22, %s8435_s8 }
  0x38   :  { %p6921_p12 = pnand %p6919_p11, %p6916_p10 }
  0x3a   :  { %6924 = shalt.err (!%p6921_p12)
}
  0x3b   :  { %s6925_s25 = scalar_lea.vmem %s70_s28, 64  ;;  %p6930_p0 = scmp.lt.s32.totalorder %s70_s28, %s70_s28 }
  0x3c   :  { %p6926_p13 = scmp.ne.s32.totalorder %s70_s28, %s6925_s25  ;;  %p6931_p1 = scmp.lt.s32.totalorder %s6925_s25, %s6925_s25 }
  0x3e   :  { %p6932_p2 = por %p6931_p1, %p6930_p0 }
  0x40   :  { %p6933_p3 = pnand %p6932_p2, %p6926_p13 }
  0x42   :  { %6936 = shalt.err (!%p6933_p3)
}
  0x43   :  { %72 = dma.hbm_to_vmem [thread:$0]  %s8435_s8, 64, %s70_s28, [#allocation8]  }
  0x44   :  { %6937 = dma.done.wait [#allocation3], 12800  }
  0x45   :  { %6938 = vsyncadd [#allocation3], 4294954496 }
  0x46   :  { %6939 = dma.done.wait [#allocation5], 8320  }
  0x47   :  { %6940 = vsyncadd [#allocation5], 4294958976 }
  0x48   :  { %6941 = dma.done.wait [#allocation8], 64  }
  0x49   :  { %6942 = vsyncadd [#allocation8], 4294967232  ;;  %v6951_v0 = vmov 0.0   ;;  %vm190_vm0 = vcmask 1043456   ;;  %vm6952_vm1 = vmmov 0   ;;  %vm191_vm2 = vcmask 1044480  }
  0x4a   :  { %5931 = vmatprep.subr.bf16.mxu0 %v6951_v0  ;;  %5987 = vmatprep.subr.bf16.mxu1 %v6951_v0  ;;  %v6953_v1 = vmov 65535   ;;  %v6327_v3 = vld [vmem:[%s8428_s1] sm:$0xff]   ;;  %v6328_v5 = vld [vmem:[%s8428_s1 + $0x8] sm:$0x1f]   ;;  %vm150_vm3 = vcmask 203776   ;;  %v92_v10 = vld [vmem:[%s8427_s0 + $0x10] sm:$0xff] }
  0x4b   :  { %5935 = vmatprep.mubr.msk.bf16.mxu0 %vm6952_vm1, %v6951_v0  ;;  %5995 = vmatprep.mubr.msk.bf16.mxu1 %vm6952_vm1, %v6951_v0  ;;  %v192_v2 = vsel %vm190_vm0, 4294967295, %v6953_v1  ;;  %v90_v6 = vld [vmem:[%s8427_s0] sm:$0xff]  ;;  %v91_v7 = vld [vmem:[%s8427_s0 + $0x8] sm:$0xff]  ;;  %v93_v11 = vld [vmem:[%s8427_s0 + $0x18] sm:$0xff]  ;;  %vm658_vm4 = vcmask 523264  }
  0x4c   :  { %v193_v4 = vsel %vm191_vm2, %v192_v2, 0  ;;  %5932 = vmatpush3.bf16.msra.mxu0 %v6327_v3  ;;  %v115_v9 = vpack.c.bf16 %v91_v7, %v90_v6  ;;  %v6329_v12 = vld [vmem:[#allocation2 + $0xc0] sm:$0xff]   ;;  %v116_v14 = vpack.c.bf16 %v93_v11, %v92_v10  ;;  %v6331_v15 = vld [vmem:[#allocation2 + $0x8] sm:$0xff]   ;;  %v6332_v16 = vld [vmem:[#allocation2 + $0x10] sm:$0xff]  }
  0x4d   :  { %5933 = vmatprep.subr.bf16.mxu0 %v6951_v0  ;;  %v195_v8 = vand.u32 %v6328_v5, %v193_v4  ;;  %v6330_v13 = vld [vmem:[#allocation2] sm:$0xff]   ;;  %v95_v18 = vld [vmem:[%s8427_s0 + $0x28] sm:$0xff]  ;;  %v96_v20 = vld [vmem:[%s8427_s0 + $0x30] sm:$0xff] }
  0x4e   :  { %5988 = vmatpush3.bf16.msra.mxu1 %v6330_v13  ;;  %v94_v17 = vld [vmem:[%s8427_s0 + $0x20] sm:$0xff]  ;;  %v97_v21 = vld [vmem:[%s8427_s0 + $0x38] sm:$0xff]  ;;  %v99_v24 = vld [vmem:[%s8427_s0 + $0x48] sm:$0xff] }
  0x4f   :  { %5989 = vmatprep.subr.bf16.mxu1 %v6951_v0  ;;  %v117_v19 = vpack.c.bf16 %v95_v18, %v94_v17  ;;  %v118_v22 = vpack.c.bf16 %v97_v21, %v96_v20  ;;  %v98_v23 = vld [vmem:[%s8427_s0 + $0x40] sm:$0xff]  ;;  %v100_v26 = vld [vmem:[%s8427_s0 + $0x50] sm:$0xff]  ;;  %v101_v27 = vld [vmem:[%s8427_s0 + $0x58] sm:$0xff] }
  0x50   :  { %5934 = vmatpush3.bf16.msra.mxu0 %v195_v8  ;;  %v119_v25 = vpack.c.bf16 %v99_v24, %v98_v23  ;;  %v120_v28 = vpack.c.bf16 %v101_v27, %v100_v26  ;;  %v102_v29 = vld [vmem:[%s8427_s0 + $0x60] sm:$0xff]  ;;  %v103_v30 = vld [vmem:[%s8427_s0 + $0x68] sm:$0xff]  ;;  %v104_v32 = vld [vmem:[%s8427_s0 + $0x70] sm:$0xff] }
  0x51   :  { %6059 = vmatprep.subr.bf16.mxu0 %v6951_v0  ;;  %v121_v31 = vpack.c.bf16 %v103_v30, %v102_v29  ;;  %v105_v33 = vld [vmem:[%s8427_s0 + $0x78] sm:$0xff]  ;;  %v106_v35 = vld [vmem:[%s8427_s0 + $0x80] sm:$0xff]  ;;  %v107_v36 = vld [vmem:[%s8427_s0 + $0x88] sm:$0xff] }
  0x52   :  { %5990 = vmatpush3.bf16.msra.mxu1 %v6331_v15  ;;  %v122_v34 = vpack.c.bf16 %v105_v33, %v104_v32  ;;  %v123_v37 = vpack.c.bf16 %v107_v36, %v106_v35  ;;  %v108_v38 = vld [vmem:[%s8427_s0 + $0x90] sm:$0xff]  ;;  %v109_v39 = vld [vmem:[%s8427_s0 + $0x98] sm:$0xff]  ;;  %v110_v41 = vld [vmem:[%s8427_s0 + $0xa0] sm:$0xff] }
  0x53   :  { %5936 = vmatmul.mubr.msk.bf16.vlgmr.msra.gmra.mrb[0].mxu0 %vm150_vm3, %v115_v9  ;;  %5991 = vmatprep.subr.bf16.mxu1 %v6951_v0  ;;  %v124_v40 = vpack.c.bf16 %v109_v39, %v108_v38  ;;  %v111_v42 = vld [vmem:[%s8427_s0 + $0xa8] sm:$0xff]  ;;  %v112_v44 = vld [vmem:[%s8427_s0 + $0xb0] sm:$0xff]  ;;  %v113_v45 = vld [vmem:[%s8427_s0 + $0xb8] sm:$0xff] }
  0x54   :  { %5939 = vmatprep.mubr.msk.bf16.mxu0 %vm6952_vm1, %v6951_v0  ;;  %6060 = vmatpush3.bf16.msra.mxu0 %v6329_v12  ;;  %v125_v43 = vpack.c.bf16 %v111_v42, %v110_v41  ;;  %v126_v46 = vpack.c.bf16 %v113_v45, %v112_v44  ;;  %v6333_v47 = vld [vmem:[#allocation2 + $0x18] sm:$0xff]   ;;  %v114_v48 = vld [vmem:[%s8427_s0 + $0xc0] sm:$0xff]  ;;  %v6337_v50 = vld [vmem:[#allocation2 + $0xc8] sm:$0xff]  }
  0x55   :  { %6061 = vmatprep.subr.bf16.mxu0 %v6951_v0  ;;  %v127_v49 = vpack.c.bf16 %v114_v48, %v114_v48  ;;  %v6344_v51 = vld [vmem:[#allocation2 + $0xd0] sm:$0xff]   ;;  %v6352_v52 = vld [vmem:[#allocation2 + $0xd8] sm:$0xff]   ;;  %v7202_v53 = vld [vmem:[%s8429_s2] ss:$0 sm:$0xff] }
  0x56   :  { %5992 = vmatpush3.bf16.msra.mxu1 %v6332_v16  ;;  %v6334_v60 = vld [vmem:[#allocation2 + $0x20] sm:$0xff]   ;;  %v6335_v62 = vld [vmem:[#allocation2 + $0x28] sm:$0xff]   ;;  %v6336_v4 = vld [vmem:[#allocation2 + $0x30] sm:$0xff]  }
  0x57   :  { %5993 = vmatprep.subr.bf16.mxu1 %v6951_v0  ;;  %v6338_v6 = vld [vmem:[#allocation2 + $0x38] sm:$0xff]   ;;  %v6339_v12 = vld [vmem:[#allocation2 + $0x40] sm:$0xff]   ;;  %v6360_v27 = vld [vmem:[#allocation2 + $0x108] sm:$0xff]  }
  0x58   :  { %6062 = vmatpush3.bf16.msra.mxu0 %v6337_v50  ;;  %v6358_v23 = vld [vmem:[#allocation2 + $0x100] sm:$0xff]   ;;  %v6342_v26 = vld [vmem:[#allocation2 + $0x58] sm:$0xff]   ;;  %v6362_v35 = vld [vmem:[#allocation2 + $0x110] sm:$0xff]  }
  0x59   :  { %6063 = vmatprep.subr.bf16.mxu0 %v6951_v0  ;;  %v6343_v33 = vld [vmem:[#allocation2 + $0x60] sm:$0xff]   ;;  %v6345_v36 = vld [vmem:[#allocation2 + $0x68] sm:$0xff]   ;;  %v6364_v39 = vld [vmem:[#allocation2 + $0x118] sm:$0xff]  }
  0x5a   :  { %5994 = vmatpush3.bf16.msra.mxu1 %v6333_v47  ;;  %v6347_v47 = vld [vmem:[#allocation2 + $0x78] sm:$0xff]   ;;  %v6368_v50 = vld [vmem:[#allocation2 + $0x148] sm:$0xff]  }
  0x5b   :  { %5940 = vmatmul.mubr.msk.bf16.gmra.mrb[4].mxu0 %vm150_vm3, %v116_v14  ;;  %5999 = vmatprep.subr.bf16.mxu1 %v6951_v0  ;;  %v6340_v14 = vld [vmem:[#allocation2 + $0x48] sm:$0xff]  }
  0x5c   :  { %5943 = vmatprep.mubr.msk.bf16.mxu0 %vm6952_vm1, %v6951_v0  ;;  %6064 = vmatpush3.bf16.msra.mxu0 %v6344_v51 }
  0x5d   :  { %6065 = vmatprep.subr.bf16.mxu0 %v6951_v0 }
  0x60   :  { %6066 = vmatpush3.bf16.msra.mxu0 %v6352_v52 }
  0x61   :  { %6083 = vmatprep.subr.bf16.mxu0 %v6951_v0 }
  0x63   :  { %5944 = vmatmul.mubr.msk.bf16.gmra.mrb[8].mxu0 %vm150_vm3, %v117_v19 }
  0x64   :  { %5947 = vmatprep.mubr.msk.bf16.mxu0 %vm6952_vm1, %v6951_v0 }
  0x6b   :  { %5948 = vmatmul.mubr.msk.bf16.gmra.mrb[12].mxu0 %vm150_vm3, %v118_v22  ;;  %v6341_v22 = vld [vmem:[#allocation2 + $0x50] sm:$0xff]  }
  0x6c   :  { %5951 = vmatprep.mubr.msk.bf16.mxu0 %vm6952_vm1, %v6951_v0 }
  0x73   :  { %5952 = vmatmul.mubr.msk.bf16.gmra.mrb[16].mxu0 %vm150_vm3, %v119_v25 }
  0x74   :  { %5955 = vmatprep.mubr.msk.bf16.mxu0 %vm6952_vm1, %v6951_v0 }
  0x7b   :  { %5956 = vmatmul.mubr.msk.bf16.gmra.mrb[20].mxu0 %vm150_vm3, %v120_v28 }
  0x7c   :  { %5959 = vmatprep.mubr.msk.bf16.mxu0 %vm6952_vm1, %v6951_v0 }
  0x83   :  { %5960 = vmatmul.mubr.msk.bf16.gmra.mrb[24].mxu0 %vm150_vm3, %v121_v31 }
  0x84   :  { %5963 = vmatprep.mubr.msk.bf16.mxu0 %vm6952_vm1, %v6951_v0 }
  0x8b   :  { %5964 = vmatmul.mubr.msk.bf16.gmra.mrb[28].mxu0 %vm150_vm3, %v122_v34 }
  0x8c   :  { %5967 = vmatprep.mubr.msk.bf16.mxu0 %vm6952_vm1, %v6951_v0 }
  0x93   :  { %5968 = vmatmul.mubr.msk.bf16.gmra.mrb[32].mxu0 %vm150_vm3, %v123_v37 }
  0x94   :  { %5971 = vmatprep.mubr.msk.bf16.mxu0 %vm6952_vm1, %v6951_v0 }
  0x9b   :  { %5972 = vmatmul.mubr.msk.bf16.gmra.mrb[36].mxu0 %vm150_vm3, %v124_v40 }
  0x9c   :  { %5975 = vmatprep.mubr.msk.bf16.mxu0 %vm6952_vm1, %v6951_v0 }
  0xa3   :  { %5976 = vmatmul.mubr.msk.bf16.gmra.mrb[40].mxu0 %vm150_vm3, %v125_v43  ;;  %v6346_v43 = vld [vmem:[#allocation2 + $0x70] sm:$0xff]  }
  0xa4   :  { %5979 = vmatprep.mubr.msk.bf16.mxu0 %vm6952_vm1, %v6951_v0 }
  0xab   :  { %5980 = vmatmul.mubr.msk.bf16.gmra.mrb[44].mxu0 %vm150_vm3, %v126_v46  ;;  %v6366_v46 = vld [vmem:[#allocation2 + $0x140] sm:$0xff]  }
  0xac   :  { %5983 = vmatprep.mubr.msk.bf16.mxu0 %vm6952_vm1, %v6951_v0 }
  0xb3   :  { %5984 = vmatmul.mubr.msk.bf16.gmra.mrb[48].mxu0 %vm150_vm3, %v127_v49 }
  0xb4   :  { %6067 = vmatprep.mubr.msk.bf16.mxu0 %vm6952_vm1, %v6951_v0 }
 0x126   :  { %v231_v54 = vpop.f32.mrb[0].mxu0 }
 0x127   :  { %v232_v55 = vadd.f32 %v7202_v53, %v231_v54  ;;  %v5937_v56 = vpop.f32.mrb[1].mxu0 }
 0x128   :  { %v234_v57 = vpop.f32.mrb[2].mxu0 }
 0x129   :  { %v333_v58 = vmax.f32 %v232_v55, 0.0  ;;  %v5938_v59 = vpop.f32.mrb[3].mxu0  ;;  %v235_v5 = vadd.f32 %v7202_v53, %v234_v57  ;;  %v6348_v55 = vld [vmem:[#allocation2 + $0x80] sm:$0xff]  }
 0x12a   :  { %v6349_v59 = vld [vmem:[#allocation2 + $0x88] sm:$0xff]  }
 0x12b   :  { %v5722_v61 = vpack.c.bf16 %v333_v58, %v333_v58  ;;  %v334_v8 = vmax.f32 %v235_v5, 0.0  ;;  %v6370_v58 = vld [vmem:[#allocation2 + $0x150] sm:$0xff]  }
 0x12d   :  { %5996 = vmatmul.mubr.msk.bf16.vlgmr.msra.gmra.mrb[0].mxu1 %vm658_vm4, %v5722_v61  ;;  %v5723_v13 = vpack.c.bf16 %v334_v8, %v334_v8 }
 0x12e   :  { %6000 = vmatpush3.bf16.msra.mxu1 %v6334_v60  ;;  %6007 = vmatprep.mubr.msk.bf16.mxu1 %vm6952_vm1, %v6951_v0  ;;  %v239_v63 = vpop.f32.mrb[4].mxu0 }
 0x12f   :  { %6001 = vmatprep.subr.bf16.mxu1 %v6951_v0  ;;  %v5941_v1 = vpop.f32.mrb[5].mxu0  ;;  %v240_v19 = vadd.f32 %v7202_v53, %v239_v63 }
 0x130   :  { %v7209_v2 = vpop.f32.mrb[6].mxu0 }
 0x131   :  { %v5942_v3 = vpop.f32.mrb[7].mxu0  ;;  %v335_v25 = vmax.f32 %v240_v19, 0.0  ;;  %v243_v45 = vadd.f32 %v7202_v53, %v7209_v2  ;;  %v6378_v19 = vld [vmem:[#allocation2 + $0x190] sm:$0xff]  }
 0x132   :  { %6002 = vmatpush3.bf16.msra.mxu1 %v6335_v62  ;;  %v6372_v62 = vld [vmem:[#allocation2 + $0x158] sm:$0xff]  }
 0x133   :  { %6003 = vmatprep.subr.bf16.mxu1 %v6951_v0  ;;  %v5724_v31 = vpack.c.bf16 %v335_v25, %v335_v25  ;;  %v336_v49 = vmax.f32 %v243_v45, 0.0 }
 0x135   :  { %v5725_v57 = vpack.c.bf16 %v336_v49, %v336_v49 }
 0x136   :  { %6004 = vmatpush3.bf16.msra.mxu1 %v6336_v4  ;;  %v7213_v7 = vpop.f32.mrb[8].mxu0  ;;  %v6350_v4 = vld [vmem:[#allocation2 + $0x90] sm:$0xff]  }
 0x137   :  { %6005 = vmatprep.subr.bf16.mxu1 %v6951_v0  ;;  %v5945_v9 = vpop.f32.mrb[9].mxu0  ;;  %v248_v2 = vadd.f32 %v7202_v53, %v7213_v7  ;;  %v6376_v7 = vld [vmem:[#allocation2 + $0x188] sm:$0xff]  }
 0x138   :  { %v7216_v10 = vpop.f32.mrb[10].mxu0  ;;  %v6351_v9 = vld [vmem:[#allocation2 + $0x98] sm:$0xff]  }
 0x139   :  { %v5946_v11 = vpop.f32.mrb[11].mxu0  ;;  %v337_v8 = vmax.f32 %v248_v2, 0.0 }
 0x13a   :  { %6006 = vmatpush3.bf16.msra.mxu1 %v6338_v6  ;;  %v6374_v6 = vld [vmem:[#allocation2 + $0x180] sm:$0xff]  }
 0x13b   :  { %6011 = vmatprep.subr.bf16.mxu1 %v6951_v0 }
 0x13d   :  { %6008 = vmatmul.mubr.msk.bf16.vlgmr.msra.gmra.mrb[4].mxu1 %vm658_vm4, %v5723_v13 }
 0x13e   :  { %6012 = vmatpush3.bf16.msra.mxu1 %v6339_v12  ;;  %6019 = vmatprep.mubr.msk.bf16.mxu1 %vm6952_vm1, %v6951_v0  ;;  %v255_v15 = vpop.f32.mrb[12].mxu0 }
 0x13f   :  { %6013 = vmatprep.subr.bf16.mxu1 %v6951_v0  ;;  %v256_v16 = vadd.f32 %v7202_v53, %v255_v15  ;;  %v5949_v17 = vpop.f32.mrb[13].mxu0 }
 0x140   :  { %v7224_v18 = vpop.f32.mrb[14].mxu0 }
 0x141   :  { %v339_v20 = vmax.f32 %v256_v16, 0.0  ;;  %v5950_v21 = vpop.f32.mrb[15].mxu0  ;;  %v6353_v16 = vld [vmem:[#allocation2 + $0xa0] sm:$0xff]  }
 0x142   :  { %6014 = vmatpush3.bf16.msra.mxu1 %v6340_v14  ;;  %v5726_v14 = vpack.c.bf16 %v337_v8, %v337_v8  ;;  %v6369_v8 = vld [vmem:[#allocation2 + $0x130] sm:$0xff]  }
 0x143   :  { %6015 = vmatprep.subr.bf16.mxu1 %v6951_v0  ;;  %v5728_v24 = vpack.c.bf16 %v339_v20, %v339_v20  ;;  %v6354_v20 = vld [vmem:[#allocation2 + $0xa8] sm:$0xff]  }
 0x145   :  { %6068 = vmatmul.mubr.msk.bf16.vlgmr.msra.gmra.mrb[52].mxu0 %vm658_vm4, %v5728_v24 }
 0x146   :  { %6016 = vmatpush3.bf16.msra.mxu1 %v6341_v22  ;;  %6084 = vmatpush3.bf16.msra.mxu0 %v6358_v23  ;;  %v263_v28 = vpop.f32.mrb[16].mxu0  ;;  %v6380_v23 = vld [vmem:[#allocation2 + $0x198] sm:$0xff]  }
 0x147   :  { %6017 = vmatprep.subr.bf16.mxu1 %v6951_v0  ;;  %6085 = vmatprep.subr.bf16.mxu0 %v6951_v0  ;;  %v5953_v29 = vpop.f32.mrb[17].mxu0  ;;  %v264_v34 = vadd.f32 %v7202_v53, %v263_v28 }
 0x148   :  { %v7231_v30 = vpop.f32.mrb[18].mxu0  ;;  %6091 = vmatprep.mubr.msk.bf16.mxu0 %vm6952_vm1, %v6951_v0  ;;  %v251_v29 = vadd.f32 %v7202_v53, %v7216_v10 }
 0x149   :  { %v5954_v32 = vpop.f32.mrb[19].mxu0  ;;  %v341_v37 = vmax.f32 %v264_v34, 0.0 }
 0x14a   :  { %6018 = vmatpush3.bf16.msra.mxu1 %v6342_v26  ;;  %6086 = vmatpush3.bf16.msra.mxu0 %v6360_v27  ;;  %v6355_v27 = vld [vmem:[#allocation2 + $0xb0] sm:$0xff]   ;;  %v6356_v32 = vld [vmem:[#allocation2 + $0xb8] sm:$0xff]   ;;  %v338_v34 = vmax.f32 %v251_v29, 0.0 }
 0x14b   :  { %6023 = vmatprep.subr.bf16.mxu1 %v6951_v0  ;;  %6087 = vmatprep.subr.bf16.mxu0 %v6951_v0  ;;  %v5730_v44 = vpack.c.bf16 %v341_v37, %v341_v37 }
 0x14d   :  { %6020 = vmatmul.mubr.msk.bf16.vlgmr.msra.gmra.mrb[8].mxu1 %vm658_vm4, %v5724_v31  ;;  %v6382_v31 = vld [vmem:[#allocation2 + $0x1c0] sm:$0xff]  }
 0x14e   :  { %6024 = vmatpush3.bf16.msra.mxu1 %v6343_v33  ;;  %6031 = vmatprep.mubr.msk.bf16.mxu1 %vm6952_vm1, %v6951_v0  ;;  %v271_v38 = vpop.f32.mrb[20].mxu0 }
 0x14f   :  { %6025 = vmatprep.subr.bf16.mxu1 %v6951_v0  ;;  %6088 = vmatpush3.bf16.msra.mxu0 %v6362_v35  ;;  %v5957_v40 = vpop.f32.mrb[21].mxu0  ;;  %v272_v56 = vadd.f32 %v7202_v53, %v271_v38  ;;  %v6384_v35 = vld [vmem:[#allocation2 + $0x1c8] sm:$0xff]   ;;  %v6357_v38 = vld [vmem:[#allocation2 + $0xe0] sm:$0xff]  }
 0x150   :  { %6089 = vmatprep.subr.bf16.mxu0 %v6951_v0  ;;  %v7243_v41 = vpop.f32.mrb[22].mxu0  ;;  %v5727_v40 = vpack.c.bf16 %v338_v34, %v338_v34 }
 0x151   :  { %v5958_v42 = vpop.f32.mrb[23].mxu0  ;;  %v343_v60 = vmax.f32 %v272_v56, 0.0  ;;  %v6363_v56 = vld [vmem:[#allocation2 + $0xf8] sm:$0xff]  }
 0x152   :  { %6026 = vmatpush3.bf16.msra.mxu1 %v6345_v36  ;;  %v6386_v42 = vld [vmem:[#allocation2 + $0x1d0] sm:$0xff]  }
 0x153   :  { %6027 = vmatprep.subr.bf16.mxu1 %v6951_v0  ;;  %6090 = vmatpush3.bf16.msra.mxu0 %v6364_v39  ;;  %v5732_v5 = vpack.c.bf16 %v343_v60, %v343_v60 }
 0x154   :  { %6107 = vmatprep.subr.bf16.mxu0 %v6951_v0 }
 0x156   :  { %6028 = vmatpush3.bf16.msra.mxu1 %v6346_v43  ;;  %6092 = vmatmul.mubr.msk.bf16.vlgmr.msra.gmra.mrb[56].mxu0 %vm658_vm4, %v5730_v44  ;;  %v279_v48 = vpop.f32.mrb[24].mxu0  ;;  %v6359_v43 = vld [vmem:[#allocation2 + $0xe8] sm:$0xff]  }
 0x157   :  { %6029 = vmatprep.subr.bf16.mxu1 %v6951_v0  ;;  %6108 = vmatpush3.bf16.msra.mxu0 %v6366_v46  ;;  %v5961_v51 = vpop.f32.mrb[25].mxu0  ;;  %v280_v17 = vadd.f32 %v7202_v53, %v279_v48  ;;  %v6388_v46 = vld [vmem:[#allocation2 + $0x1d8] sm:$0xff]  }
 0x158   :  { %6109 = vmatprep.subr.bf16.mxu0 %v6951_v0  ;;  %6115 = vmatprep.mubr.msk.bf16.mxu0 %vm6952_vm1, %v6951_v0  ;;  %v7254_v52 = vpop.f32.mrb[26].mxu0 }
 0x159   :  { %v5962_v54 = vpop.f32.mrb[27].mxu0  ;;  %v345_v21 = vmax.f32 %v280_v17, 0.0 }
 0x15a   :  { %6030 = vmatpush3.bf16.msra.mxu1 %v6347_v47  ;;  %v259_v54 = vadd.f32 %v7202_v53, %v7224_v18 }
 0x15b   :  { %6035 = vmatprep.subr.bf16.mxu1 %v6951_v0  ;;  %6110 = vmatpush3.bf16.msra.mxu0 %v6368_v50  ;;  %v5734_v28 = vpack.c.bf16 %v345_v21, %v345_v21  ;;  %v6361_v50 = vld [vmem:[#allocation2 + $0xf0] sm:$0xff]  }
 0x15c   :  { %6111 = vmatprep.subr.bf16.mxu0 %v6951_v0 }
 0x15d   :  { %6032 = vmatmul.mubr.msk.bf16.vlgmr.msra.gmra.mrb[12].mxu1 %vm658_vm4, %v5725_v57  ;;  %v340_v57 = vmax.f32 %v259_v54, 0.0 }
 0x15e   :  { %6036 = vmatpush3.bf16.msra.mxu1 %v6348_v55  ;;  %6043 = vmatprep.mubr.msk.bf16.mxu1 %vm6952_vm1, %v6951_v0  ;;  %v7262_v61 = vpop.f32.mrb[28].mxu0  ;;  %v6390_v55 = vld [vmem:[#allocation2 + $0x200] sm:$0xff]  }
 0x15f   :  { %6037 = vmatprep.subr.bf16.mxu1 %v6951_v0  ;;  %6112 = vmatpush3.bf16.msra.mxu0 %v6370_v58  ;;  %v5965_v63 = vpop.f32.mrb[29].mxu0  ;;  %v288_v39 = vadd.f32 %v7202_v53, %v7262_v61  ;;  %v6392_v58 = vld [vmem:[#allocation2 + $0x208] sm:$0xff]  }
 0x160   :  { %6113 = vmatprep.subr.bf16.mxu0 %v6951_v0  ;;  %v7266_v1 = vpop.f32.mrb[30].mxu0  ;;  %v6394_v63 = vld [vmem:[#allocation2 + $0x210] sm:$0xff]  }
 0x161   :  { %v5966_v3 = vpop.f32.mrb[31].mxu0  ;;  %v347_v44 = vmax.f32 %v288_v39, 0.0 }
 0x162   :  { %6038 = vmatpush3.bf16.msra.mxu1 %v6349_v59  ;;  %v6365_v59 = vld [vmem:[#allocation2 + $0x120] sm:$0xff]  }
 0x163   :  { %6039 = vmatprep.subr.bf16.mxu1 %v6951_v0  ;;  %6114 = vmatpush3.bf16.msra.mxu0 %v6372_v62  ;;  %v5736_v51 = vpack.c.bf16 %v347_v44, %v347_v44  ;;  %v5729_v62 = vpack.c.bf16 %v340_v57, %v340_v57  ;;  %v291_v57 = vadd.f32 %v7202_v53, %v7266_v1  ;;  %v6397_v1 = vld [vmem:[#allocation2 + $0x220] sm:$0xff]  }
 0x164   :  { %6131 = vmatprep.subr.bf16.mxu0 %v6951_v0 }
 0x166   :  { %6040 = vmatpush3.bf16.msra.mxu1 %v6350_v4  ;;  %6116 = vmatmul.mubr.msk.bf16.vlgmr.msra.gmra.mrb[60].mxu0 %vm658_vm4, %v5732_v5  ;;  %v7273_v11 = vpop.f32.mrb[32].mxu0  ;;  %v6367_v4 = vld [vmem:[#allocation2 + $0x128] sm:$0xff]  }
 0x167   :  { %6041 = vmatprep.subr.bf16.mxu1 %v6951_v0  ;;  %6132 = vmatpush3.bf16.msra.mxu0 %v6374_v6  ;;  %v5969_v12 = vpop.f32.mrb[33].mxu0  ;;  %v296_v60 = vadd.f32 %v7202_v53, %v7273_v11  ;;  %v6396_v6 = vld [vmem:[#allocation2 + $0x218] sm:$0xff]   ;;  %v267_v11 = vadd.f32 %v7202_v53, %v7231_v30  ;;  %v6373_v30 = vld [vmem:[#allocation2 + $0x160] sm:$0xff]  }
 0x168   :  { %6133 = vmatprep.subr.bf16.mxu0 %v6951_v0  ;;  %6139 = vmatprep.mubr.msk.bf16.mxu0 %vm6952_vm1, %v6951_v0  ;;  %v7279_v13 = vpop.f32.mrb[34].mxu0  ;;  %v6371_v12 = vld [vmem:[#allocation2 + $0x138] sm:$0xff]  }
 0x169   :  { %v5970_v15 = vpop.f32.mrb[35].mxu0  ;;  %v349_v5 = vmax.f32 %v296_v60, 0.0  ;;  %v348_v60 = vmax.f32 %v291_v57, 0.0 }
 0x16a   :  { %6042 = vmatpush3.bf16.msra.mxu1 %v6351_v9  ;;  %v6400_v15 = vld [vmem:[#allocation2 + $0x248] sm:$0xff]  }
 0x16b   :  { %6047 = vmatprep.subr.bf16.mxu1 %v6951_v0  ;;  %6134 = vmatpush3.bf16.msra.mxu0 %v6376_v7  ;;  %v5738_v9 = vpack.c.bf16 %v349_v5, %v349_v5  ;;  %v6398_v7 = vld [vmem:[#allocation2 + $0x240] sm:$0xff]   ;;  %v6428_v5 = vld [vmem:[#allocation2 + $0x318] sm:$0xff]  }
 0x16c   :  { %6135 = vmatprep.subr.bf16.mxu0 %v6951_v0 }
 0x16d   :  { %6044 = vmatmul.mubr.msk.bf16.vlgmr.msra.gmra.mrb[16].mxu1 %vm658_vm4, %v5726_v14  ;;  %v342_v14 = vmax.f32 %v267_v11, 0.0 }
 0x16e   :  { %6048 = vmatpush3.bf16.msra.mxu1 %v6353_v16  ;;  %6055 = vmatprep.mubr.msk.bf16.mxu1 %vm6952_vm1, %v6951_v0  ;;  %v7287_v22 = vpop.f32.mrb[36].mxu0 }
 0x16f   :  { %6049 = vmatprep.subr.bf16.mxu1 %v6951_v0  ;;  %6136 = vmatpush3.bf16.msra.mxu0 %v6378_v19  ;;  %v5973_v24 = vpop.f32.mrb[37].mxu0  ;;  %v304_v16 = vadd.f32 %v7202_v53, %v7287_v22  ;;  %v5731_v17 = vpack.c.bf16 %v342_v14, %v342_v14  ;;  %v6402_v19 = vld [vmem:[#allocation2 + $0x250] sm:$0xff]   ;;  %v6407_v14 = vld [vmem:[#allocation2 + $0x268] sm:$0xff]  }
 0x170   :  { %6137 = vmatprep.subr.bf16.mxu0 %v6951_v0  ;;  %v7291_v25 = vpop.f32.mrb[38].mxu0  ;;  %v6377_v22 = vld [vmem:[#allocation2 + $0x170] sm:$0xff]  }
 0x171   :  { %v5974_v26 = vpop.f32.mrb[39].mxu0  ;;  %v351_v21 = vmax.f32 %v304_v16, 0.0 }
 0x172   :  { %6050 = vmatpush3.bf16.msra.mxu1 %v6354_v20  ;;  %v6375_v20 = vld [vmem:[#allocation2 + $0x168] sm:$0xff]   ;;  %v275_v26 = vadd.f32 %v7202_v53, %v7243_v41  ;;  %v6381_v41 = vld [vmem:[#allocation2 + $0x1a0] sm:$0xff]  }
 0x173   :  { %6051 = vmatprep.subr.bf16.mxu1 %v6951_v0  ;;  %6138 = vmatpush3.bf16.msra.mxu0 %v6380_v23  ;;  %v6404_v23 = vld [vmem:[#allocation2 + $0x258] sm:$0xff]   ;;  %v5740_v24 = vpack.c.bf16 %v351_v21, %v351_v21 }
 0x174   :  { %6155 = vmatprep.subr.bf16.mxu0 %v6951_v0  ;;  %v344_v29 = vmax.f32 %v275_v26, 0.0 }
 0x176   :  { %6052 = vmatpush3.bf16.msra.mxu1 %v6355_v27  ;;  %6140 = vmatmul.mubr.msk.bf16.vlgmr.msra.gmra.mrb[64].mxu0 %vm658_vm4, %v5734_v28  ;;  %v7298_v33 = vpop.f32.mrb[40].mxu0  ;;  %v6406_v27 = vld [vmem:[#allocation2 + $0x280] sm:$0xff]   ;;  %v6379_v28 = vld [vmem:[#allocation2 + $0x178] sm:$0xff]   ;;  %v5733_v34 = vpack.c.bf16 %v344_v29, %v344_v29 }
 0x177   :  { %6053 = vmatprep.subr.bf16.mxu1 %v6951_v0  ;;  %6156 = vmatpush3.bf16.msra.mxu0 %v6382_v31  ;;  %v5977_v36 = vpop.f32.mrb[41].mxu0  ;;  %v6408_v31 = vld [vmem:[#allocation2 + $0x288] sm:$0xff]  }
 0x178   :  { %6157 = vmatprep.subr.bf16.mxu0 %v6951_v0  ;;  %6163 = vmatprep.mubr.msk.bf16.mxu0 %vm6952_vm1, %v6951_v0  ;;  %v7304_v10 = vpop.f32.mrb[42].mxu0  ;;  %v6383_v36 = vld [vmem:[#allocation2 + $0x1a8] sm:$0xff]  }
 0x179   :  { %v5978_v37 = vpop.f32.mrb[43].mxu0  ;;  %v315_v21 = vadd.f32 %v7202_v53, %v7304_v10 }
 0x17a   :  { %6054 = vmatpush3.bf16.msra.mxu1 %v6356_v32  ;;  %v312_v32 = vadd.f32 %v7202_v53, %v7298_v33  ;;  %v6385_v33 = vld [vmem:[#allocation2 + $0x1b0] sm:$0xff]  }
 0x17b   :  { %6071 = vmatprep.subr.bf16.mxu1 %v6951_v0  ;;  %6158 = vmatpush3.bf16.msra.mxu0 %v6384_v35  ;;  %v6410_v35 = vld [vmem:[#allocation2 + $0x290] sm:$0xff]  }
 0x17c   :  { %6159 = vmatprep.subr.bf16.mxu0 %v6951_v0  ;;  %v353_v37 = vmax.f32 %v312_v32, 0.0 }
 0x17d   :  { %6056 = vmatmul.mubr.msk.bf16.vlgmr.msra.gmra.mrb[20].mxu1 %vm658_vm4, %v5727_v40  ;;  %v283_v40 = vadd.f32 %v7202_v53, %v7254_v52  ;;  %v6389_v52 = vld [vmem:[#allocation2 + $0x1e0] sm:$0xff]  }
 0x17e   :  { %6072 = vmatpush3.bf16.msra.mxu1 %v6357_v38  ;;  %6079 = vmatprep.mubr.msk.bf16.mxu1 %vm6952_vm1, %v6951_v0  ;;  %v7313_v45 = vpop.f32.mrb[44].mxu0  ;;  %v6412_v38 = vld [vmem:[#allocation2 + $0x298] sm:$0xff]   ;;  %v5742_v39 = vpack.c.bf16 %v353_v37, %v353_v37 }
 0x17f   :  { %6073 = vmatprep.subr.bf16.mxu1 %v6951_v0  ;;  %6160 = vmatpush3.bf16.msra.mxu0 %v6386_v42  ;;  %v5981_v47 = vpop.f32.mrb[45].mxu0  ;;  %v6414_v42 = vld [vmem:[#allocation2 + $0x2c0] sm:$0xff]   ;;  %v346_v44 = vmax.f32 %v283_v40, 0.0 }
 0x180   :  { %6161 = vmatprep.subr.bf16.mxu0 %v6951_v0  ;;  %v7317_v48 = vpop.f32.mrb[46].mxu0  ;;  %v320_v47 = vadd.f32 %v7202_v53, %v7313_v45  ;;  %v6393_v45 = vld [vmem:[#allocation2 + $0x1f0] sm:$0xff]  }
 0x181   :  { %v5982_v49 = vpop.f32.mrb[47].mxu0 }
 0x182   :  { %6074 = vmatpush3.bf16.msra.mxu1 %v6359_v43  ;;  %v6387_v43 = vld [vmem:[#allocation2 + $0x1b8] sm:$0xff]   ;;  %v5735_v49 = vpack.c.bf16 %v346_v44, %v346_v44  ;;  %v355_v54 = vmax.f32 %v320_v47, 0.0 }
 0x183   :  { %6075 = vmatprep.subr.bf16.mxu1 %v6951_v0  ;;  %6162 = vmatpush3.bf16.msra.mxu0 %v6388_v46  ;;  %v6416_v46 = vld [vmem:[#allocation2 + $0x2c8] sm:$0xff]  }
 0x184   :  { %6179 = vmatprep.subr.bf16.mxu0 %v6951_v0 }
 0x186   :  { %6076 = vmatpush3.bf16.msra.mxu1 %v6361_v50  ;;  %6164 = vmatmul.mubr.msk.bf16.vlgmr.msra.gmra.mrb[68].mxu0 %vm658_vm4, %v5736_v51  ;;  %v7328_v18 = vpop.f32.mrb[48].mxu0  ;;  %v6418_v50 = vld [vmem:[#allocation2 + $0x2d0] sm:$0xff]   ;;  %v6391_v51 = vld [vmem:[#allocation2 + $0x1e8] sm:$0xff]  }
 0x187   :  { %6077 = vmatprep.subr.bf16.mxu1 %v6951_v0  ;;  %6180 = vmatpush3.bf16.msra.mxu0 %v6390_v55  ;;  %v5985_v61 = vpop.f32.mrb[49].mxu0  ;;  %v6420_v55 = vld [vmem:[#allocation2 + $0x2d8] sm:$0xff]  }
 0x188   :  { %6181 = vmatprep.subr.bf16.mxu0 %v6951_v0  ;;  %6187 = vmatprep.mubr.msk.bf16.mxu0 %vm6952_vm1, %v6951_v0  ;;  %v330_v2 = vpop.f32.mrb[50].mxu0  ;;  %v6424_v61 = vld [vmem:[#allocation2 + $0x308] sm:$0xff]  }
 0x189   :  { %v5986_v3 = vpop.f32.mrb[51].mxu0  ;;  %v6426_v2 = vld [vmem:[#allocation2 + $0x310] sm:$0xff]  }
 0x18a   :  { %6078 = vmatpush3.bf16.msra.mxu1 %v6363_v56  ;;  %v5744_v56 = vpack.c.bf16 %v355_v54, %v355_v54  ;;  %v6399_v3 = vld [vmem:[#allocation2 + $0x228] sm:$0xff]  }
 0x18b   :  { %6095 = vmatprep.subr.bf16.mxu1 %v6951_v0  ;;  %6182 = vmatpush3.bf16.msra.mxu0 %v6392_v58  ;;  %v6422_v58 = vld [vmem:[#allocation2 + $0x300] sm:$0xff]  }
 0x18c   :  { %6183 = vmatprep.subr.bf16.mxu0 %v6951_v0 }
 0x18d   :  { %6080 = vmatmul.mubr.msk.bf16.vlgmr.msra.gmra.mrb[24].mxu1 %vm658_vm4, %v5729_v62  ;;  %v328_v62 = vadd.f32 %v7202_v53, %v7328_v18  ;;  %v6401_v18 = vld [vmem:[#allocation2 + $0x230] sm:$0xff]  }
 0x18e   :  { %6096 = vmatpush3.bf16.msra.mxu1 %v6365_v59  ;;  %6103 = vmatprep.mubr.msk.bf16.mxu1 %vm6952_vm1, %v6951_v0  ;;  %v6395_v59 = vld [vmem:[#allocation2 + $0x1f8] sm:$0xff]  }
 0x18f   :  { %6097 = vmatprep.subr.bf16.mxu1 %v6951_v0  ;;  %6184 = vmatpush3.bf16.msra.mxu0 %v6394_v63  ;;  %v5737_v63 = vpack.c.bf16 %v348_v60, %v348_v60 }
 0x190   :  { %6185 = vmatprep.subr.bf16.mxu0 %v6951_v0 }
 0x192   :  { %6098 = vmatpush3.bf16.msra.mxu1 %v6367_v4  ;;  %v357_v4 = vmax.f32 %v328_v62, 0.0 }
 0x193   :  { %6099 = vmatprep.subr.bf16.mxu1 %v6951_v0  ;;  %6186 = vmatpush3.bf16.msra.mxu0 %v6396_v6 }
 0x194   :  { %6203 = vmatprep.subr.bf16.mxu0 %v6951_v0  ;;  %v5746_v6 = vpack.c.bf16 %v357_v4, %v357_v4 }
 0x196   :  { %6100 = vmatpush3.bf16.msra.mxu1 %v6369_v8  ;;  %6188 = vmatmul.mubr.msk.bf16.vlgmr.msra.gmra.mrb[72].mxu0 %vm658_vm4, %v5738_v9  ;;  %v299_v8 = vadd.f32 %v7202_v53, %v7279_v13  ;;  %v6403_v9 = vld [vmem:[#allocation2 + $0x238] sm:$0xff]   ;;  %v6409_v13 = vld [vmem:[#allocation2 + $0x270] sm:$0xff]  }
 0x197   :  { %6101 = vmatprep.subr.bf16.mxu1 %v6951_v0  ;;  %6204 = vmatpush3.bf16.msra.mxu0 %v6398_v7  ;;  %v6405_v7 = vld [vmem:[#allocation2 + $0x260] sm:$0xff]  }
 0x198   :  { %6205 = vmatprep.subr.bf16.mxu0 %v6951_v0  ;;  %6211 = vmatprep.mubr.msk.bf16.mxu0 %vm6952_vm1, %v6951_v0  ;;  %v350_v11 = vmax.f32 %v299_v8, 0.0  ;;  %v2344_v8 = vld [vmem:[#allocation4] sm:$0xff] }
 0x19a   :  { %6102 = vmatpush3.bf16.msra.mxu1 %v6371_v12  ;;  %v5739_v12 = vpack.c.bf16 %v350_v11, %v350_v11  ;;  %v2345_v11 = vld [vmem:[#allocation4 + $0x8] sm:$0xff] }
 0x19b   :  { %6119 = vmatprep.subr.bf16.mxu1 %v6951_v0  ;;  %6206 = vmatpush3.bf16.msra.mxu0 %v6400_v15  ;;  %v307_v15 = vadd.f32 %v7202_v53, %v7291_v25  ;;  %v6417_v25 = vld [vmem:[#allocation2 + $0x2b0] sm:$0xff]  }
 0x19c   :  { %6207 = vmatprep.subr.bf16.mxu0 %v6951_v0 }
 0x19d   :  { %6104 = vmatmul.mubr.msk.bf16.vlgmr.msra.gmra.mrb[28].mxu1 %vm658_vm4, %v5731_v17  ;;  %v352_v16 = vmax.f32 %v307_v15, 0.0  ;;  %v6413_v17 = vld [vmem:[#allocation2 + $0x2a0] sm:$0xff]  }
 0x19e   :  { %6120 = vmatpush3.bf16.msra.mxu1 %v6373_v30  ;;  %6127 = vmatprep.mubr.msk.bf16.mxu1 %vm6952_vm1, %v6951_v0  ;;  %v6411_v30 = vld [vmem:[#allocation2 + $0x278] sm:$0xff]  }
 0x19f   :  { %6121 = vmatprep.subr.bf16.mxu1 %v6951_v0  ;;  %6208 = vmatpush3.bf16.msra.mxu0 %v6402_v19  ;;  %v5741_v19 = vpack.c.bf16 %v352_v16, %v352_v16 }
 0x1a0   :  { %6209 = vmatprep.subr.bf16.mxu0 %v6951_v0 }
 0x1a2   :  { %6122 = vmatpush3.bf16.msra.mxu1 %v6375_v20  ;;  %v6415_v20 = vld [vmem:[#allocation2 + $0x2a8] sm:$0xff]  }
 0x1a3   :  { %6123 = vmatprep.subr.bf16.mxu1 %v6951_v0  ;;  %6210 = vmatpush3.bf16.msra.mxu0 %v6404_v23  ;;  %v6419_v23 = vld [vmem:[#allocation2 + $0x2b8] sm:$0xff]  }
 0x1a4   :  { %6227 = vmatprep.subr.bf16.mxu0 %v6951_v0 }
 0x1a6   :  { %6124 = vmatpush3.bf16.msra.mxu1 %v6377_v22  ;;  %6212 = vmatmul.mubr.msk.bf16.vlgmr.msra.gmra.mrb[76].mxu0 %vm658_vm4, %v5740_v24  ;;  %v354_v22 = vmax.f32 %v315_v21, 0.0  ;;  %v6421_v24 = vld [vmem:[#allocation2 + $0x2e0] sm:$0xff]  }
 0x1a7   :  { %6125 = vmatprep.subr.bf16.mxu1 %v6951_v0  ;;  %6228 = vmatpush3.bf16.msra.mxu0 %v6406_v27  ;;  %v6423_v27 = vld [vmem:[#allocation2 + $0x2e8] sm:$0xff]  }
 0x1a8   :  { %6229 = vmatprep.subr.bf16.mxu0 %v6951_v0  ;;  %6235 = vmatprep.mubr.msk.bf16.mxu0 %vm6952_vm1, %v6951_v0  ;;  %v5743_v26 = vpack.c.bf16 %v354_v22, %v354_v22  ;;  %v2357_v22 = vld [vmem:[#allocation4 + $0x68] sm:$0xff] }
 0x1aa   :  { %6126 = vmatpush3.bf16.msra.mxu1 %v6379_v28 }
 0x1ab   :  { %6143 = vmatprep.subr.bf16.mxu1 %v6951_v0  ;;  %6230 = vmatpush3.bf16.msra.mxu0 %v6408_v31  ;;  %v6425_v31 = vld [vmem:[#allocation2 + $0x2f0] sm:$0xff]  }
 0x1ac   :  { %6231 = vmatprep.subr.bf16.mxu0 %v6951_v0 }
 0x1ad   :  { %6128 = vmatmul.mubr.msk.bf16.vlgmr.msra.gmra.mrb[32].mxu1 %vm658_vm4, %v5733_v34  ;;  %v6427_v34 = vld [vmem:[#allocation2 + $0x2f8] sm:$0xff]  }
 0x1ae   :  { %6144 = vmatpush3.bf16.msra.mxu1 %v6381_v41  ;;  %6151 = vmatprep.mubr.msk.bf16.mxu1 %vm6952_vm1, %v6951_v0  ;;  %v323_v41 = vadd.f32 %v7202_v53, %v7317_v48 }
 0x1af   :  { %6145 = vmatprep.subr.bf16.mxu1 %v6951_v0  ;;  %6232 = vmatpush3.bf16.msra.mxu0 %v6410_v35 }
 0x1b0   :  { %6233 = vmatprep.subr.bf16.mxu0 %v6951_v0  ;;  %v356_v35 = vmax.f32 %v323_v41, 0.0 }
 0x1b2   :  { %6146 = vmatpush3.bf16.msra.mxu1 %v6383_v36  ;;  %v5745_v36 = vpack.c.bf16 %v356_v35, %v356_v35  ;;  %v2372_v35 = vld [vmem:[#allocation4 + $0xe0] sm:$0xff] }
 0x1b3   :  { %6147 = vmatprep.subr.bf16.mxu1 %v6951_v0  ;;  %6234 = vmatpush3.bf16.msra.mxu0 %v6412_v38 }
 0x1b4   :  { %6251 = vmatprep.subr.bf16.mxu0 %v6951_v0 }
 0x1b6   :  { %6148 = vmatpush3.bf16.msra.mxu1 %v6385_v33  ;;  %6236 = vmatmul.mubr.msk.bf16.vlgmr.msra.gmra.mrb[80].mxu0 %vm658_vm4, %v5742_v39 }
 0x1b7   :  { %6149 = vmatprep.subr.bf16.mxu1 %v6951_v0  ;;  %6252 = vmatpush3.bf16.msra.mxu0 %v6414_v42 }
 0x1b8   :  { %6253 = vmatprep.subr.bf16.mxu0 %v6951_v0  ;;  %6259 = vmatprep.mubr.msk.bf16.mxu0 %vm6952_vm1, %v6951_v0 }
 0x1ba   :  { %6150 = vmatpush3.bf16.msra.mxu1 %v6387_v43 }
 0x1bb   :  { %6167 = vmatprep.subr.bf16.mxu1 %v6951_v0  ;;  %6254 = vmatpush3.bf16.msra.mxu0 %v6416_v46 }
 0x1bc   :  { %6255 = vmatprep.subr.bf16.mxu0 %v6951_v0 }
 0x1bd   :  { %6152 = vmatmul.mubr.msk.bf16.vlgmr.msra.gmra.mrb[36].mxu1 %vm658_vm4, %v5735_v49 }
 0x1be   :  { %6168 = vmatpush3.bf16.msra.mxu1 %v6389_v52  ;;  %6175 = vmatprep.mubr.msk.bf16.mxu1 %vm6952_vm1, %v6951_v0 }
 0x1bf   :  { %6169 = vmatprep.subr.bf16.mxu1 %v6951_v0  ;;  %6256 = vmatpush3.bf16.msra.mxu0 %v6418_v50 }
 0x1c0   :  { %6257 = vmatprep.subr.bf16.mxu0 %v6951_v0 }
 0x1c2   :  { %6170 = vmatpush3.bf16.msra.mxu1 %v6391_v51 }
 0x1c3   :  { %6171 = vmatprep.subr.bf16.mxu1 %v6951_v0  ;;  %6258 = vmatpush3.bf16.msra.mxu0 %v6420_v55 }
 0x1c4   :  { %6275 = vmatprep.subr.bf16.mxu0 %v6951_v0 }
 0x1c6   :  { %6172 = vmatpush3.bf16.msra.mxu1 %v6393_v45  ;;  %6260 = vmatmul.mubr.msk.bf16.vlgmr.msra.gmra.mrb[84].mxu0 %vm658_vm4, %v5744_v56 }
 0x1c7   :  { %6173 = vmatprep.subr.bf16.mxu1 %v6951_v0  ;;  %6276 = vmatpush3.bf16.msra.mxu0 %v6422_v58 }
 0x1c8   :  { %6277 = vmatprep.subr.bf16.mxu0 %v6951_v0  ;;  %6283 = vmatprep.mubr.msk.bf16.mxu0 %vm6952_vm1, %v6951_v0 }
 0x1ca   :  { %6174 = vmatpush3.bf16.msra.mxu1 %v6395_v59 }
 0x1cb   :  { %6191 = vmatprep.subr.bf16.mxu1 %v6951_v0  ;;  %6278 = vmatpush3.bf16.msra.mxu0 %v6424_v61 }
 0x1cc   :  { %6279 = vmatprep.subr.bf16.mxu0 %v6951_v0 }
 0x1cd   :  { %6176 = vmatmul.mubr.msk.bf16.vlgmr.msra.gmra.mrb[40].mxu1 %vm658_vm4, %v5737_v63 }
 0x1ce   :  { %6192 = vmatpush3.bf16.msra.mxu1 %v6397_v1  ;;  %6199 = vmatprep.mubr.msk.bf16.mxu1 %vm6952_vm1, %v6951_v0 }
 0x1cf   :  { %6193 = vmatprep.subr.bf16.mxu1 %v6951_v0  ;;  %6280 = vmatpush3.bf16.msra.mxu0 %v6426_v2 }
 0x1d0   :  { %6281 = vmatprep.subr.bf16.mxu0 %v6951_v0 }
 0x1d2   :  { %6194 = vmatpush3.bf16.msra.mxu1 %v6399_v3 }
 0x1d3   :  { %6195 = vmatprep.subr.bf16.mxu1 %v6951_v0  ;;  %6282 = vmatpush3.bf16.msra.mxu0 %v6428_v5 }
 0x1d6   :  { %6196 = vmatpush3.bf16.msra.mxu1 %v6401_v18  ;;  %6284 = vmatmul.mubr.msk.bf16.vlgmr.msra.gmra.mrb[88].mxu0 %vm658_vm4, %v5746_v6 }
 0x1d7   :  { %6197 = vmatprep.subr.bf16.mxu1 %v6951_v0 }
 0x1da   :  { %6198 = vmatpush3.bf16.msra.mxu1 %v6403_v9  ;;  %v2348_v9 = vld [vmem:[#allocation4 + $0x20] sm:$0xff] }
 0x1db   :  { %6215 = vmatprep.subr.bf16.mxu1 %v6951_v0 }
 0x1dd   :  { %6200 = vmatmul.mubr.msk.bf16.vlgmr.msra.gmra.mrb[44].mxu1 %vm658_vm4, %v5739_v12  ;;  %v2349_v12 = vld [vmem:[#allocation4 + $0x28] sm:$0xff] }
 0x1de   :  { %6216 = vmatpush3.bf16.msra.mxu1 %v6405_v7  ;;  %6223 = vmatprep.mubr.msk.bf16.mxu1 %vm6952_vm1, %v6951_v0  ;;  %v5369_v7 = vcombine.high %v2344_v8, %v2348_v9  ;;  %v5371_v15 = vcombine.high %v2345_v11, %v2349_v12 }
 0x1df   :  { %6217 = vmatprep.subr.bf16.mxu1 %v6951_v0 }
 0x1e0   :  { %2811 = vmatprep.subr.bf16.mxu0 %v5371_v15 }
 0x1e2   :  { %6218 = vmatpush3.bf16.msra.mxu1 %v6407_v14  ;;  %v5368_v14 = vcombine.low %v2344_v8, %v2348_v9 }
 0x1e3   :  { %6219 = vmatprep.subr.bf16.mxu1 %v6951_v0 }
 0x1e6   :  { %6220 = vmatpush3.bf16.msra.mxu1 %v6409_v13  ;;  %v5370_v13 = vcombine.low %v2345_v11, %v2349_v12 }
 0x1e7   :  { %6221 = vmatprep.subr.bf16.mxu1 %v6951_v0 }
 0x1e8   :  { %2812 = vmatpush1.bf16.msra.mxu0 %v5370_v13  ;;  %v2393_v13 = vld [vmem:[#allocation4 + $0x188] sm:$0xff] }
 0x1ea   :  { %6222 = vmatpush3.bf16.msra.mxu1 %v6411_v30 }
 0x1eb   :  { %6239 = vmatprep.subr.bf16.mxu1 %v6951_v0 }
 0x1ed   :  { %6224 = vmatmul.mubr.msk.bf16.vlgmr.msra.gmra.mrb[48].mxu1 %vm658_vm4, %v5741_v19  ;;  %v2352_v19 = vld [vmem:[#allocation4 + $0x40] sm:$0xff] }
 0x1ee   :  { %6240 = vmatpush3.bf16.msra.mxu1 %v6413_v17  ;;  %6247 = vmatprep.mubr.msk.bf16.mxu1 %vm6952_vm1, %v6951_v0 }
 0x1ef   :  { %6241 = vmatprep.subr.bf16.mxu1 %v6951_v0 }
 0x1f2   :  { %6242 = vmatpush3.bf16.msra.mxu1 %v6415_v20  ;;  %v2356_v20 = vld [vmem:[#allocation4 + $0x60] sm:$0xff] }
 0x1f3   :  { %6243 = vmatprep.subr.bf16.mxu1 %v6951_v0 }
 0x1f6   :  { %6244 = vmatpush3.bf16.msra.mxu1 %v6417_v25  ;;  %v2353_v25 = vld [vmem:[#allocation4 + $0x48] sm:$0xff] }
 0x1f7   :  { %6245 = vmatprep.subr.bf16.mxu1 %v6951_v0 }
 0x1fa   :  { %6246 = vmatpush3.bf16.msra.mxu1 %v6419_v23  ;;  %v5377_v23 = vcombine.high %v2352_v19, %v2356_v20 }
 0x1fb   :  { %6263 = vmatprep.subr.bf16.mxu1 %v6951_v0 }
 0x1fd   :  { %6248 = vmatmul.mubr.msk.bf16.vlgmr.msra.gmra.mrb[52].mxu1 %vm658_vm4, %v5743_v26  ;;  %v5376_v26 = vcombine.low %v2352_v19, %v2356_v20 }
 0x1fe   :  { %6264 = vmatpush3.bf16.msra.mxu1 %v6421_v24  ;;  %6271 = vmatprep.mubr.msk.bf16.mxu1 %vm6952_vm1, %v6951_v0 }
 0x1ff   :  { %6265 = vmatprep.subr.bf16.mxu1 %v6951_v0 }
 0x200   :  { %v696_v10 = vpop.f32.mrb[0].mxu1 }
 0x201   :  { %v5997_v28 = vpop.f32.mrb[1].mxu1 }
 0x202   :  { %6266 = vmatpush3.bf16.msra.mxu1 %v6423_v27  ;;  %v699_v29 = vpop.f32.mrb[2].mxu1  ;;  %v5378_v27 = vcombine.low %v2353_v25, %v2357_v22  ;;  %v2360_v28 = vld [vmem:[#allocation4 + $0x80] sm:$0xff] }
 0x203   :  { %v5998_v32 = vpop.f32.mrb[3].mxu1  ;;  %6267 = vmatprep.subr.bf16.mxu1 %v6951_v0  ;;  %v2364_v29 = vld [vmem:[#allocation4 + $0xa0] sm:$0xff] }
 0x204   :  { %v5385_v41 = vcombine.high %v2360_v28, %v2364_v29  ;;  %v2365_v32 = vld [vmem:[#allocation4 + $0xa8] sm:$0xff] }
 0x206   :  { %6268 = vmatpush3.bf16.msra.mxu1 %v6425_v31  ;;  %v2361_v31 = vld [vmem:[#allocation4 + $0x88] sm:$0xff] }
 0x207   :  { %6269 = vmatprep.subr.bf16.mxu1 %v6951_v0 }
 0x20a   :  { %6270 = vmatpush3.bf16.msra.mxu1 %v6427_v34  ;;  %v2368_v34 = vld [vmem:[#allocation4 + $0xc0] sm:$0xff] }
 0x20b   :  { %2770 = vmatprep.subr.bf16.mxu1 %v5369_v7 }
 0x20d   :  { %6272 = vmatmul.mubr.msk.bf16.vlgmr.msra.gmra.mrb[56].mxu1 %vm658_vm4, %v5745_v36  ;;  %v5384_v36 = vcombine.low %v2360_v28, %v2364_v29 }
 0x20e   :  { %2771 = vmatpush1.bf16.msra.mxu1 %v5368_v14  ;;  %v2396_v14 = vld [vmem:[#allocation4 + $0x1a0] sm:$0xff] }
 0x20f   :  { %2772 = vmatprep.subr.bf16.mxu1 %v5377_v23 }
 0x210   :  { %v763_v37 = vpop.f32.mrb[4].mxu1 }
 0x211   :  { %v2310_v38 = vadd.f32 %v763_v37, %v696_v10  ;;  %v6009_v33 = vpop.f32.mrb[5].mxu1  ;;  %v5379_v10 = vcombine.high %v2353_v25, %v2357_v22  ;;  %v5387_v37 = vcombine.high %v2361_v31, %v2365_v32  ;;  %v2400_v25 = vld [vmem:[#allocation4 + $0x1c0] sm:$0xff]  ;;  %v2401_v22 = vld [vmem:[#allocation4 + $0x1c8] sm:$0xff] }
 0x212   :  { %v766_v39 = vpop.f32.mrb[6].mxu1  ;;  %2773 = vmatpush1.bf16.msra.mxu1 %v5376_v26  ;;  %v2373_v33 = vld [vmem:[#allocation4 + $0xe8] sm:$0xff] }
 0x213   :  { %v6010_v40 = vpop.f32.mrb[7].mxu1  ;;  %2813 = vmatprep.subr.bf16.mxu0 %v5379_v10  ;;  %2774 = vmatprep.subr.bf16.mxu1 %v5385_v41  ;;  %v5386_v39 = vcombine.low %v2361_v31, %v2365_v32  ;;  %v7465_v31 = vld [vmem:[#allocation4 + $0x10] sm:$0xff]  ;;  %v7469_v32 = vld [vmem:[#allocation4 + $0x18] sm:$0xff] }
 0x214   :  { %2814 = vmatpush1.bf16.msra.mxu0 %v5378_v27  ;;  %v5393_v40 = vcombine.high %v2368_v34, %v2372_v35  ;;  %v7467_v41 = vld [vmem:[#allocation4 + $0x30] sm:$0xff] }
 0x215   :  { %2815 = vmatprep.subr.bf16.mxu0 %v5387_v37 }
 0x216   :  { %2775 = vmatpush1.bf16.msra.mxu1 %v5384_v36  ;;  %v5372_v36 = vcombine.low %v7465_v31, %v7467_v41 }
 0x217   :  { %2776 = vmatprep.subr.bf16.mxu1 %v5393_v40 }
 0x218   :  { %v7444_v42 = vpop.f32.mrb[52].mxu0  ;;  %2816 = vmatpush1.bf16.msra.mxu0 %v5386_v39  ;;  %v6954_v39 = vmov 0  }
 0x219   :  { %v6069_v53 = vpop.f32.mrb[53].mxu0  ;;  %2802 = vmatprep.mubr.bf16.mxu1 %v6954_v39  ;;  %2843 = vmatprep.mubr.bf16.mxu0 %v6954_v39 }
 0x21a   :  { %v1101_v48 = vpop.f32.mrb[54].mxu0 }
 0x21b   :  { %v6070_v43 = vpop.f32.mrb[55].mxu0 }
 0x21c   :  { %v5392_v43 = vcombine.low %v2368_v34, %v2372_v35  ;;  %v5373_v34 = vcombine.high %v7465_v31, %v7467_v41  ;;  %v7473_v35 = vld [vmem:[#allocation4 + $0x38] sm:$0xff] }
 0x21d   :  { %v5374_v37 = vcombine.low %v7469_v32, %v7473_v35 }
 0x21e   :  { %2777 = vmatpush1.bf16.msra.mxu1 %v5392_v43 }
 0x220   :  { %v830_v44 = vpop.f32.mrb[8].mxu1 }
 0x221   :  { %v6021_v46 = vpop.f32.mrb[9].mxu1 }
 0x222   :  { %v833_v52 = vpop.f32.mrb[10].mxu1 }
 0x223   :  { %v6022_v47 = vpop.f32.mrb[11].mxu1 }
 0x229   :  { %v7446_v49 = vpop.f32.mrb[56].mxu0 }
 0x22a   :  { %v6093_v0 = vpop.f32.mrb[57].mxu0 }
 0x22b   :  { %v1235_v50 = vpop.f32.mrb[58].mxu0  ;;  %v2376_v0 = vld [vmem:[#allocation4 + $0x100] sm:$0xff] }
 0x22c   :  { %v6094_v51 = vpop.f32.mrb[59].mxu0  ;;  %v2380_v50 = vld [vmem:[#allocation4 + $0x120] sm:$0xff] }
 0x22d   :  { %v2377_v51 = vld [vmem:[#allocation4 + $0x108] sm:$0xff] }
 0x230   :  { %v897_v54 = vpop.f32.mrb[12].mxu1 }
 0x231   :  { %v2311_v55 = vadd.f32 %v897_v54, %v830_v44  ;;  %v6033_v45 = vpop.f32.mrb[13].mxu1  ;;  %v5401_v54 = vcombine.high %v2376_v0, %v2380_v50 }
 0x232   :  { %v900_v56 = vpop.f32.mrb[14].mxu1  ;;  %v5400_v45 = vcombine.low %v2376_v0, %v2380_v50 }
 0x233   :  { %v7448_v57 = vadd.f32 %v2311_v55, %v2310_v38  ;;  %v6034_v58 = vpop.f32.mrb[15].mxu1  ;;  %v2369_v38 = vld [vmem:[#allocation4 + $0xc8] sm:$0xff]  ;;  %2778 = vmatprep.subr.bf16.mxu1 %v5401_v54 }
 0x234   :  { %v5395_v53 = vcombine.high %v2369_v38, %v2373_v33  ;;  %v5394_v46 = vcombine.low %v2369_v38, %v2373_v33  ;;  %v2381_v55 = vld [vmem:[#allocation4 + $0x128] sm:$0xff]  ;;  %2779 = vmatpush1.bf16.msra.mxu1 %v5400_v45  ;;  %v5375_v38 = vcombine.high %v7469_v32, %v7473_v35 }
 0x235   :  { %v5402_v56 = vcombine.low %v2377_v51, %v2381_v55  ;;  %v5403_v58 = vcombine.high %v2377_v51, %v2381_v55 }
 0x236   :  { %2817 = vmatprep.subr.bf16.mxu0 %v5395_v53 }
 0x237   :  { %2818 = vmatpush1.bf16.msra.mxu0 %v5394_v46 }
 0x238   :  { %2819 = vmatprep.subr.bf16.mxu0 %v5403_v58 }
 0x239   :  { %v7450_v59 = vpop.f32.mrb[60].mxu0 }
 0x23a   :  { %v6117_v60 = vpop.f32.mrb[61].mxu0 }
 0x23b   :  { %v1369_v61 = vpop.f32.mrb[62].mxu0  ;;  %2820 = vmatpush1.bf16.msra.mxu0 %v5402_v56 }
 0x23c   :  { %v6118_v1 = vpop.f32.mrb[63].mxu0 }
 0x240   :  { %v964_v62 = vpop.f32.mrb[16].mxu1 }
 0x241   :  { %v6045_v63 = vpop.f32.mrb[17].mxu1 }
 0x242   :  { %v967_v2 = vpop.f32.mrb[18].mxu1  ;;  %v2388_v63 = vld [vmem:[#allocation4 + $0x160] sm:$0xff] }
 0x243   :  { %v6046_v3 = vpop.f32.mrb[19].mxu1  ;;  %v2385_v2 = vld [vmem:[#allocation4 + $0x148] sm:$0xff] }
 0x249   :  { %v7452_v4 = vpop.f32.mrb[64].mxu0 }
 0x24a   :  { %v6141_v5 = vpop.f32.mrb[65].mxu0 }
 0x24b   :  { %v1503_v18 = vpop.f32.mrb[66].mxu0 }
 0x24c   :  { %v6142_v6 = vpop.f32.mrb[67].mxu0  ;;  %v2389_v18 = vld [vmem:[#allocation4 + $0x168] sm:$0xff] }
 0x24d   :  { %v5410_v11 = vcombine.low %v2385_v2, %v2389_v18  ;;  %v5411_v7 = vcombine.high %v2385_v2, %v2389_v18 }
 0x24f   :  { %2821 = vmatprep.subr.bf16.mxu0 %v5411_v7 }
 0x250   :  { %v1031_v30 = vpop.f32.mrb[20].mxu1  ;;  %2822 = vmatpush1.bf16.msra.mxu0 %v5410_v11 }
 0x251   :  { %v7454_v16 = vadd.f32 %v1031_v30, %v964_v62  ;;  %v6057_v17 = vpop.f32.mrb[21].mxu1  ;;  %v2384_v62 = vld [vmem:[#allocation4 + $0x140] sm:$0xff]  ;;  %v2397_v30 = vld [vmem:[#allocation4 + $0x1a8] sm:$0xff] }
 0x252   :  { %v1034_v21 = vpop.f32.mrb[22].mxu1  ;;  %v5409_v5 = vcombine.high %v2384_v62, %v2388_v63  ;;  %v5408_v9 = vcombine.low %v2384_v62, %v2388_v63  ;;  %v5418_v19 = vcombine.low %v2393_v13, %v2397_v30  ;;  %v5419_v20 = vcombine.high %v2393_v13, %v2397_v30 }
 0x253   :  { %v6058_v24 = vpop.f32.mrb[23].mxu1  ;;  %v2404_v21 = vld [vmem:[#allocation4 + $0x1e0] sm:$0xff] }
 0x254   :  { %2780 = vmatprep.subr.bf16.mxu1 %v5409_v5  ;;  %2823 = vmatprep.subr.bf16.mxu0 %v5419_v20  ;;  %v5425_v23 = vcombine.high %v2400_v25, %v2404_v21  ;;  %v2405_v24 = vld [vmem:[#allocation4 + $0x1e8] sm:$0xff]  ;;  %v5424_v27 = vcombine.low %v2400_v25, %v2404_v21 }
 0x255   :  { %2781 = vmatpush1.bf16.msra.mxu1 %v5408_v9  ;;  %2824 = vmatpush1.bf16.msra.mxu0 %v5418_v19  ;;  %v5426_v10 = vcombine.low %v2401_v22, %v2405_v24  ;;  %v5427_v28 = vcombine.high %v2401_v22, %v2405_v24 }
 0x257   :  { %2825 = vmatprep.subr.bf16.mxu0 %v5427_v28 }
 0x259   :  { %v7456_v48 = vpop.f32.mrb[68].mxu0  ;;  %2826 = vmatpush1.bf16.msra.mxu0 %v5426_v10 }
 0x25a   :  { %v6165_v44 = vpop.f32.mrb[69].mxu0  ;;  %2893 = vmatprep.subr.bf16.mxu0 %v5375_v38 }
 0x25b   :  { %v1637_v52 = vpop.f32.mrb[70].mxu0 }
 0x25c   :  { %v6166_v47 = vpop.f32.mrb[71].mxu0 }
 0x260   :  { %v1165_v60 = vpop.f32.mrb[24].mxu1 }
 0x261   :  { %v2313_v61 = vadd.f32 %v1165_v60, %v7444_v42  ;;  %v6081_v1 = vpop.f32.mrb[25].mxu1  ;;  %v2392_v42 = vld [vmem:[#allocation4 + $0x180] sm:$0xff] }
 0x262   :  { %v1168_v3 = vpop.f32.mrb[26].mxu1  ;;  %v5417_v15 = vcombine.high %v2392_v42, %v2396_v14  ;;  %v5416_v17 = vcombine.low %v2392_v42, %v2396_v14 }
 0x263   :  { %v2323_v6 = vadd.f32 %v2313_v61, %v7454_v16  ;;  %v6082_v8 = vpop.f32.mrb[27].mxu1 }
 0x264   :  { %2782 = vmatprep.subr.bf16.mxu1 %v5417_v15 }
 0x265   :  { %v7461_v12 = vadd.f32 %v2323_v6, %v7448_v57  ;;  %2783 = vmatpush1.bf16.msra.mxu1 %v5416_v17 }
 0x266   :  { %2784 = vmatprep.subr.bf16.mxu1 %v5425_v23 }
 0x269   :  { %v7463_v16 = vpop.f32.mrb[72].mxu0  ;;  %2785 = vmatpush1.bf16.msra.mxu1 %v5424_v27 }
 0x26a   :  { %v6189_v57 = vpop.f32.mrb[73].mxu0  ;;  %2852 = vmatprep.subr.bf16.mxu1 %v5373_v34 }
 0x26b   :  { %v1771_v26 = vpop.f32.mrb[74].mxu0 }
 0x26c   :  { %v6190_v29 = vpop.f32.mrb[75].mxu0 }
 0x270   :  { %v1299_v33 = vpop.f32.mrb[28].mxu1 }
 0x271   :  { %v2314_v40 = vadd.f32 %v1299_v33, %v7446_v49  ;;  %v6105_v53 = vpop.f32.mrb[29].mxu1 }
 0x272   :  { %v1302_v43 = vpop.f32.mrb[30].mxu1 }
 0x273   :  { %v6106_v44 = vpop.f32.mrb[31].mxu1 }
 0x279   :  { %v1902_v46 = vpop.f32.mrb[76].mxu0 }
 0x27a   :  { %v6213_v52 = vpop.f32.mrb[77].mxu0 }
 0x27b   :  { %v1905_v47 = vpop.f32.mrb[78].mxu0 }
 0x27c   :  { %v6214_v0 = vpop.f32.mrb[79].mxu0 }
 0x280   :  { %v1433_v50 = vpop.f32.mrb[32].mxu1 }
 0x281   :  { %v2315_v51 = vadd.f32 %v1433_v50, %v7450_v59  ;;  %v6129_v54 = vpop.f32.mrb[33].mxu1 }
 0x282   :  { %v1436_v55 = vpop.f32.mrb[34].mxu1  ;;  %v2358_v54 = vld [vmem:[#allocation4 + $0x70] sm:$0xff] }
 0x283   :  { %v2324_v45 = vadd.f32 %v2315_v51, %v2314_v40  ;;  %v6130_v56 = vpop.f32.mrb[35].mxu1  ;;  %v2354_v51 = vld [vmem:[#allocation4 + $0x50] sm:$0xff]  ;;  %v2355_v55 = vld [vmem:[#allocation4 + $0x58] sm:$0xff] }
 0x289   :  { %v2036_v58 = vpop.f32.mrb[80].mxu0 }
 0x28a   :  { %v6237_v60 = vpop.f32.mrb[81].mxu0 }
 0x28b   :  { %v2039_v61 = vpop.f32.mrb[82].mxu0  ;;  %v5381_v60 = vcombine.high %v2354_v51, %v2358_v54 }
 0x28c   :  { %v6238_v49 = vpop.f32.mrb[83].mxu0 }
 0x28d   :  { %v2362_v49 = vld [vmem:[#allocation4 + $0x90] sm:$0xff] }
 0x290   :  { %v1567_v1 = vpop.f32.mrb[36].mxu1 }
 0x291   :  { %v2316_v62 = vadd.f32 %v1567_v1, %v7452_v4  ;;  %v6153_v63 = vpop.f32.mrb[37].mxu1  ;;  %v2366_v1 = vld [vmem:[#allocation4 + $0xb0] sm:$0xff] }
 0x292   :  { %v1570_v2 = vpop.f32.mrb[38].mxu1  ;;  %v2367_v63 = vld [vmem:[#allocation4 + $0xb8] sm:$0xff]  ;;  %v5388_v31 = vcombine.low %v2362_v49, %v2366_v1 }
 0x293   :  { %v6154_v3 = vpop.f32.mrb[39].mxu1  ;;  %v5380_v2 = vcombine.low %v2354_v51, %v2358_v54  ;;  %v6435_v51 = vld [vmem:[%s8434_s7 + $0x20] ss:$16 sps:$4 sm:$0xff]   ;;  %v6438_v54 = vld [vmem:[%s8434_s7 + $0x28] ss:$16 sps:$4 sm:$0xff]  }
 0x299   :  { %v2170_v5 = vpop.f32.mrb[84].mxu0 }
 0x29a   :  { %v6261_v18 = vpop.f32.mrb[85].mxu0 }
 0x29b   :  { %v2173_v6 = vpop.f32.mrb[86].mxu0 }
 0x29c   :  { %v6262_v8 = vpop.f32.mrb[87].mxu0  ;;  %v2370_v6 = vld [vmem:[#allocation4 + $0xd0] sm:$0xff] }
 0x29d   :  { %v2374_v8 = vld [vmem:[#allocation4 + $0xf0] sm:$0xff] }
 0x29e   :  { %v5397_v32 = vcombine.high %v2370_v6, %v2374_v8 }
 0x2a0   :  { %v1701_v9 = vpop.f32.mrb[40].mxu1 }
 0x2a1   :  { %v2317_v59 = vadd.f32 %v1701_v9, %v7456_v48  ;;  %v6177_v11 = vpop.f32.mrb[41].mxu1  ;;  %v2371_v9 = vld [vmem:[#allocation4 + $0xd8] sm:$0xff] }
 0x2a2   :  { %v1704_v7 = vpop.f32.mrb[42].mxu1  ;;  %v2379_v11 = vld [vmem:[#allocation4 + $0x118] sm:$0xff] }
 0x2a3   :  { %v2325_v42 = vadd.f32 %v2317_v59, %v2316_v62  ;;  %v6178_v14 = vpop.f32.mrb[43].mxu1  ;;  %v2363_v62 = vld [vmem:[#allocation4 + $0x98] sm:$0xff] }
 0x2a4   :  { %v5391_v18 = vcombine.high %v2363_v62, %v2367_v63  ;;  %v2375_v59 = vld [vmem:[#allocation4 + $0xf8] sm:$0xff]  ;;  %v5390_v41 = vcombine.low %v2363_v62, %v2367_v63  ;;  %v6455_v62 = vld [vmem:[%s8434_s7 + $0x84] ss:$16 sps:$4 sm:$0xff]  }
 0x2a5   :  { %v2329_v13 = vadd.f32 %v2325_v42, %v2324_v45  ;;  %v2359_v45 = vld [vmem:[#allocation4 + $0x78] sm:$0xff]  ;;  %v5399_v35 = vcombine.high %v2371_v9, %v2375_v59  ;;  %v5396_v42 = vcombine.low %v2370_v6, %v2374_v8  ;;  %v5398_v14 = vcombine.low %v2371_v9, %v2375_v59  ;;  %v6459_v6 = vld [vmem:[%s8434_s7 + $0xa0] ss:$16 sps:$4 sm:$0xff]   ;;  %v6467_v9 = vld [vmem:[%s8434_s7 + $0xc4] ss:$16 sps:$4 sm:$0xff]  }
 0x2a6   :  { %v5383_v61 = vcombine.high %v2355_v55, %v2359_v45  ;;  %v5382_v3 = vcombine.low %v2355_v55, %v2359_v45  ;;  %v2383_v7 = vld [vmem:[#allocation4 + $0x138] sm:$0xff]  ;;  %v6443_v55 = vld [vmem:[%s8434_s7 + $0x44] ss:$16 sps:$4 sm:$0xff]  }
 0x2a7   :  { %v2331_v15 = vadd.f32 %v2329_v13, %v7461_v12  ;;  %v6446_v45 = vld [vmem:[%s8434_s7 + $0x4c] ss:$16 sps:$4 sm:$0xff]   ;;  %v6462_v8 = vld [vmem:[%s8434_s7 + $0xa8] ss:$16 sps:$4 sm:$0xff]  }
 0x2a8   :  { %v6458_v63 = vld [vmem:[%s8434_s7 + $0x8c] ss:$16 sps:$4 sm:$0xff]  }
 0x2a9   :  { %v2304_v30 = vpop.f32.mrb[88].mxu0  ;;  %v6470_v59 = vld [vmem:[%s8434_s7 + $0xcc] ss:$16 sps:$4 sm:$0xff]  }
 0x2aa   :  { %v6285_v17 = vpop.f32.mrb[89].mxu0 }
 0x2ab   :  { %v2307_v4 = vpop.f32.mrb[90].mxu0  ;;  %v2387_v17 = vld [vmem:[#allocation4 + $0x158] sm:$0xff] }
 0x2ac   :  { %v6286_v19 = vpop.f32.mrb[91].mxu0  ;;  %v2391_v4 = vld [vmem:[#allocation4 + $0x178] sm:$0xff] }
 0x2b0   :  { %v1835_v20 = vpop.f32.mrb[44].mxu1 }
 0x2b1   :  { %v2318_v25 = vadd.f32 %v1835_v20, %v7463_v16  ;;  %v6201_v21 = vpop.f32.mrb[45].mxu1  ;;  %v5406_v20 = vcombine.low %v2379_v11, %v2383_v7 }
 0x2b2   :  { %v1838_v57 = vpop.f32.mrb[46].mxu1  ;;  %v5415_v21 = vcombine.high %v2387_v17, %v2391_v4 }
 0x2b3   :  { %v6202_v23 = vpop.f32.mrb[47].mxu1  ;;  %v2394_v57 = vld [vmem:[#allocation4 + $0x190] sm:$0xff] }
 0x2b4   :  { %v2398_v23 = vld [vmem:[#allocation4 + $0x1b0] sm:$0xff] }
 0x2c0   :  { %v1969_v22 = vpop.f32.mrb[48].mxu1 }
 0x2c1   :  { %v2319_v24 = vadd.f32 %v1969_v22, %v1902_v46  ;;  %v6225_v48 = vpop.f32.mrb[49].mxu1  ;;  %v5367_v46 = vld [vmem:[%s8431_s4] ss:$0 sm:$0xff]  ;;  %v2395_v22 = vld [vmem:[#allocation4 + $0x198] sm:$0xff] }
 0x2c2   :  { %v1972_v26 = vpop.f32.mrb[50].mxu1 }
 0x2c3   :  { %v2326_v27 = vadd.f32 %v2319_v24, %v2318_v25  ;;  %v6226_v10 = vpop.f32.mrb[51].mxu1  ;;  %v2399_v24 = vld [vmem:[#allocation4 + $0x1b8] sm:$0xff]  ;;  %v5414_v26 = vcombine.low %v2387_v17, %v2391_v4  ;;  %v6491_v17 = vld [vmem:[%s8434_s7 + $0x144] ss:$16 sps:$4 sm:$0xff]  }
 0x2c4   :  { %v5423_v10 = vcombine.high %v2395_v22, %v2399_v24  ;;  %v6494_v4 = vld [vmem:[%s8434_s7 + $0x14c] ss:$16 sps:$4 sm:$0xff]  }
 0x2d0   :  { %v2103_v28 = vpop.f32.mrb[52].mxu1 }
 0x2d1   :  { %v2320_v29 = vadd.f32 %v2103_v28, %v2036_v58  ;;  %v6249_v34 = vpop.f32.mrb[53].mxu1  ;;  %v2402_v28 = vld [vmem:[#allocation4 + $0x1d0] sm:$0xff] }
 0x2d2   :  { %v2106_v12 = vpop.f32.mrb[54].mxu1  ;;  %v2403_v34 = vld [vmem:[#allocation4 + $0x1d8] sm:$0xff] }
 0x2d3   :  { %v6250_v38 = vpop.f32.mrb[55].mxu1  ;;  %v2407_v12 = vld [vmem:[#allocation4 + $0x1f8] sm:$0xff] }
 0x2d4   :  { %v5420_v38 = vcombine.low %v2394_v57, %v2398_v23 }
 0x2e0   :  { %v2237_v33 = vpop.f32.mrb[56].mxu1 }
 0x2e1   :  { %v2321_v40 = vadd.f32 %v2237_v33, %v2170_v5  ;;  %v6273_v53 = vpop.f32.mrb[57].mxu1  ;;  %v5389_v5 = vcombine.high %v2362_v49, %v2366_v1  ;;  %v5422_v33 = vcombine.low %v2395_v22, %v2399_v24  ;;  %v6447_v49 = vld [vmem:[%s8434_s7 + $0x60] ss:$16 sps:$4 sm:$0xff]   ;;  %v6450_v1 = vld [vmem:[%s8434_s7 + $0x68] ss:$16 sps:$4 sm:$0xff]  }
 0x2e2   :  { %v2240_v43 = vpop.f32.mrb[58].mxu1  ;;  %v5431_v53 = vcombine.high %v2403_v34, %v2407_v12  ;;  %v6503_v22 = vld [vmem:[%s8434_s7 + $0x184] ss:$16 sps:$4 sm:$0xff]   ;;  %v6506_v24 = vld [vmem:[%s8434_s7 + $0x18c] ss:$16 sps:$4 sm:$0xff]  }
 0x2e3   :  { %v2327_v44 = vadd.f32 %v2321_v40, %v2320_v29  ;;  %v6274_v16 = vpop.f32.mrb[59].mxu1  ;;  %v2406_v29 = vld [vmem:[#allocation4 + $0x1f0] sm:$0xff] }
 0x2e4   :  { %v5429_v40 = vcombine.high %v2402_v28, %v2406_v29  ;;  %v5428_v43 = vcombine.low %v2402_v28, %v2406_v29  ;;  %v6431_v16 = vld [vmem:[%s8434_s7 + $0x4] ss:$16 sps:$4 sm:$0xff]   ;;  %v6507_v28 = vld [vmem:[%s8434_s7 + $0x1a0] ss:$16 sps:$4 sm:$0xff]   ;;  %v6510_v29 = vld [vmem:[%s8434_s7 + $0x1a8] ss:$16 sps:$4 sm:$0xff]  }
 0x2e5   :  { %v2330_v52 = vadd.f32 %v2327_v44, %v2326_v27  ;;  %v5421_v27 = vcombine.high %v2394_v57, %v2398_v23  ;;  %v5430_v44 = vcombine.low %v2403_v34, %v2407_v12  ;;  %v6495_v57 = vld [vmem:[%s8434_s7 + $0x160] ss:$16 sps:$4 sm:$0xff]   ;;  %v6498_v23 = vld [vmem:[%s8434_s7 + $0x168] ss:$16 sps:$4 sm:$0xff]   ;;  %v6515_v34 = vld [vmem:[%s8434_s7 + $0x1c4] ss:$16 sps:$4 sm:$0xff]  }
 0x2e6   :  { %v6518_v12 = vld [vmem:[%s8434_s7 + $0x1cc] ss:$16 sps:$4 sm:$0xff]  }
 0x2e7   :  { %v2332_v47 = vadd.f32 %v2330_v52, %v2304_v30  ;;  %v2390_v30 = vld [vmem:[#allocation4 + $0x170] sm:$0xff]  ;;  %v6434_v52 = vld [vmem:[%s8434_s7 + $0xc] ss:$16 sps:$4 sm:$0xff]  }
 0x2e9   :  { %v2333_v0 = vadd.f32 %v2332_v47, %v2331_v15  ;;  %v2386_v15 = vld [vmem:[#allocation4 + $0x150] sm:$0xff] }
 0x2ea   :  { %v5413_v25 = vcombine.high %v2386_v15, %v2390_v30  ;;  %v5412_v48 = vcombine.low %v2386_v15, %v2390_v30  ;;  %v6429_v47 = vld [vmem:[%s8434_s7] ss:$16 sps:$4 sm:$0xff]   ;;  %v6486_v30 = vld [vmem:[%s8434_s7 + $0x128] ss:$16 sps:$4 sm:$0xff]  }
 0x2eb   :  { %v2341_v50 = vadd.f32 %v5367_v46, %v2333_v0  ;;  %v6432_v46 = vld [vmem:[%s8434_s7 + $0x8] ss:$16 sps:$4 sm:$0xff]   ;;  %v6437_v0 = vld [vmem:[%s8434_s7 + $0x24] ss:$16 sps:$4 sm:$0xff]   ;;  %v6483_v15 = vld [vmem:[%s8434_s7 + $0x120] ss:$16 sps:$4 sm:$0xff]  }
 0x2ed   :  { %v2342_v56 = vmax.f32 %v2341_v50, 0.0  ;;  %v6440_v50 = vld [vmem:[%s8434_s7 + $0x2c] ss:$16 sps:$4 sm:$0xff]  }
 0x2ef   :  { %v7492_v58 = vpack.c.bf16 %v2342_v56, %v2342_v56  ;;  %v6441_v56 = vld [vmem:[%s8434_s7 + $0x40] ss:$16 sps:$4 sm:$0xff]  }
 0x2f1   :  { %2803 = vmatmul.mubr.bf16.vlgmr.msra.gmra.mrb[60].mxu1 %v7492_v58  ;;  %2844 = vmatmul.mubr.bf16.vlgmr.msra.gmra.mrb[92].mxu0 %v7492_v58 }
 0x2f2   :  { %2853 = vmatpush1.bf16.msra.mxu1 %v5372_v36  ;;  %2894 = vmatpush1.bf16.msra.mxu0 %v5374_v37  ;;  %v2378_v36 = vld [vmem:[#allocation4 + $0x110] sm:$0xff] }
 0x2f3   :  { %2854 = vmatprep.subr.bf16.mxu1 %v5381_v60  ;;  %2895 = vmatprep.subr.bf16.mxu0 %v5383_v61  ;;  %v2382_v37 = vld [vmem:[#allocation4 + $0x130] sm:$0xff]  ;;  %v6452_v61 = vld [vmem:[%s8434_s7 + $0x6c] ss:$16 sps:$4 sm:$0xff]  }
 0x2f4   :  { %2884 = vmatprep.mubr.bf16.mxu1 %v6954_v39  ;;  %2925 = vmatprep.mubr.bf16.mxu0 %v6954_v39  ;;  %v5405_v13 = vcombine.high %v2378_v36, %v2382_v37  ;;  %v5407_v39 = vcombine.high %v2379_v11, %v2383_v7  ;;  %v5404_v19 = vcombine.low %v2378_v36, %v2382_v37  ;;  %v6449_v60 = vld [vmem:[%s8434_s7 + $0x64] ss:$16 sps:$4 sm:$0xff]   ;;  %v6471_v36 = vld [vmem:[%s8434_s7 + $0xe0] ss:$16 sps:$4 sm:$0xff]   ;;  %v6474_v37 = vld [vmem:[%s8434_s7 + $0xe8] ss:$16 sps:$4 sm:$0xff]  }
 0x2f5   :  { %v6479_v11 = vld [vmem:[%s8434_s7 + $0x104] ss:$16 sps:$4 sm:$0xff]   ;;  %v6482_v7 = vld [vmem:[%s8434_s7 + $0x10c] ss:$16 sps:$4 sm:$0xff]  }
 0x2f6   :  { %2855 = vmatpush1.bf16.msra.mxu1 %v5380_v2  ;;  %2896 = vmatpush1.bf16.msra.mxu0 %v5382_v3  ;;  %v6453_v2 = vld [vmem:[%s8434_s7 + $0x80] ss:$16 sps:$4 sm:$0xff]   ;;  %v6456_v3 = vld [vmem:[%s8434_s7 + $0x88] ss:$16 sps:$4 sm:$0xff]  }
 0x2f7   :  { %2856 = vmatprep.subr.bf16.mxu1 %v5389_v5  ;;  %2897 = vmatprep.subr.bf16.mxu0 %v5391_v18  ;;  %v6461_v5 = vld [vmem:[%s8434_s7 + $0xa4] ss:$16 sps:$4 sm:$0xff]   ;;  %v6464_v18 = vld [vmem:[%s8434_s7 + $0xac] ss:$16 sps:$4 sm:$0xff]  }
 0x2fa   :  { %2857 = vmatpush1.bf16.msra.mxu1 %v5388_v31  ;;  %2898 = vmatpush1.bf16.msra.mxu0 %v5390_v41  ;;  %v6465_v31 = vld [vmem:[%s8434_s7 + $0xc0] ss:$16 sps:$4 sm:$0xff]   ;;  %v6468_v41 = vld [vmem:[%s8434_s7 + $0xc8] ss:$16 sps:$4 sm:$0xff]  }
 0x2fb   :  { %2858 = vmatprep.subr.bf16.mxu1 %v5397_v32  ;;  %2899 = vmatprep.subr.bf16.mxu0 %v5399_v35  ;;  %v6473_v32 = vld [vmem:[%s8434_s7 + $0xe4] ss:$16 sps:$4 sm:$0xff]   ;;  %v6476_v35 = vld [vmem:[%s8434_s7 + $0xec] ss:$16 sps:$4 sm:$0xff]  }
 0x2fe   :  { %2859 = vmatpush1.bf16.msra.mxu1 %v5396_v42  ;;  %2900 = vmatpush1.bf16.msra.mxu0 %v5398_v14  ;;  %v6477_v42 = vld [vmem:[%s8434_s7 + $0x100] ss:$16 sps:$4 sm:$0xff]   ;;  %v6480_v14 = vld [vmem:[%s8434_s7 + $0x108] ss:$16 sps:$4 sm:$0xff]  }
 0x2ff   :  { %2860 = vmatprep.subr.bf16.mxu1 %v5405_v13  ;;  %2901 = vmatprep.subr.bf16.mxu0 %v5407_v39  ;;  %v6485_v13 = vld [vmem:[%s8434_s7 + $0x124] ss:$16 sps:$4 sm:$0xff]   ;;  %v6488_v39 = vld [vmem:[%s8434_s7 + $0x12c] ss:$16 sps:$4 sm:$0xff]  }
 0x302   :  { %2861 = vmatpush1.bf16.msra.mxu1 %v5404_v19  ;;  %2902 = vmatpush1.bf16.msra.mxu0 %v5406_v20  ;;  %v6489_v19 = vld [vmem:[%s8434_s7 + $0x140] ss:$16 sps:$4 sm:$0xff]   ;;  %v6492_v20 = vld [vmem:[%s8434_s7 + $0x148] ss:$16 sps:$4 sm:$0xff]  }
 0x303   :  { %2862 = vmatprep.subr.bf16.mxu1 %v5413_v25  ;;  %2903 = vmatprep.subr.bf16.mxu0 %v5415_v21  ;;  %v6497_v25 = vld [vmem:[%s8434_s7 + $0x164] ss:$16 sps:$4 sm:$0xff]   ;;  %v6500_v21 = vld [vmem:[%s8434_s7 + $0x16c] ss:$16 sps:$4 sm:$0xff]  }
 0x306   :  { %2863 = vmatpush1.bf16.msra.mxu1 %v5412_v48  ;;  %2904 = vmatpush1.bf16.msra.mxu0 %v5414_v26  ;;  %v6501_v48 = vld [vmem:[%s8434_s7 + $0x180] ss:$16 sps:$4 sm:$0xff]   ;;  %v6504_v26 = vld [vmem:[%s8434_s7 + $0x188] ss:$16 sps:$4 sm:$0xff]  }
 0x307   :  { %2864 = vmatprep.subr.bf16.mxu1 %v5421_v27  ;;  %2905 = vmatprep.subr.bf16.mxu0 %v5423_v10  ;;  %v6509_v27 = vld [vmem:[%s8434_s7 + $0x1a4] ss:$16 sps:$4 sm:$0xff]   ;;  %v6512_v10 = vld [vmem:[%s8434_s7 + $0x1ac] ss:$16 sps:$4 sm:$0xff]  }
 0x30a   :  { %2865 = vmatpush1.bf16.msra.mxu1 %v5420_v38  ;;  %2906 = vmatpush1.bf16.msra.mxu0 %v5422_v33  ;;  %v6513_v38 = vld [vmem:[%s8434_s7 + $0x1c0] ss:$16 sps:$4 sm:$0xff]   ;;  %v6516_v33 = vld [vmem:[%s8434_s7 + $0x1c8] ss:$16 sps:$4 sm:$0xff]  }
 0x30b   :  { %2866 = vmatprep.subr.bf16.mxu1 %v5429_v40  ;;  %2907 = vmatprep.subr.bf16.mxu0 %v5431_v53  ;;  %v6521_v40 = vld [vmem:[%s8434_s7 + $0x1e4] ss:$16 sps:$4 sm:$0xff]   ;;  %v6524_v53 = vld [vmem:[%s8434_s7 + $0x1ec] ss:$16 sps:$4 sm:$0xff]  }
 0x30e   :  { %2867 = vmatpush1.bf16.msra.mxu1 %v5428_v43  ;;  %2908 = vmatpush1.bf16.msra.mxu0 %v5430_v44  ;;  %v6519_v43 = vld [vmem:[%s8434_s7 + $0x1e0] ss:$16 sps:$4 sm:$0xff]   ;;  %v6522_v44 = vld [vmem:[%s8434_s7 + $0x1e8] ss:$16 sps:$4 sm:$0xff]  }
 0x30f   :  { %4508 = vmatprep.subr.bf16.mxu1 %v6431_v16  ;;  %4672 = vmatprep.subr.bf16.mxu0 %v6434_v52  ;;  %v6527_v16 = vld [vmem:[%s8434_s7 + $0x204] ss:$16 sps:$4 sm:$0xff]   ;;  %v6530_v52 = vld [vmem:[%s8434_s7 + $0x20c] ss:$16 sps:$4 sm:$0xff]  }
 0x311   :  { %2885 = vmatmul.mubr.bf16.vlgmr.msra.gmra.mrb[64].mxu1 %v7492_v58  ;;  %2926 = vmatmul.mubr.bf16.vlgmr.msra.gmra.mrb[96].mxu0 %v7492_v58  ;;  %v6444_v58 = vld [vmem:[%s8434_s7 + $0x48] ss:$16 sps:$4 sm:$0xff]  }
 0x312   :  { %4509 = vmatpush1.bf16.msra.mxu1 %v6429_v47  ;;  %4673 = vmatpush1.bf16.msra.mxu0 %v6432_v46  ;;  %v2410_v47 = vlaneseq }
 0x313   :  { %4510 = vmatprep.subr.bf16.mxu1 %v6437_v0  ;;  %4674 = vmatprep.subr.bf16.mxu0 %v6440_v50  ;;  %v7707_v50 = vld [vmem:[#allocation6] sm:$0xff] }
 0x314   :  { %v7704_v46 = vshrl.u32 %v2410_v47, 7  ;;  %v6575_v47 = vld [vmem:[%s8434_s7 + $0x304] ss:$16 sps:$4 sm:$0xff]  }
 0x316   :  { %4511 = vmatpush1.bf16.msra.mxu1 %v6435_v51  ;;  %4675 = vmatpush1.bf16.msra.mxu0 %v6438_v54  ;;  %v2412_v0 = vsub.s32 0, %v7704_v46  ;;  %v2416_v51 = vsub.s32 1, %v7704_v46  ;;  %v2424_v54 = vsub.s32 3, %v7704_v46 }
 0x317   :  { %4512 = vmatprep.subr.bf16.mxu1 %v6443_v55  ;;  %4676 = vmatprep.subr.bf16.mxu0 %v6446_v45 }
 0x318   :  { %v2413_v55 = vrot.slane %v7707_v50, %v2412_v0  ;;  %v2417_v45 = vrot.slane %v7707_v50, %v2416_v51 }
 0x31a   :  { %4513 = vmatpush1.bf16.msra.mxu1 %v6441_v56  ;;  %4677 = vmatpush1.bf16.msra.mxu0 %v6444_v58  ;;  %v2425_v56 = vrot.slane %v7707_v50, %v2424_v54 }
 0x31b   :  { %4514 = vmatprep.subr.bf16.mxu1 %v6449_v60  ;;  %4678 = vmatprep.subr.bf16.mxu0 %v6452_v61 }
 0x31e   :  { %4515 = vmatpush1.bf16.msra.mxu1 %v6447_v49  ;;  %4679 = vmatpush1.bf16.msra.mxu0 %v6450_v1 }
 0x31f   :  { %4516 = vmatprep.subr.bf16.mxu1 %v6455_v62  ;;  %4680 = vmatprep.subr.bf16.mxu0 %v6458_v63 }
 0x322   :  { %4517 = vmatpush1.bf16.msra.mxu1 %v6453_v2  ;;  %4681 = vmatpush1.bf16.msra.mxu0 %v6456_v3 }
 0x323   :  { %4518 = vmatprep.subr.bf16.mxu1 %v6461_v5  ;;  %4682 = vmatprep.subr.bf16.mxu0 %v6464_v18 }
 0x326   :  { %4519 = vmatpush1.bf16.msra.mxu1 %v6459_v6  ;;  %4683 = vmatpush1.bf16.msra.mxu0 %v6462_v8 }
 0x327   :  { %4520 = vmatprep.subr.bf16.mxu1 %v6467_v9  ;;  %4684 = vmatprep.subr.bf16.mxu0 %v6470_v59 }
 0x32a   :  { %4521 = vmatpush1.bf16.msra.mxu1 %v6465_v31  ;;  %4685 = vmatpush1.bf16.msra.mxu0 %v6468_v41  ;;  %v6525_v31 = vld [vmem:[%s8434_s7 + $0x200] ss:$16 sps:$4 sm:$0xff]   ;;  %v6528_v41 = vld [vmem:[%s8434_s7 + $0x208] ss:$16 sps:$4 sm:$0xff]  }
 0x32b   :  { %4522 = vmatprep.subr.bf16.mxu1 %v6473_v32  ;;  %4686 = vmatprep.subr.bf16.mxu0 %v6476_v35  ;;  %v6533_v35 = vld [vmem:[%s8434_s7 + $0x224] ss:$16 sps:$4 sm:$0xff]  }
 0x32e   :  { %4523 = vmatpush1.bf16.msra.mxu1 %v6471_v36  ;;  %4687 = vmatpush1.bf16.msra.mxu0 %v6474_v37  ;;  %v6536_v36 = vld [vmem:[%s8434_s7 + $0x22c] ss:$16 sps:$4 sm:$0xff]  }
 0x32f   :  { %4524 = vmatprep.subr.bf16.mxu1 %v6479_v11  ;;  %4688 = vmatprep.subr.bf16.mxu0 %v6482_v7  ;;  %v6531_v11 = vld [vmem:[%s8434_s7 + $0x220] ss:$16 sps:$4 sm:$0xff]   ;;  %v6534_v7 = vld [vmem:[%s8434_s7 + $0x228] ss:$16 sps:$4 sm:$0xff]  }
 0x332   :  { %4525 = vmatpush1.bf16.msra.mxu1 %v6477_v42  ;;  %4689 = vmatpush1.bf16.msra.mxu0 %v6480_v14  ;;  %v6539_v42 = vld [vmem:[%s8434_s7 + $0x244] ss:$16 sps:$4 sm:$0xff]   ;;  %v6542_v14 = vld [vmem:[%s8434_s7 + $0x24c] ss:$16 sps:$4 sm:$0xff]  }
 0x333   :  { %4526 = vmatprep.subr.bf16.mxu1 %v6485_v13  ;;  %4690 = vmatprep.subr.bf16.mxu0 %v6488_v39  ;;  %v6537_v13 = vld [vmem:[%s8434_s7 + $0x240] ss:$16 sps:$4 sm:$0xff]   ;;  %v6540_v39 = vld [vmem:[%s8434_s7 + $0x248] ss:$16 sps:$4 sm:$0xff]  }
 0x336   :  { %4527 = vmatpush1.bf16.msra.mxu1 %v6483_v15  ;;  %4691 = vmatpush1.bf16.msra.mxu0 %v6486_v30  ;;  %v6545_v15 = vld [vmem:[%s8434_s7 + $0x264] ss:$16 sps:$4 sm:$0xff]   ;;  %v6548_v30 = vld [vmem:[%s8434_s7 + $0x26c] ss:$16 sps:$4 sm:$0xff]  }
 0x337   :  { %4528 = vmatprep.subr.bf16.mxu1 %v6491_v17  ;;  %4692 = vmatprep.subr.bf16.mxu0 %v6494_v4  ;;  %v6543_v17 = vld [vmem:[%s8434_s7 + $0x260] ss:$16 sps:$4 sm:$0xff]   ;;  %v6546_v4 = vld [vmem:[%s8434_s7 + $0x268] ss:$16 sps:$4 sm:$0xff]  }
 0x33a   :  { %4529 = vmatpush1.bf16.msra.mxu1 %v6489_v19  ;;  %4693 = vmatpush1.bf16.msra.mxu0 %v6492_v20  ;;  %v6551_v19 = vld [vmem:[%s8434_s7 + $0x284] ss:$16 sps:$4 sm:$0xff]   ;;  %v6554_v20 = vld [vmem:[%s8434_s7 + $0x28c] ss:$16 sps:$4 sm:$0xff]  }
 0x33b   :  { %4530 = vmatprep.subr.bf16.mxu1 %v6497_v25  ;;  %4694 = vmatprep.subr.bf16.mxu0 %v6500_v21  ;;  %v6549_v25 = vld [vmem:[%s8434_s7 + $0x280] ss:$16 sps:$4 sm:$0xff]   ;;  %v6552_v21 = vld [vmem:[%s8434_s7 + $0x288] ss:$16 sps:$4 sm:$0xff]  }
 0x33e   :  { %4531 = vmatpush1.bf16.msra.mxu1 %v6495_v57  ;;  %4695 = vmatpush1.bf16.msra.mxu0 %v6498_v23  ;;  %v6557_v57 = vld [vmem:[%s8434_s7 + $0x2a4] ss:$16 sps:$4 sm:$0xff]   ;;  %v6560_v23 = vld [vmem:[%s8434_s7 + $0x2ac] ss:$16 sps:$4 sm:$0xff]  }
 0x33f   :  { %4532 = vmatprep.subr.bf16.mxu1 %v6503_v22  ;;  %4696 = vmatprep.subr.bf16.mxu0 %v6506_v24  ;;  %v6555_v22 = vld [vmem:[%s8434_s7 + $0x2a0] ss:$16 sps:$4 sm:$0xff]   ;;  %v6558_v24 = vld [vmem:[%s8434_s7 + $0x2a8] ss:$16 sps:$4 sm:$0xff]  }
 0x342   :  { %4533 = vmatpush1.bf16.msra.mxu1 %v6501_v48  ;;  %4697 = vmatpush1.bf16.msra.mxu0 %v6504_v26  ;;  %v6563_v48 = vld [vmem:[%s8434_s7 + $0x2c4] ss:$16 sps:$4 sm:$0xff]   ;;  %v6566_v26 = vld [vmem:[%s8434_s7 + $0x2cc] ss:$16 sps:$4 sm:$0xff]  }
 0x343   :  { %4534 = vmatprep.subr.bf16.mxu1 %v6509_v27  ;;  %4698 = vmatprep.subr.bf16.mxu0 %v6512_v10  ;;  %v6561_v27 = vld [vmem:[%s8434_s7 + $0x2c0] ss:$16 sps:$4 sm:$0xff]   ;;  %v6564_v10 = vld [vmem:[%s8434_s7 + $0x2c8] ss:$16 sps:$4 sm:$0xff]  }
 0x346   :  { %4535 = vmatpush1.bf16.msra.mxu1 %v6507_v28  ;;  %4699 = vmatpush1.bf16.msra.mxu0 %v6510_v29  ;;  %v6569_v28 = vld [vmem:[%s8434_s7 + $0x2e4] ss:$16 sps:$4 sm:$0xff]   ;;  %v6572_v29 = vld [vmem:[%s8434_s7 + $0x2ec] ss:$16 sps:$4 sm:$0xff]  }
 0x347   :  { %4536 = vmatprep.subr.bf16.mxu1 %v6515_v34  ;;  %4700 = vmatprep.subr.bf16.mxu0 %v6518_v12 }
 0x34a   :  { %4537 = vmatpush1.bf16.msra.mxu1 %v6513_v38  ;;  %4701 = vmatpush1.bf16.msra.mxu0 %v6516_v33 }
 0x34b   :  { %4538 = vmatprep.subr.bf16.mxu1 %v6521_v40  ;;  %4702 = vmatprep.subr.bf16.mxu0 %v6524_v53 }
 0x34e   :  { %4539 = vmatpush1.bf16.msra.mxu1 %v6519_v43  ;;  %4703 = vmatpush1.bf16.msra.mxu0 %v6522_v44  ;;  %v6567_v43 = vld [vmem:[%s8434_s7 + $0x2e0] ss:$16 sps:$4 sm:$0xff]   ;;  %v6570_v44 = vld [vmem:[%s8434_s7 + $0x2e8] ss:$16 sps:$4 sm:$0xff]  }
 0x34f   :  { %4549 = vmatprep.subr.bf16.mxu1 %v6527_v16  ;;  %4713 = vmatprep.subr.bf16.mxu0 %v6530_v52 }
 0x3c4   :  { %v2804_v58 = vpop.f32.mrb[60].mxu1  ;;  %v7720_v60 = vpop.f32.mrb[92].mxu0 }
 0x3c5   :  { %v2805_v61 = vadd.f32 %v2804_v58, %v2413_v55  ;;  %v2806_v49 = vpop.f32.mrb[61].mxu1  ;;  %v2847_v1 = vpop.f32.mrb[93].mxu0  ;;  %v6578_v55 = vld [vmem:[%s8434_s7 + $0x30c] ss:$16 sps:$4 sm:$0xff]   ;;  %v6581_v58 = vld [vmem:[%s8434_s7 + $0x324] ss:$16 sps:$4 sm:$0xff]  }
 0x3c6   :  { %v2807_v62 = vadd.f32 %v2806_v49, %v2417_v45  ;;  %v2848_v63 = vadd.f32 %v2847_v1, %v2425_v56  ;;  %v2808_v2 = vpop.f32.mrb[62].mxu1  ;;  %v2849_v3 = vpop.f32.mrb[94].mxu0  ;;  %v6573_v45 = vld [vmem:[%s8434_s7 + $0x300] ss:$16 sps:$4 sm:$0xff]   ;;  %v6576_v56 = vld [vmem:[%s8434_s7 + $0x308] ss:$16 sps:$4 sm:$0xff]  }
 0x3c7   :  { %v2934_v5 = vmax.f32 %v2805_v61, 0.0  ;;  %v2809_v18 = vpop.f32.mrb[63].mxu1  ;;  %v2850_v6 = vpop.f32.mrb[95].mxu0  ;;  %v6584_v61 = vld [vmem:[%s8434_s7 + $0x32c] ss:$16 sps:$4 sm:$0xff]  }
 0x3c8   :  { %v2935_v8 = vmax.f32 %v2807_v62, 0.0  ;;  %v2937_v9 = vmax.f32 %v2848_v63, 0.0  ;;  %v6579_v49 = vld [vmem:[%s8434_s7 + $0x320] ss:$16 sps:$4 sm:$0xff]   ;;  %v6582_v1 = vld [vmem:[%s8434_s7 + $0x328] ss:$16 sps:$4 sm:$0xff]  }
 0x3c9   :  { %v2942_v32 = vpack.c.bf16 %v2934_v5, %v2934_v5  ;;  %v6587_v62 = vld [vmem:[%s8434_s7 + $0x344] ss:$16 sps:$4 sm:$0xff]   ;;  %v6590_v63 = vld [vmem:[%s8434_s7 + $0x34c] ss:$16 sps:$4 sm:$0xff]   ;;  %v6585_v2 = vld [vmem:[%s8434_s7 + $0x340] ss:$16 sps:$4 sm:$0xff]  }
 0x3ca   :  { %v2943_v59 = vpack.c.bf16 %v2935_v8, %v2935_v8  ;;  %v2945_v37 = vpack.c.bf16 %v2937_v9, %v2937_v9  ;;  %v6588_v3 = vld [vmem:[%s8434_s7 + $0x348] ss:$16 sps:$4 sm:$0xff]   ;;  %v6593_v5 = vld [vmem:[%s8434_s7 + $0x364] ss:$16 sps:$4 sm:$0xff]   ;;  %v6596_v18 = vld [vmem:[%s8434_s7 + $0x36c] ss:$16 sps:$4 sm:$0xff]  }
 0x3cb   :  { %v6591_v6 = vld [vmem:[%s8434_s7 + $0x360] ss:$16 sps:$4 sm:$0xff]   ;;  %v6594_v8 = vld [vmem:[%s8434_s7 + $0x368] ss:$16 sps:$4 sm:$0xff]   ;;  %v6599_v9 = vld [vmem:[%s8434_s7 + $0x384] ss:$16 sps:$4 sm:$0xff]  }
 0x3cc   :  { %4540 = vmatprep.mubr.bf16.mxu1 %v2943_v59  ;;  %4704 = vmatprep.mubr.bf16.mxu0 %v2943_v59  ;;  %v6602_v59 = vld [vmem:[%s8434_s7 + $0x38c] ss:$16 sps:$4 sm:$0xff]  }
 0x3cd   :  { %4541 = vmatmul.mubr.bf16.vlgmr.msra.gmra.mrb[68].mxu1 %v2942_v32  ;;  %4705 = vmatmul.mubr.bf16.vlgmr.msra.gmra.mrb[100].mxu0 %v2942_v32  ;;  %v2420_v32 = vsub.s32 2, %v7704_v46 }
 0x3ce   :  { %4550 = vmatpush1.bf16.msra.mxu1 %v6525_v31  ;;  %4714 = vmatpush1.bf16.msra.mxu0 %v6528_v41  ;;  %v6597_v31 = vld [vmem:[%s8434_s7 + $0x380] ss:$16 sps:$4 sm:$0xff]   ;;  %v6600_v41 = vld [vmem:[%s8434_s7 + $0x388] ss:$16 sps:$4 sm:$0xff]  }
 0x3cf   :  { %4581 = vmatprep.mubr.bf16.mxu1 %v2945_v37  ;;  %4745 = vmatprep.mubr.bf16.mxu0 %v2945_v37  ;;  %v2432_v37 = vsub.s32 5, %v7704_v46 }
 0x3d0   :  { %4551 = vmatprep.subr.bf16.mxu1 %v6533_v35  ;;  %4715 = vmatprep.subr.bf16.mxu0 %v6536_v36  ;;  %v6605_v35 = vld [vmem:[%s8434_s7 + $0x3a4] ss:$16 sps:$4 sm:$0xff]   ;;  %v6608_v36 = vld [vmem:[%s8434_s7 + $0x3ac] ss:$16 sps:$4 sm:$0xff]  }
 0x3d2   :  { %4552 = vmatpush1.bf16.msra.mxu1 %v6531_v11  ;;  %4716 = vmatpush1.bf16.msra.mxu0 %v6534_v7  ;;  %v6603_v11 = vld [vmem:[%s8434_s7 + $0x3a0] ss:$16 sps:$4 sm:$0xff]   ;;  %v6606_v7 = vld [vmem:[%s8434_s7 + $0x3a8] ss:$16 sps:$4 sm:$0xff]  }
 0x3d3   :  { %4553 = vmatprep.subr.bf16.mxu1 %v6539_v42  ;;  %4717 = vmatprep.subr.bf16.mxu0 %v6542_v14  ;;  %v2421_v42 = vrot.slane %v7707_v50, %v2420_v32  ;;  %v6611_v14 = vld [vmem:[%s8434_s7 + $0x3c4] ss:$16 sps:$4 sm:$0xff]  }
 0x3d6   :  { %4554 = vmatpush1.bf16.msra.mxu1 %v6537_v13  ;;  %4718 = vmatpush1.bf16.msra.mxu0 %v6540_v39  ;;  %v6614_v13 = vld [vmem:[%s8434_s7 + $0x3cc] ss:$16 sps:$4 sm:$0xff]   ;;  %v2433_v39 = vrot.slane %v7707_v50, %v2432_v37  ;;  %v6677_v37 = vld [vmem:[%s8434_s7 + $0x524] ss:$16 sps:$4 sm:$0xff]  }
 0x3d7   :  { %4555 = vmatprep.subr.bf16.mxu1 %v6545_v15  ;;  %4719 = vmatprep.subr.bf16.mxu0 %v6548_v30  ;;  %v6609_v15 = vld [vmem:[%s8434_s7 + $0x3c0] ss:$16 sps:$4 sm:$0xff]   ;;  %v6612_v30 = vld [vmem:[%s8434_s7 + $0x3c8] ss:$16 sps:$4 sm:$0xff]  }
 0x3da   :  { %4556 = vmatpush1.bf16.msra.mxu1 %v6543_v17  ;;  %4720 = vmatpush1.bf16.msra.mxu0 %v6546_v4  ;;  %v2846_v17 = vadd.f32 %v7720_v60, %v2421_v42  ;;  %v6617_v4 = vld [vmem:[%s8434_s7 + $0x3e4] ss:$16 sps:$4 sm:$0xff]   ;;  %v6618_v60 = vld [vmem:[%s8434_s7 + $0x3e8] ss:$16 sps:$4 sm:$0xff]  }
 0x3db   :  { %4557 = vmatprep.subr.bf16.mxu1 %v6551_v19  ;;  %4721 = vmatprep.subr.bf16.mxu0 %v6554_v20  ;;  %v6620_v19 = vld [vmem:[%s8434_s7 + $0x3ec] ss:$16 sps:$4 sm:$0xff]   ;;  %v6678_v42 = vld [vmem:[%s8434_s7 + $0x528] ss:$16 sps:$4 sm:$0xff]  }
 0x3de   :  { %4558 = vmatpush1.bf16.msra.mxu1 %v6549_v25  ;;  %4722 = vmatpush1.bf16.msra.mxu0 %v6552_v21  ;;  %v6615_v25 = vld [vmem:[%s8434_s7 + $0x3e0] ss:$16 sps:$4 sm:$0xff]   ;;  %v2936_v21 = vmax.f32 %v2846_v17, 0.0  ;;  %v6692_v17 = vld [vmem:[%s8434_s7 + $0x56c] ss:$16 sps:$4 sm:$0xff]  }
 0x3df   :  { %4559 = vmatprep.subr.bf16.mxu1 %v6557_v57  ;;  %4723 = vmatprep.subr.bf16.mxu0 %v6560_v23  ;;  %v6623_v57 = vld [vmem:[%s8434_s7 + $0x404] ss:$16 sps:$4 sm:$0xff]   ;;  %v6626_v23 = vld [vmem:[%s8434_s7 + $0x40c] ss:$16 sps:$4 sm:$0xff]  }
 0x3e2   :  { %4560 = vmatpush1.bf16.msra.mxu1 %v6555_v22  ;;  %4724 = vmatpush1.bf16.msra.mxu0 %v6558_v24  ;;  %v6621_v24 = vld [vmem:[%s8434_s7 + $0x400] ss:$16 sps:$4 sm:$0xff]  }
 0x3e3   :  { %4561 = vmatprep.subr.bf16.mxu1 %v6563_v48  ;;  %4725 = vmatprep.subr.bf16.mxu0 %v6566_v26  ;;  %v2944_v48 = vpack.c.bf16 %v2936_v21, %v2936_v21  ;;  %v6624_v26 = vld [vmem:[%s8434_s7 + $0x408] ss:$16 sps:$4 sm:$0xff]   ;;  %v2428_v21 = vsub.s32 4, %v7704_v46 }
 0x3e4   :  { %v7806_v34 = vpop.f32.mrb[64].mxu1  ;;  %v7808_v12 = vpop.f32.mrb[96].mxu0 }
 0x3e5   :  { %v7810_v38 = vpop.f32.mrb[65].mxu1  ;;  %v7812_v33 = vpop.f32.mrb[97].mxu0 }
 0x3e6   :  { %v2890_v40 = vpop.f32.mrb[66].mxu1  ;;  %v2931_v53 = vpop.f32.mrb[98].mxu0  ;;  %4562 = vmatpush1.bf16.msra.mxu1 %v6561_v27  ;;  %4726 = vmatpush1.bf16.msra.mxu0 %v6564_v10  ;;  %v2889_v20 = vadd.f32 %v7810_v38, %v2433_v39  ;;  %v6629_v10 = vld [vmem:[%s8434_s7 + $0x424] ss:$16 sps:$4 sm:$0xff]   ;;  %v6630_v38 = vld [vmem:[%s8434_s7 + $0x428] ss:$16 sps:$4 sm:$0xff]  }
 0x3e7   :  { %v2891_v16 = vpop.f32.mrb[67].mxu1  ;;  %v2932_v52 = vpop.f32.mrb[99].mxu0  ;;  %4563 = vmatprep.subr.bf16.mxu1 %v6569_v28  ;;  %4727 = vmatprep.subr.bf16.mxu0 %v6572_v29  ;;  %v6632_v28 = vld [vmem:[%s8434_s7 + $0x42c] ss:$16 sps:$4 sm:$0xff]   ;;  %v6627_v29 = vld [vmem:[%s8434_s7 + $0x420] ss:$16 sps:$4 sm:$0xff]  }
 0x3e8   :  { %v2939_v22 = vmax.f32 %v2889_v20, 0.0  ;;  %v6635_v40 = vld [vmem:[%s8434_s7 + $0x444] ss:$16 sps:$4 sm:$0xff]   ;;  %v6638_v53 = vld [vmem:[%s8434_s7 + $0x44c] ss:$16 sps:$4 sm:$0xff]  }
 0x3e9   :  { %v6641_v16 = vld [vmem:[%s8434_s7 + $0x464] ss:$16 sps:$4 sm:$0xff]   ;;  %v6644_v52 = vld [vmem:[%s8434_s7 + $0x46c] ss:$16 sps:$4 sm:$0xff]   ;;  %v6681_v39 = vld [vmem:[%s8434_s7 + $0x540] ss:$16 sps:$4 sm:$0xff]  }
 0x3ea   :  { %4564 = vmatpush1.bf16.msra.mxu1 %v6567_v43  ;;  %4728 = vmatpush1.bf16.msra.mxu0 %v6570_v44  ;;  %v2947_v27 = vpack.c.bf16 %v2939_v22, %v2939_v22  ;;  %v6633_v43 = vld [vmem:[%s8434_s7 + $0x440] ss:$16 sps:$4 sm:$0xff]   ;;  %v6636_v44 = vld [vmem:[%s8434_s7 + $0x448] ss:$16 sps:$4 sm:$0xff]   ;;  %v6695_v20 = vld [vmem:[%s8434_s7 + $0x584] ss:$16 sps:$4 sm:$0xff]  }
 0x3eb   :  { %4565 = vmatprep.subr.bf16.mxu1 %v6575_v47  ;;  %4729 = vmatprep.subr.bf16.mxu0 %v6578_v55  ;;  %v6639_v47 = vld [vmem:[%s8434_s7 + $0x460] ss:$16 sps:$4 sm:$0xff]   ;;  %v6642_v55 = vld [vmem:[%s8434_s7 + $0x468] ss:$16 sps:$4 sm:$0xff]   ;;  %v6704_v22 = vld [vmem:[%s8434_s7 + $0x5ac] ss:$16 sps:$4 sm:$0xff]  }
 0x3ee   :  { %4566 = vmatpush1.bf16.msra.mxu1 %v6573_v45  ;;  %4730 = vmatpush1.bf16.msra.mxu0 %v6576_v56  ;;  %v6647_v45 = vld [vmem:[%s8434_s7 + $0x484] ss:$16 sps:$4 sm:$0xff]   ;;  %v6650_v56 = vld [vmem:[%s8434_s7 + $0x48c] ss:$16 sps:$4 sm:$0xff]  }
 0x3ef   :  { %4567 = vmatprep.subr.bf16.mxu1 %v6581_v58  ;;  %4731 = vmatprep.subr.bf16.mxu0 %v6584_v61  ;;  %v6645_v58 = vld [vmem:[%s8434_s7 + $0x480] ss:$16 sps:$4 sm:$0xff]   ;;  %v6648_v61 = vld [vmem:[%s8434_s7 + $0x488] ss:$16 sps:$4 sm:$0xff]  }
 0x3f2   :  { %4568 = vmatpush1.bf16.msra.mxu1 %v6579_v49  ;;  %4732 = vmatpush1.bf16.msra.mxu0 %v6582_v1  ;;  %v6653_v49 = vld [vmem:[%s8434_s7 + $0x4a4] ss:$16 sps:$4 sm:$0xff]   ;;  %v6656_v1 = vld [vmem:[%s8434_s7 + $0x4ac] ss:$16 sps:$4 sm:$0xff]  }
 0x3f3   :  { %4569 = vmatprep.subr.bf16.mxu1 %v6587_v62  ;;  %4733 = vmatprep.subr.bf16.mxu0 %v6590_v63  ;;  %v6651_v62 = vld [vmem:[%s8434_s7 + $0x4a0] ss:$16 sps:$4 sm:$0xff]   ;;  %v6654_v63 = vld [vmem:[%s8434_s7 + $0x4a8] ss:$16 sps:$4 sm:$0xff]  }
 0x3f6   :  { %4570 = vmatpush1.bf16.msra.mxu1 %v6585_v2  ;;  %4734 = vmatpush1.bf16.msra.mxu0 %v6588_v3  ;;  %v6659_v2 = vld [vmem:[%s8434_s7 + $0x4c4] ss:$16 sps:$4 sm:$0xff]   ;;  %v6662_v3 = vld [vmem:[%s8434_s7 + $0x4cc] ss:$16 sps:$4 sm:$0xff]  }
 0x3f7   :  { %4571 = vmatprep.subr.bf16.mxu1 %v6593_v5  ;;  %4735 = vmatprep.subr.bf16.mxu0 %v6596_v18  ;;  %v6657_v5 = vld [vmem:[%s8434_s7 + $0x4c0] ss:$16 sps:$4 sm:$0xff]   ;;  %v6660_v18 = vld [vmem:[%s8434_s7 + $0x4c8] ss:$16 sps:$4 sm:$0xff]  }
 0x3fa   :  { %4572 = vmatpush1.bf16.msra.mxu1 %v6591_v6  ;;  %4736 = vmatpush1.bf16.msra.mxu0 %v6594_v8  ;;  %v6665_v6 = vld [vmem:[%s8434_s7 + $0x4e4] ss:$16 sps:$4 sm:$0xff]   ;;  %v6668_v8 = vld [vmem:[%s8434_s7 + $0x4ec] ss:$16 sps:$4 sm:$0xff]  }
 0x3fb   :  { %4573 = vmatprep.subr.bf16.mxu1 %v6599_v9  ;;  %4737 = vmatprep.subr.bf16.mxu0 %v6602_v59  ;;  %v6663_v9 = vld [vmem:[%s8434_s7 + $0x4e0] ss:$16 sps:$4 sm:$0xff]   ;;  %v6666_v59 = vld [vmem:[%s8434_s7 + $0x4e8] ss:$16 sps:$4 sm:$0xff]  }
 0x3fe   :  { %4574 = vmatpush1.bf16.msra.mxu1 %v6597_v31  ;;  %4738 = vmatpush1.bf16.msra.mxu0 %v6600_v41  ;;  %v6671_v31 = vld [vmem:[%s8434_s7 + $0x504] ss:$16 sps:$4 sm:$0xff]   ;;  %v6674_v41 = vld [vmem:[%s8434_s7 + $0x50c] ss:$16 sps:$4 sm:$0xff]  }
 0x3ff   :  { %4575 = vmatprep.subr.bf16.mxu1 %v6605_v35  ;;  %4739 = vmatprep.subr.bf16.mxu0 %v6608_v36  ;;  %v6669_v35 = vld [vmem:[%s8434_s7 + $0x500] ss:$16 sps:$4 sm:$0xff]   ;;  %v6672_v36 = vld [vmem:[%s8434_s7 + $0x508] ss:$16 sps:$4 sm:$0xff]  }
 0x402   :  { %4576 = vmatpush1.bf16.msra.mxu1 %v6603_v11  ;;  %4740 = vmatpush1.bf16.msra.mxu0 %v6606_v7  ;;  %v6680_v11 = vld [vmem:[%s8434_s7 + $0x52c] ss:$16 sps:$4 sm:$0xff]   ;;  %v6675_v7 = vld [vmem:[%s8434_s7 + $0x520] ss:$16 sps:$4 sm:$0xff]  }
 0x403   :  { %4577 = vmatprep.subr.bf16.mxu1 %v6611_v14  ;;  %4741 = vmatprep.subr.bf16.mxu0 %v6614_v13  ;;  %v6683_v14 = vld [vmem:[%s8434_s7 + $0x544] ss:$16 sps:$4 sm:$0xff]   ;;  %v6686_v13 = vld [vmem:[%s8434_s7 + $0x54c] ss:$16 sps:$4 sm:$0xff]  }
 0x406   :  { %4578 = vmatpush1.bf16.msra.mxu1 %v6609_v15  ;;  %4742 = vmatpush1.bf16.msra.mxu0 %v6612_v30  ;;  %v6684_v15 = vld [vmem:[%s8434_s7 + $0x548] ss:$16 sps:$4 sm:$0xff]   ;;  %v6689_v30 = vld [vmem:[%s8434_s7 + $0x564] ss:$16 sps:$4 sm:$0xff]  }
 0x407   :  { %4579 = vmatprep.subr.bf16.mxu1 %v6617_v4  ;;  %4743 = vmatprep.subr.bf16.mxu0 %v6620_v19  ;;  %v6687_v4 = vld [vmem:[%s8434_s7 + $0x560] ss:$16 sps:$4 sm:$0xff]   ;;  %v6690_v19 = vld [vmem:[%s8434_s7 + $0x568] ss:$16 sps:$4 sm:$0xff]  }
 0x40a   :  { %4580 = vmatpush1.bf16.msra.mxu1 %v6615_v25  ;;  %4744 = vmatpush1.bf16.msra.mxu0 %v6618_v60  ;;  %v6698_v25 = vld [vmem:[%s8434_s7 + $0x58c] ss:$16 sps:$4 sm:$0xff]   ;;  %v6693_v60 = vld [vmem:[%s8434_s7 + $0x580] ss:$16 sps:$4 sm:$0xff]  }
 0x40b   :  { %4590 = vmatprep.subr.bf16.mxu1 %v6623_v57  ;;  %4754 = vmatprep.subr.bf16.mxu0 %v6626_v23  ;;  %v6696_v57 = vld [vmem:[%s8434_s7 + $0x588] ss:$16 sps:$4 sm:$0xff]   ;;  %v6701_v23 = vld [vmem:[%s8434_s7 + $0x5a4] ss:$16 sps:$4 sm:$0xff]  }
 0x40d   :  { %4582 = vmatmul.mubr.bf16.vlgmr.msra.gmra.mrb[68].mxu1 %v2944_v48  ;;  %4746 = vmatmul.mubr.bf16.vlgmr.msra.gmra.mrb[100].mxu0 %v2944_v48  ;;  %v6699_v48 = vld [vmem:[%s8434_s7 + $0x5a0] ss:$16 sps:$4 sm:$0xff]  }
 0x40e   :  { %4591 = vmatpush1.bf16.msra.mxu1 %v6621_v24  ;;  %4622 = vmatprep.mubr.bf16.mxu1 %v2947_v27  ;;  %v2440_v24 = vsub.s32 7, %v7704_v46 }
 0x40f   :  { %4755 = vmatpush1.bf16.msra.mxu0 %v6624_v26  ;;  %4786 = vmatprep.mubr.bf16.mxu0 %v2947_v27  ;;  %v2429_v26 = vrot.slane %v7707_v50, %v2428_v21  ;;  %v6702_v27 = vld [vmem:[%s8434_s7 + $0x5a8] ss:$16 sps:$4 sm:$0xff]   ;;  %v6765_v21 = vld [vmem:[%s8434_s7 + $0x700] ss:$16 sps:$4 sm:$0xff]  }
 0x410   :  { %4592 = vmatprep.subr.bf16.mxu1 %v6629_v10  ;;  %4756 = vmatprep.subr.bf16.mxu0 %v6632_v28  ;;  %v6707_v10 = vld [vmem:[%s8434_s7 + $0x5c4] ss:$16 sps:$4 sm:$0xff]   ;;  %v6710_v28 = vld [vmem:[%s8434_s7 + $0x5cc] ss:$16 sps:$4 sm:$0xff]  }
 0x412   :  { %4593 = vmatpush1.bf16.msra.mxu1 %v6627_v29  ;;  %v2441_v29 = vrot.slane %v7707_v50, %v2440_v24  ;;  %v6771_v24 = vld [vmem:[%s8434_s7 + $0x720] ss:$16 sps:$4 sm:$0xff]  }
 0x413   :  { %4757 = vmatpush1.bf16.msra.mxu0 %v6630_v38  ;;  %4594 = vmatprep.subr.bf16.mxu1 %v6635_v40  ;;  %v6705_v38 = vld [vmem:[%s8434_s7 + $0x5c0] ss:$16 sps:$4 sm:$0xff]   ;;  %v2887_v40 = vadd.f32 %v7806_v34, %v2429_v26  ;;  %v6779_v26 = vld [vmem:[%s8434_s7 + $0x744] ss:$16 sps:$4 sm:$0xff]  }
 0x414   :  { %4758 = vmatprep.subr.bf16.mxu0 %v6638_v53  ;;  %v6708_v53 = vld [vmem:[%s8434_s7 + $0x5c8] ss:$16 sps:$4 sm:$0xff]   ;;  %v6711_v34 = vld [vmem:[%s8434_s7 + $0x5e0] ss:$16 sps:$4 sm:$0xff]  }
 0x416   :  { %4595 = vmatpush1.bf16.msra.mxu1 %v6633_v43  ;;  %v6713_v43 = vld [vmem:[%s8434_s7 + $0x5e4] ss:$16 sps:$4 sm:$0xff]  }
 0x417   :  { %4759 = vmatpush1.bf16.msra.mxu0 %v6636_v44  ;;  %4596 = vmatprep.subr.bf16.mxu1 %v6641_v16  ;;  %v6716_v44 = vld [vmem:[%s8434_s7 + $0x5ec] ss:$16 sps:$4 sm:$0xff]   ;;  %v2930_v16 = vadd.f32 %v7812_v33, %v2441_v29  ;;  %v6785_v29 = vld [vmem:[%s8434_s7 + $0x764] ss:$16 sps:$4 sm:$0xff]  }
 0x418   :  { %4760 = vmatprep.subr.bf16.mxu0 %v6644_v52  ;;  %v2938_v52 = vmax.f32 %v2887_v40, 0.0  ;;  %v6722_v33 = vld [vmem:[%s8434_s7 + $0x60c] ss:$16 sps:$4 sm:$0xff]   ;;  %v6783_v40 = vld [vmem:[%s8434_s7 + $0x760] ss:$16 sps:$4 sm:$0xff]  }
 0x41a   :  { %4597 = vmatpush1.bf16.msra.mxu1 %v6639_v47  ;;  %v6714_v47 = vld [vmem:[%s8434_s7 + $0x5e8] ss:$16 sps:$4 sm:$0xff]  }
 0x41b   :  { %4761 = vmatpush1.bf16.msra.mxu0 %v6642_v55  ;;  %4598 = vmatprep.subr.bf16.mxu1 %v6647_v45  ;;  %v6719_v55 = vld [vmem:[%s8434_s7 + $0x604] ss:$16 sps:$4 sm:$0xff]   ;;  %v2941_v45 = vmax.f32 %v2930_v16, 0.0  ;;  %v6789_v16 = vld [vmem:[%s8434_s7 + $0x780] ss:$16 sps:$4 sm:$0xff]  }
 0x41c   :  { %4762 = vmatprep.subr.bf16.mxu0 %v6650_v56  ;;  %v6717_v56 = vld [vmem:[%s8434_s7 + $0x600] ss:$16 sps:$4 sm:$0xff]  }
 0x41e   :  { %4599 = vmatpush1.bf16.msra.mxu1 %v6645_v58  ;;  %v2946_v58 = vpack.c.bf16 %v2938_v52, %v2938_v52  ;;  %v6792_v52 = vld [vmem:[%s8434_s7 + $0x788] ss:$16 sps:$4 sm:$0xff]  }
 0x41f   :  { %4763 = vmatpush1.bf16.msra.mxu0 %v6648_v61  ;;  %4600 = vmatprep.subr.bf16.mxu1 %v6653_v49  ;;  %v6720_v61 = vld [vmem:[%s8434_s7 + $0x608] ss:$16 sps:$4 sm:$0xff]   ;;  %v6725_v49 = vld [vmem:[%s8434_s7 + $0x624] ss:$16 sps:$4 sm:$0xff]  }
 0x420   :  { %4764 = vmatprep.subr.bf16.mxu0 %v6656_v1  ;;  %v2949_v1 = vpack.c.bf16 %v2941_v45, %v2941_v45 }
 0x422   :  { %4601 = vmatpush1.bf16.msra.mxu1 %v6651_v62  ;;  %v6728_v62 = vld [vmem:[%s8434_s7 + $0x62c] ss:$16 sps:$4 sm:$0xff]  }
 0x423   :  { %4765 = vmatpush1.bf16.msra.mxu0 %v6654_v63  ;;  %4602 = vmatprep.subr.bf16.mxu1 %v6659_v2  ;;  %v6723_v63 = vld [vmem:[%s8434_s7 + $0x620] ss:$16 sps:$4 sm:$0xff]   ;;  %v6726_v2 = vld [vmem:[%s8434_s7 + $0x628] ss:$16 sps:$4 sm:$0xff]  }
 0x424   :  { %4766 = vmatprep.subr.bf16.mxu0 %v6662_v3  ;;  %v6731_v3 = vld [vmem:[%s8434_s7 + $0x644] ss:$16 sps:$4 sm:$0xff]  }
 0x426   :  { %4603 = vmatpush1.bf16.msra.mxu1 %v6657_v5  ;;  %v6734_v5 = vld [vmem:[%s8434_s7 + $0x64c] ss:$16 sps:$4 sm:$0xff]  }
 0x427   :  { %4767 = vmatpush1.bf16.msra.mxu0 %v6660_v18  ;;  %4604 = vmatprep.subr.bf16.mxu1 %v6665_v6  ;;  %v6729_v18 = vld [vmem:[%s8434_s7 + $0x640] ss:$16 sps:$4 sm:$0xff]   ;;  %v6732_v6 = vld [vmem:[%s8434_s7 + $0x648] ss:$16 sps:$4 sm:$0xff]  }
 0x428   :  { %4768 = vmatprep.subr.bf16.mxu0 %v6668_v8  ;;  %v6737_v8 = vld [vmem:[%s8434_s7 + $0x664] ss:$16 sps:$4 sm:$0xff]  }
 0x42a   :  { %4605 = vmatpush1.bf16.msra.mxu1 %v6663_v9  ;;  %v6740_v9 = vld [vmem:[%s8434_s7 + $0x66c] ss:$16 sps:$4 sm:$0xff]  }
 0x42b   :  { %4769 = vmatpush1.bf16.msra.mxu0 %v6666_v59  ;;  %4606 = vmatprep.subr.bf16.mxu1 %v6671_v31  ;;  %v6735_v59 = vld [vmem:[%s8434_s7 + $0x660] ss:$16 sps:$4 sm:$0xff]   ;;  %v6738_v31 = vld [vmem:[%s8434_s7 + $0x668] ss:$16 sps:$4 sm:$0xff]  }
 0x42c   :  { %4770 = vmatprep.subr.bf16.mxu0 %v6674_v41  ;;  %v6743_v41 = vld [vmem:[%s8434_s7 + $0x684] ss:$16 sps:$4 sm:$0xff]  }
 0x42e   :  { %4607 = vmatpush1.bf16.msra.mxu1 %v6669_v35  ;;  %v6746_v35 = vld [vmem:[%s8434_s7 + $0x68c] ss:$16 sps:$4 sm:$0xff]  }
 0x42f   :  { %4771 = vmatpush1.bf16.msra.mxu0 %v6672_v36  ;;  %4608 = vmatprep.subr.bf16.mxu1 %v6677_v37  ;;  %v6741_v36 = vld [vmem:[%s8434_s7 + $0x680] ss:$16 sps:$4 sm:$0xff]   ;;  %v6744_v37 = vld [vmem:[%s8434_s7 + $0x688] ss:$16 sps:$4 sm:$0xff]  }
 0x430   :  { %4772 = vmatprep.subr.bf16.mxu0 %v6680_v11  ;;  %v6749_v11 = vld [vmem:[%s8434_s7 + $0x6a4] ss:$16 sps:$4 sm:$0xff]  }
 0x432   :  { %4609 = vmatpush1.bf16.msra.mxu1 %v6675_v7  ;;  %v6752_v7 = vld [vmem:[%s8434_s7 + $0x6ac] ss:$16 sps:$4 sm:$0xff]  }
 0x433   :  { %4773 = vmatpush1.bf16.msra.mxu0 %v6678_v42  ;;  %4610 = vmatprep.subr.bf16.mxu1 %v6683_v14  ;;  %v6747_v42 = vld [vmem:[%s8434_s7 + $0x6a0] ss:$16 sps:$4 sm:$0xff]   ;;  %v6750_v14 = vld [vmem:[%s8434_s7 + $0x6a8] ss:$16 sps:$4 sm:$0xff]  }
 0x434   :  { %4774 = vmatprep.subr.bf16.mxu0 %v6686_v13  ;;  %v6755_v13 = vld [vmem:[%s8434_s7 + $0x6c4] ss:$16 sps:$4 sm:$0xff]  }
 0x436   :  { %4611 = vmatpush1.bf16.msra.mxu1 %v6681_v39  ;;  %v6758_v39 = vld [vmem:[%s8434_s7 + $0x6cc] ss:$16 sps:$4 sm:$0xff]  }
 0x437   :  { %4775 = vmatpush1.bf16.msra.mxu0 %v6684_v15  ;;  %4612 = vmatprep.subr.bf16.mxu1 %v6689_v30  ;;  %v6753_v15 = vld [vmem:[%s8434_s7 + $0x6c0] ss:$16 sps:$4 sm:$0xff]   ;;  %v6756_v30 = vld [vmem:[%s8434_s7 + $0x6c8] ss:$16 sps:$4 sm:$0xff]  }
 0x438   :  { %4776 = vmatprep.subr.bf16.mxu0 %v6692_v17  ;;  %v6761_v17 = vld [vmem:[%s8434_s7 + $0x6e4] ss:$16 sps:$4 sm:$0xff]  }
 0x43a   :  { %4613 = vmatpush1.bf16.msra.mxu1 %v6687_v4  ;;  %v6764_v4 = vld [vmem:[%s8434_s7 + $0x6ec] ss:$16 sps:$4 sm:$0xff]  }
 0x43b   :  { %4777 = vmatpush1.bf16.msra.mxu0 %v6690_v19  ;;  %4614 = vmatprep.subr.bf16.mxu1 %v6695_v20  ;;  %v6759_v19 = vld [vmem:[%s8434_s7 + $0x6e0] ss:$16 sps:$4 sm:$0xff]   ;;  %v6762_v20 = vld [vmem:[%s8434_s7 + $0x6e8] ss:$16 sps:$4 sm:$0xff]  }
 0x43c   :  { %4778 = vmatprep.subr.bf16.mxu0 %v6698_v25  ;;  %v6767_v25 = vld [vmem:[%s8434_s7 + $0x704] ss:$16 sps:$4 sm:$0xff]  }
 0x43e   :  { %4615 = vmatpush1.bf16.msra.mxu1 %v6693_v60  ;;  %v6770_v60 = vld [vmem:[%s8434_s7 + $0x70c] ss:$16 sps:$4 sm:$0xff]  }
 0x43f   :  { %4779 = vmatpush1.bf16.msra.mxu0 %v6696_v57  ;;  %4616 = vmatprep.subr.bf16.mxu1 %v6701_v23  ;;  %v6768_v57 = vld [vmem:[%s8434_s7 + $0x708] ss:$16 sps:$4 sm:$0xff]   ;;  %v6773_v23 = vld [vmem:[%s8434_s7 + $0x724] ss:$16 sps:$4 sm:$0xff]  }
 0x440   :  { %4780 = vmatprep.subr.bf16.mxu0 %v6704_v22  ;;  %v6776_v22 = vld [vmem:[%s8434_s7 + $0x72c] ss:$16 sps:$4 sm:$0xff]  }
 0x442   :  { %4617 = vmatpush1.bf16.msra.mxu1 %v6699_v48  ;;  %v6774_v48 = vld [vmem:[%s8434_s7 + $0x728] ss:$16 sps:$4 sm:$0xff]  }
 0x443   :  { %4781 = vmatpush1.bf16.msra.mxu0 %v6702_v27  ;;  %4618 = vmatprep.subr.bf16.mxu1 %v6707_v10  ;;  %v6782_v27 = vld [vmem:[%s8434_s7 + $0x74c] ss:$16 sps:$4 sm:$0xff]   ;;  %v6777_v10 = vld [vmem:[%s8434_s7 + $0x740] ss:$16 sps:$4 sm:$0xff]  }
 0x444   :  { %4782 = vmatprep.subr.bf16.mxu0 %v6710_v28  ;;  %v6780_v28 = vld [vmem:[%s8434_s7 + $0x748] ss:$16 sps:$4 sm:$0xff]  }
 0x446   :  { %4619 = vmatpush1.bf16.msra.mxu1 %v6705_v38  ;;  %v6788_v38 = vld [vmem:[%s8434_s7 + $0x76c] ss:$16 sps:$4 sm:$0xff]  }
 0x447   :  { %4783 = vmatpush1.bf16.msra.mxu0 %v6708_v53  ;;  %4620 = vmatprep.subr.bf16.mxu1 %v6713_v43  ;;  %v6786_v53 = vld [vmem:[%s8434_s7 + $0x768] ss:$16 sps:$4 sm:$0xff]   ;;  %v6791_v43 = vld [vmem:[%s8434_s7 + $0x784] ss:$16 sps:$4 sm:$0xff]  }
 0x448   :  { %4784 = vmatprep.subr.bf16.mxu0 %v6716_v44  ;;  %v6794_v44 = vld [vmem:[%s8434_s7 + $0x78c] ss:$16 sps:$4 sm:$0xff]  }
 0x44a   :  { %4621 = vmatpush1.bf16.msra.mxu1 %v6711_v34  ;;  %v2436_v34 = vsub.s32 6, %v7704_v46 }
 0x44b   :  { %4785 = vmatpush1.bf16.msra.mxu0 %v6714_v47  ;;  %4631 = vmatprep.subr.bf16.mxu1 %v6719_v55  ;;  %v6797_v47 = vld [vmem:[%s8434_s7 + $0x7a4] ss:$16 sps:$4 sm:$0xff]   ;;  %v6800_v55 = vld [vmem:[%s8434_s7 + $0x7ac] ss:$16 sps:$4 sm:$0xff]  }
 0x44c   :  { %4795 = vmatprep.subr.bf16.mxu0 %v6722_v33  ;;  %v6795_v33 = vld [vmem:[%s8434_s7 + $0x7a0] ss:$16 sps:$4 sm:$0xff]   ;;  %v2437_v45 = vrot.slane %v7707_v50, %v2436_v34 }
 0x44d   :  { %4623 = vmatmul.mubr.bf16.vlgmr.msra.gmra.mrb[68].mxu1 %v2946_v58  ;;  %v6801_v50 = vld [vmem:[%s8434_s7 + $0x7c0] ss:$16 sps:$4 sm:$0xff]  }
 0x44e   :  { %4787 = vmatmul.mubr.bf16.vlgmr.msra.gmra.mrb[100].mxu0 %v2946_v58  ;;  %4632 = vmatpush1.bf16.msra.mxu1 %v6717_v56  ;;  %v6798_v56 = vld [vmem:[%s8434_s7 + $0x7a8] ss:$16 sps:$4 sm:$0xff]   ;;  %v6803_v58 = vld [vmem:[%s8434_s7 + $0x7c4] ss:$16 sps:$4 sm:$0xff]  }
 0x44f   :  { %4663 = vmatprep.mubr.bf16.mxu1 %v2949_v1  ;;  %4796 = vmatpush1.bf16.msra.mxu0 %v6720_v61  ;;  %v6806_v61 = vld [vmem:[%s8434_s7 + $0x7cc] ss:$16 sps:$4 sm:$0xff]  }
 0x450   :  { %4827 = vmatprep.mubr.bf16.mxu0 %v2949_v1  ;;  %4633 = vmatprep.subr.bf16.mxu1 %v6725_v49  ;;  %v2928_v49 = vadd.f32 %v7808_v12, %v2437_v45  ;;  %v6804_v1 = vld [vmem:[%s8434_s7 + $0x7c8] ss:$16 sps:$4 sm:$0xff]   ;;  %v6807_v12 = vld [vmem:[%s8434_s7 + $0x7e0] ss:$16 sps:$4 sm:$0xff]  }
 0x451   :  { %4797 = vmatprep.subr.bf16.mxu0 %v6728_v62  ;;  %v6809_v62 = vld [vmem:[%s8434_s7 + $0x7e4] ss:$16 sps:$4 sm:$0xff]  }
 0x452   :  { %4634 = vmatpush1.bf16.msra.mxu1 %v6723_v63  ;;  %v6812_v63 = vld [vmem:[%s8434_s7 + $0x7ec] ss:$16 sps:$4 sm:$0xff]  }
 0x453   :  { %4798 = vmatpush1.bf16.msra.mxu0 %v6726_v2  ;;  %4635 = vmatprep.subr.bf16.mxu1 %v6731_v3  ;;  %v2940_v2 = vmax.f32 %v2928_v49, 0.0  ;;  %v6810_v3 = vld [vmem:[%s8434_s7 + $0x7e8] ss:$16 sps:$4 sm:$0xff]  }
 0x454   :  { %4799 = vmatprep.subr.bf16.mxu0 %v6734_v5  ;;  %v6813_v5 = vld [vmem:[%s8436_s9 + $0x40] sm:$0xff]  }
 0x456   :  { %4636 = vmatpush1.bf16.msra.mxu1 %v6729_v18  ;;  %v6814_v18 = vld [vmem:[%s8436_s9 + $0xc0] sm:$0xff]  }
 0x457   :  { %4800 = vmatpush1.bf16.msra.mxu0 %v6732_v6  ;;  %4637 = vmatprep.subr.bf16.mxu1 %v6737_v8  ;;  %v6815_v6 = vld [vmem:[%s8436_s9] sm:$0xff]   ;;  %v2948_v8 = vpack.c.bf16 %v2940_v2, %v2940_v2 }
 0x458   :  { %4801 = vmatprep.subr.bf16.mxu0 %v6740_v9  ;;  %v6816_v9 = vld [vmem:[%s8436_s9 + $0x80] sm:$0xff]  }
 0x45a   :  { %4638 = vmatpush1.bf16.msra.mxu1 %v6735_v59  ;;  %v6817_v59 = vld [vmem:[%s8436_s9 + $0x48] sm:$0xff]  }
 0x45b   :  { %4802 = vmatpush1.bf16.msra.mxu0 %v6738_v31  ;;  %4639 = vmatprep.subr.bf16.mxu1 %v6743_v41  ;;  %v6818_v31 = vld [vmem:[%s8436_s9 + $0xc8] sm:$0xff]  }
 0x45c   :  { %4803 = vmatprep.subr.bf16.mxu0 %v6746_v35  ;;  %v6819_v41 = vld [vmem:[%s8436_s9 + $0x8] sm:$0xff]  }
 0x45d   :  { %v6820_v35 = vld [vmem:[%s8436_s9 + $0x88] sm:$0xff]  }
 0x45e   :  { %4640 = vmatpush1.bf16.msra.mxu1 %v6741_v36  ;;  %v6821_v36 = vld [vmem:[%s8436_s9 + $0x50] sm:$0xff]  }
 0x45f   :  { %4804 = vmatpush1.bf16.msra.mxu0 %v6744_v37  ;;  %4641 = vmatprep.subr.bf16.mxu1 %v6749_v11  ;;  %v6822_v37 = vld [vmem:[%s8436_s9 + $0xd0] sm:$0xff]  }
 0x460   :  { %4805 = vmatprep.subr.bf16.mxu0 %v6752_v7  ;;  %v6823_v11 = vld [vmem:[%s8436_s9 + $0x10] sm:$0xff]  }
 0x461   :  { %v6824_v7 = vld [vmem:[%s8436_s9 + $0x90] sm:$0xff]  }
 0x462   :  { %4642 = vmatpush1.bf16.msra.mxu1 %v6747_v42  ;;  %v6825_v42 = vld [vmem:[%s8436_s9 + $0x58] sm:$0xff]  }
 0x463   :  { %4806 = vmatpush1.bf16.msra.mxu0 %v6750_v14  ;;  %4643 = vmatprep.subr.bf16.mxu1 %v6755_v13  ;;  %v6826_v14 = vld [vmem:[%s8436_s9 + $0xd8] sm:$0xff]  }
 0x464   :  { %4807 = vmatprep.subr.bf16.mxu0 %v6758_v39  ;;  %v6827_v13 = vld [vmem:[%s8436_s9 + $0x18] sm:$0xff]  }
 0x465   :  { %v6828_v39 = vld [vmem:[%s8436_s9 + $0x98] sm:$0xff]  }
 0x466   :  { %4644 = vmatpush1.bf16.msra.mxu1 %v6753_v15  ;;  %v6829_v15 = vld [vmem:[%s8436_s9 + $0x60] sm:$0xff]  }
 0x467   :  { %4808 = vmatpush1.bf16.msra.mxu0 %v6756_v30  ;;  %4645 = vmatprep.subr.bf16.mxu1 %v6761_v17  ;;  %v6830_v30 = vld [vmem:[%s8436_s9 + $0xe0] sm:$0xff]  }
 0x468   :  { %4809 = vmatprep.subr.bf16.mxu0 %v6764_v4  ;;  %v6831_v17 = vld [vmem:[%s8436_s9 + $0x20] sm:$0xff]  }
 0x469   :  { %v6832_v4 = vld [vmem:[%s8436_s9 + $0xa0] sm:$0xff]  }
 0x46a   :  { %4646 = vmatpush1.bf16.msra.mxu1 %v6759_v19  ;;  %v6833_v19 = vld [vmem:[%s8436_s9 + $0x68] sm:$0xff]  }
 0x46b   :  { %4810 = vmatpush1.bf16.msra.mxu0 %v6762_v20  ;;  %4647 = vmatprep.subr.bf16.mxu1 %v6767_v25  ;;  %v6834_v20 = vld [vmem:[%s8436_s9 + $0xe8] sm:$0xff]  }
 0x46c   :  { %4811 = vmatprep.subr.bf16.mxu0 %v6770_v60  ;;  %v6835_v25 = vld [vmem:[%s8436_s9 + $0x28] sm:$0xff]  }
 0x46d   :  { %v6836_v60 = vld [vmem:[%s8436_s9 + $0xa8] sm:$0xff]  }
 0x46e   :  { %4648 = vmatpush1.bf16.msra.mxu1 %v6765_v21  ;;  %v6837_v21 = vld [vmem:[%s8436_s9 + $0x70] sm:$0xff]  }
 0x46f   :  { %4812 = vmatpush1.bf16.msra.mxu0 %v6768_v57  ;;  %4649 = vmatprep.subr.bf16.mxu1 %v6773_v23  ;;  %v6838_v57 = vld [vmem:[%s8436_s9 + $0xf0] sm:$0xff]  }
 0x470   :  { %4813 = vmatprep.subr.bf16.mxu0 %v6776_v22  ;;  %v6839_v23 = vld [vmem:[%s8436_s9 + $0x30] sm:$0xff]  }
 0x471   :  { %v6840_v22 = vld [vmem:[%s8436_s9 + $0xb0] sm:$0xff]  }
 0x472   :  { %4650 = vmatpush1.bf16.msra.mxu1 %v6771_v24  ;;  %v6841_v24 = vld [vmem:[%s8436_s9 + $0x78] sm:$0xff]  }
 0x473   :  { %4814 = vmatpush1.bf16.msra.mxu0 %v6774_v48  ;;  %4651 = vmatprep.subr.bf16.mxu1 %v6779_v26  ;;  %v6842_v48 = vld [vmem:[%s8436_s9 + $0xf8] sm:$0xff]  }
 0x474   :  { %4815 = vmatprep.subr.bf16.mxu0 %v6782_v27  ;;  %v6843_v26 = vld [vmem:[%s8436_s9 + $0x38] sm:$0xff]  }
 0x475   :  { %v6844_v27 = vld [vmem:[%s8436_s9 + $0xb8] sm:$0xff]  }
 0x476   :  { %4652 = vmatpush1.bf16.msra.mxu1 %v6777_v10  ;;  %v3206_v10 = vld [vmem:[#allocation7] sm:$0xf] }
 0x477   :  { %4816 = vmatpush1.bf16.msra.mxu0 %v6780_v28  ;;  %4653 = vmatprep.subr.bf16.mxu1 %v6785_v29  ;;  %v3211_v28 = vrot.slane %v3206_v10, %v2412_v0  ;;  %v3219_v29 = vrot.slane %v3206_v10, %v2420_v32 }
 0x478   :  { %4817 = vmatprep.subr.bf16.mxu0 %v6788_v38  ;;  %v3215_v38 = vrot.slane %v3206_v10, %v2416_v51 }
 0x47a   :  { %4654 = vmatpush1.bf16.msra.mxu1 %v6783_v40  ;;  %v3223_v40 = vrot.slane %v3206_v10, %v2424_v54 }
 0x47b   :  { %4818 = vmatpush1.bf16.msra.mxu0 %v6786_v53  ;;  %4655 = vmatprep.subr.bf16.mxu1 %v6791_v43 }
 0x47c   :  { %4819 = vmatprep.subr.bf16.mxu0 %v6794_v44 }
 0x47e   :  { %4656 = vmatpush1.bf16.msra.mxu1 %v6789_v16 }
 0x47f   :  { %4820 = vmatpush1.bf16.msra.mxu0 %v6792_v52  ;;  %4657 = vmatprep.subr.bf16.mxu1 %v6797_v47 }
 0x480   :  { %4821 = vmatprep.subr.bf16.mxu0 %v6800_v55 }
 0x482   :  { %4658 = vmatpush1.bf16.msra.mxu1 %v6795_v33 }
 0x483   :  { %4822 = vmatpush1.bf16.msra.mxu0 %v6798_v56  ;;  %4659 = vmatprep.subr.bf16.mxu1 %v6803_v58 }
 0x484   :  { %4823 = vmatprep.subr.bf16.mxu0 %v6806_v61 }
 0x486   :  { %4660 = vmatpush1.bf16.msra.mxu1 %v6801_v50 }
 0x487   :  { %4824 = vmatpush1.bf16.msra.mxu0 %v6804_v1  ;;  %4661 = vmatprep.subr.bf16.mxu1 %v6809_v62 }
 0x488   :  { %4825 = vmatprep.subr.bf16.mxu0 %v6812_v63  ;;  %v5688_v63 = vld [vmem:[%s8437_s10] ss:$0 sm:$0xff] }
 0x48a   :  { %4662 = vmatpush1.bf16.msra.mxu1 %v6807_v12 }
 0x48b   :  { %4826 = vmatpush1.bf16.msra.mxu0 %v6810_v3  ;;  %5887 = vmatprep.subr.bf16.mxu1 %v6813_v5 }
 0x48c   :  { %5909 = vmatprep.subr.bf16.mxu0 %v6814_v18 }
 0x48d   :  { %4664 = vmatmul.mubr.bf16.vlgmr.msra.gmra.mrb[68].mxu1 %v2948_v8 }
 0x48e   :  { %4828 = vmatmul.mubr.bf16.vlgmr.msra.gmra.mrb[100].mxu0 %v2948_v8  ;;  %5888 = vmatpush3.bf16.msra.mxu1 %v6815_v6 }
 0x48f   :  { %5910 = vmatpush3.bf16.msra.mxu0 %v6816_v9  ;;  %5889 = vmatprep.subr.bf16.mxu1 %v6817_v59 }
 0x490   :  { %5911 = vmatprep.subr.bf16.mxu0 %v6818_v31 }
 0x492   :  { %5890 = vmatpush3.bf16.msra.mxu1 %v6819_v41 }
 0x493   :  { %5912 = vmatpush3.bf16.msra.mxu0 %v6820_v35  ;;  %5891 = vmatprep.subr.bf16.mxu1 %v6821_v36 }
 0x494   :  { %5913 = vmatprep.subr.bf16.mxu0 %v6822_v37 }
 0x496   :  { %5892 = vmatpush3.bf16.msra.mxu1 %v6823_v11 }
 0x497   :  { %5914 = vmatpush3.bf16.msra.mxu0 %v6824_v7  ;;  %5893 = vmatprep.subr.bf16.mxu1 %v6825_v42 }
 0x498   :  { %5915 = vmatprep.subr.bf16.mxu0 %v6826_v14 }
 0x49a   :  { %5894 = vmatpush3.bf16.msra.mxu1 %v6827_v13 }
 0x49b   :  { %5916 = vmatpush3.bf16.msra.mxu0 %v6828_v39  ;;  %5895 = vmatprep.subr.bf16.mxu1 %v6829_v15 }
 0x49c   :  { %5917 = vmatprep.subr.bf16.mxu0 %v6830_v30 }
 0x49e   :  { %5896 = vmatpush3.bf16.msra.mxu1 %v6831_v17 }
 0x49f   :  { %5918 = vmatpush3.bf16.msra.mxu0 %v6832_v4  ;;  %5897 = vmatprep.subr.bf16.mxu1 %v6833_v19 }
 0x4a0   :  { %5919 = vmatprep.subr.bf16.mxu0 %v6834_v20 }
 0x4a2   :  { %5898 = vmatpush3.bf16.msra.mxu1 %v6835_v25 }
 0x4a3   :  { %5920 = vmatpush3.bf16.msra.mxu0 %v6836_v60  ;;  %5899 = vmatprep.subr.bf16.mxu1 %v6837_v21 }
 0x4a4   :  { %5921 = vmatprep.subr.bf16.mxu0 %v6838_v57 }
 0x4a6   :  { %5900 = vmatpush3.bf16.msra.mxu1 %v6839_v23 }
 0x4a7   :  { %5922 = vmatpush3.bf16.msra.mxu0 %v6840_v22  ;;  %5901 = vmatprep.subr.bf16.mxu1 %v6841_v24 }
 0x4a8   :  { %5923 = vmatprep.subr.bf16.mxu0 %v6842_v48 }
 0x4aa   :  { %5902 = vmatpush3.bf16.msra.mxu1 %v6843_v26 }
 0x4ab   :  { %5924 = vmatpush3.bf16.msra.mxu0 %v6844_v27 }
 0x560   :  { %v4665_v53 = vpop.f32.mrb[68].mxu1 }
 0x561   :  { %v6287_v43 = vadd.f32 %v4665_v53, %v3211_v28  ;;  %v4829_v44 = vpop.f32.mrb[100].mxu0  ;;  %v4667_v16 = vpop.f32.mrb[69].mxu1 }
 0x562   :  { %v6289_v34 = vadd.f32 %v4829_v44, %v3219_v29  ;;  %v6288_v52 = vadd.f32 %v4667_v16, %v3215_v38  ;;  %v4831_v47 = vpop.f32.mrb[101].mxu0  ;;  %v4669_v55 = vpop.f32.mrb[70].mxu1 }
 0x563   :  { %v4836_v33 = vmax.f32 %v6287_v43, 0.0  ;;  %v6290_v45 = vadd.f32 %v4831_v47, %v3223_v40  ;;  %v4833_v0 = vpop.f32.mrb[102].mxu0  ;;  %v4670_v56 = vpop.f32.mrb[71].mxu1 }
 0x564   :  { %v4838_v58 = vmax.f32 %v6289_v34, 0.0  ;;  %v4837_v32 = vmax.f32 %v6288_v52, 0.0  ;;  %v4834_v61 = vpop.f32.mrb[103].mxu0 }
 0x565   :  { %v4839_v50 = vmax.f32 %v6290_v45, 0.0  ;;  %v4840_v49 = vpack.c.bf16 %v4836_v33, %v4836_v33 }
 0x566   :  { %v4841_v51 = vpack.c.bf16 %v4837_v32, %v4837_v32  ;;  %v4842_v54 = vpack.c.bf16 %v4838_v58, %v4838_v58 }
 0x567   :  { %v4843_v46 = vpack.c.bf16 %v4839_v50, %v4839_v50 }
 0x568   :  { %5139 = vmatprep.mubr.bf16.mxu1 %v4841_v51 }
 0x569   :  { %5179 = vmatprep.mubr.bf16.mxu0 %v4843_v46  ;;  %5140 = vmatmul.mubr.bf16.vlgmr.msra.gmra.mrb[72].mxu1 %v4840_v49 }
 0x56a   :  { %5180 = vmatmul.mubr.bf16.vlgmr.msra.gmra.mrb[104].mxu0 %v4842_v54 }
 0x63c   :  { %v5903_v1 = vpop.f32.mrb[72].mxu1 }
 0x63d   :  { %v5925_v62 = vpop.f32.mrb[104].mxu0  ;;  %v5904_v12 = vpop.f32.mrb[73].mxu1 }
 0x63e   :  { %v5905_v2 = vadd.f32 %v5904_v12, %v5903_v1  ;;  %v5926_v3 = vpop.f32.mrb[105].mxu0  ;;  %v5906_v5 = vpop.f32.mrb[74].mxu1 }
 0x63f   :  { %v5927_v18 = vadd.f32 %v5926_v3, %v5925_v62  ;;  %v5928_v6 = vpop.f32.mrb[106].mxu0  ;;  %v5907_v8 = vpop.f32.mrb[75].mxu1 }
 0x640   :  { %v5142_v9 = vadd.f32 %v5905_v2, %v5688_v63  ;;  %v5929_v59 = vpop.f32.mrb[107].mxu0 }
 0x642   :  { %v5182_v31 = vadd.f32 %v5927_v18, %v5142_v9 }
 0x644   :  { %v5721_v41 = vmul.f32 -1.442695, %v5182_v31 }
 0x646   :  { %6845 = vpow2.f32 %v5721_v41 }
 0x650   :  { %v6846_v35 = vpop.eup %6845 }
 0x651   :  { %v5190_v36 = vadd.f32 1.0, %v6846_v35 }
 0x653   :  { %6847 = vrcp.f32 %v5190_v36 }
 0x65d   :  { %v6848_v37 = vpop.eup %6847 }
 0x65e   :  { %5193 = vst [vmem:[%s8438_s11] sm:$0xff] %v6848_v37 }
 0x65f   :  { %5198 = vsyncpa [#allocation3], 1 }
 0x660   :  { %5199 = vsyncpa [#allocation5], 1 }
 0x661   :  { %5200 = vsyncpa [#allocation8], 1 }

</bundles_post_ra>
